<compile_context>
chip_gen: v7x
topology: tpu7x:2x2x1
jax: 0.10.0
libtpu: 0.0.40
codegen_flags: <defaults>
</compile_context>

<pallas_src>
import jax
import jax.numpy as jnp
from jax import lax
from jax.experimental import pallas as pl
from jax.experimental.pallas import tpu as pltpu


def _round_up(n, m):
    return ((n + m - 1) // m) * m


def _make_kernel(T, Bp, Hp):
    """Build the BiLSTM kernel with static T (seq len), Bp (padded batch), Hp (padded H)."""
    G4 = 4 * Hp  # per-direction gate width (lane-aligned)

    def kernel(emb_ref, wih_ref, b_ref, whh_f_ref, whh_b_ref,
               wfc_f_ref, wfc_b_ref, bfc_ref, out_ref, xproj_ref):
        # ---- Hoisted, fused input projection: one big matmul for BOTH directions ----
        # emb: (T*Bp, Ep) bf16 ; wih: (Ep, 8Hp) bf16 ; result + fused bias -> f32 scratch.
        xproj_ref[...] = (jnp.dot(emb_ref[...], wih_ref[...],
                                  preferred_element_type=jnp.float32)
                          + b_ref[...])                           # (T*Bp, 8Hp) f32

        whh_f = whh_f_ref[...]                                    # (Hp, 4Hp) bf16, pre-T
        whh_b = whh_b_ref[...]

        def gate_update(gates, c):
            # PyTorch gate order [i, f, g, o]; each Hp-wide slice is lane-aligned. All f32.
            i = jax.nn.sigmoid(gates[:, 0 * Hp:1 * Hp])
            f = jax.nn.sigmoid(gates[:, 1 * Hp:2 * Hp])
            g = jnp.tanh(gates[:, 2 * Hp:3 * Hp])
            o = jax.nn.sigmoid(gates[:, 3 * Hp:4 * Hp])
            c_new = f * c + i * g
            h_new = o * jnp.tanh(c_new)
            return h_new, c_new

        # ---- Fused fwd + bwd recurrence: only the tiny recurrent matmuls stay serial ----
        def body(t, carry):
            h_f, c_f, h_b, c_b = carry
            row_f = pl.multiple_of(t * Bp, Bp)
            row_b = pl.multiple_of((T - 1 - t) * Bp, Bp)
            x_f = xproj_ref[pl.ds(row_f, Bp), 0:G4]               # fwd half (lane-aligned)
            x_b = xproj_ref[pl.ds(row_b, Bp), G4:2 * G4]          # bwd half
            # bf16 recurrent matmuls with f32 accumulation; gate math stays f32.
            g_f = x_f + jnp.dot(h_f.astype(jnp.bfloat16), whh_f,
                                preferred_element_type=jnp.float32)
            g_b = x_b + jnp.dot(h_b.astype(jnp.bfloat16), whh_b,
                                preferred_element_type=jnp.float32)
            h_f, c_f = gate_update(g_f, c_f)
            h_b, c_b = gate_update(g_b, c_b)
            return h_f, c_f, h_b, c_b

        zeros = jnp.zeros((Bp, Hp), jnp.float32)
        h_f, _, h_b, _ = lax.fori_loop(
            0, T, body, (zeros, zeros, zeros, zeros),
            unroll=True if T <= 16 else 4)

        # Dropout(0.5) in eval mode is the identity.
        # Final Linear without an in-kernel concat: fc weight split per direction.
        out_ref[...] = (jnp.dot(h_f, wfc_f_ref[...], preferred_element_type=jnp.float32)
                        + jnp.dot(h_b, wfc_b_ref[...], preferred_element_type=jnp.float32)
                        + bfc_ref[...])                           # (Bp, Op) lane-dense store

    return kernel


def _pad_gate_weight(w_t, in_pad, H, Hp, dtype):
    """(in_dim, 4H) -> (in_pad, 4Hp); each gate block placed at a lane-aligned offset."""
    in_dim = w_t.shape[0]
    out = jnp.zeros((in_pad, 4 * Hp), dtype)
    for g in range(4):
        out = out.at[:in_dim, g * Hp:g * Hp + H].set(
            w_t[:, g * H:(g + 1) * H].astype(dtype))
    return out


def _pad_gate_bias(b, H, Hp):
    out = jnp.zeros((1, 4 * Hp), jnp.float32)
    for g in range(4):
        out = out.at[0, g * Hp:g * Hp + H].set(b[g * H:(g + 1) * H])
    return out


def init_params(key, vocab_size, embedding_dim, hidden_dim, output_dim, padding_idx):
    ks = jax.random.split(key, 11)
    s = 1.0 / jnp.sqrt(jnp.float32(hidden_dim))

    def u(k, shape):
        return jax.random.uniform(k, shape, jnp.float32, -s, s)

    emb = jax.random.normal(ks[0], (vocab_size, embedding_dim), jnp.float32)
    emb = emb.at[padding_idx].set(0.0)   # nn.Embedding padding_idx row = 0

    H = hidden_dim
    return dict(
        embedding=emb,
        w_ih_f=u(ks[1], (4 * H, embedding_dim)),
        w_hh_f=u(ks[2], (4 * H, H)),
        b_ih_f=u(ks[3], (4 * H,)),
        b_hh_f=u(ks[4], (4 * H,)),
        w_ih_b=u(ks[5], (4 * H, embedding_dim)),
        w_hh_b=u(ks[6], (4 * H, H)),
        b_ih_b=u(ks[7], (4 * H,)),
        b_hh_b=u(ks[8], (4 * H,)),
        fc_w=u(ks[9], (output_dim, 2 * H)),
        fc_b=u(ks[10], (output_dim,)),
    )


def sentiment_forward(x_tokens, params):
    """x_tokens: int32 (B, T) token ids. Returns (B, output_dim) float32.

    Note: bf16 is used for the embedding gather, the input projection and the recurrent
    matmuls (f32 accumulation / gate math) -> ~1e-2 relative deviation vs an all-f32
    reference; appropriate for inference.
    """
    B, T = x_tokens.shape
    E = params['embedding'].shape[1]
    H = params['w_hh_f'].shape[1]
    O = params['fc_b'].shape[-1]

    Bp = _round_up(max(B, 8), 8)       # sublane-aligned batch
    Ep = _round_up(E, 128)             # lane-aligned embedding dim
    Hp = _round_up(H, 128)             # each of the 4 gates is lane-aligned
    Op = _round_up(O, 128)             # unmasked output store; sliced back below
    # TODO(synk): for H << 128 configs, pack the 4 gates into one 128-lane block instead of
    # per-gate Hp padding (quarters EUP/VPU gate work); deployed H=256 keeps this layout.

    # Embedding gather in bf16 + (B,T,E)->(T,B,E) as XLA glue (halves gather/pad HBM bytes).
    emb_bf16 = params['embedding'].astype(jnp.bfloat16)
    embedded = jnp.take(emb_bf16, x_tokens, axis=0)                       # (B, T, E) bf16
    emb_tbe = jnp.transpose(embedded, (1, 0, 2))                          # (T, B, E)
    emb_pad = jnp.zeros((T, Bp, Ep), jnp.bfloat16).at[:, :B, :E].set(emb_tbe)
    emb_2d = emb_pad.reshape(T * Bp, Ep)                                  # (T*Bp, Ep) bf16

    # Pre-transposed, gate-block-padded weights (done once in XLA, outside the kernel).
    wih_f = _pad_gate_weight(params['w_ih_f'].T, Ep, H, Hp, jnp.bfloat16)  # (Ep, 4Hp)
    wih_b = _pad_gate_weight(params['w_ih_b'].T, Ep, H, Hp, jnp.bfloat16)
    wih = jnp.concatenate([wih_f, wih_b], axis=1)                          # (Ep, 8Hp) fused
    b_f = _pad_gate_bias(params['b_ih_f'] + params['b_hh_f'], H, Hp)       # (1, 4Hp)
    b_b = _pad_gate_bias(params['b_ih_b'] + params['b_hh_b'], H, Hp)
    b_fused = jnp.concatenate([b_f, b_b], axis=1)                          # (1, 8Hp)

    whh_f = _pad_gate_weight(params['w_hh_f'].T, Hp, H, Hp, jnp.bfloat16)  # (Hp, 4Hp) bf16
    whh_b = _pad_gate_weight(params['w_hh_b'].T, Hp, H, Hp, jnp.bfloat16)

    fc_wT = params['fc_w'].T                                               # (2H, O)
    wfc_f = jnp.zeros((Hp, Op), jnp.float32).at[:H, :O].set(fc_wT[:H])
    wfc_b = jnp.zeros((Hp, Op), jnp.float32).at[:H, :O].set(fc_wT[H:2 * H])
    bfc = jnp.zeros((1, Op), jnp.float32).at[0, :O].set(params['fc_b'])

    vmem = pl.BlockSpec(memory_space=pltpu.MemorySpace.VMEM)
    out_pad = pl.pallas_call(
        _make_kernel(T, Bp, Hp),
        out_shape=jax.ShapeDtypeStruct((Bp, Op), jnp.float32),
        in_specs=[vmem] * 8,
        out_specs=vmem,
        scratch_shapes=[pltpu.VMEM((T * Bp, 8 * Hp), jnp.float32)],   # fused xproj (both dirs)
        compiler_params=pltpu.CompilerParams(vmem_limit_bytes=48 * 1024 * 1024),
    )(emb_2d, wih, b_fused, whh_f, whh_b, wfc_f, wfc_b, bfc)

    return out_pad[:B, :O]


if __name__ == "__main__":
    # Small shapes consistent with the module's forward:
    vocab_size = 50
    embedding_dim = 32
    hidden_dim = 32
    output_dim = 3
    padding_idx = 0
    batch, seq = 2, 8

    key = jax.random.PRNGKey(0)
    k_params, k_tok = jax.random.split(key)
    params = init_params(k_params, vocab_size, embedding_dim, hidden_dim,
                         output_dim, padding_idx)
    x = jax.random.randint(k_tok, (batch, seq), 0, vocab_size, dtype=jnp.int32)

    out = sentiment_forward(x, params)
    out = jax.block_until_ready(out)
    assert out.shape == (batch, output_dim)
    assert out.dtype == jnp.float32
    print("KERNEL_OK")
</pallas_src>

<mosaic_0001>
module attributes {stable_mosaic.version = 11 : i64} {
  func.func @kernel(%arg0: memref<64x128xbf16, #tpu.memory_space<vmem>>, %arg1: memref<128x1024xbf16, #tpu.memory_space<vmem>>, %arg2: memref<1x1024xf32, #tpu.memory_space<vmem>>, %arg3: memref<128x512xbf16, #tpu.memory_space<vmem>>, %arg4: memref<128x512xbf16, #tpu.memory_space<vmem>>, %arg5: memref<128x128xf32, #tpu.memory_space<vmem>>, %arg6: memref<128x128xf32, #tpu.memory_space<vmem>>, %arg7: memref<1x128xf32, #tpu.memory_space<vmem>>, %arg8: memref<8x128xf32, #tpu.memory_space<vmem>>, %arg9: memref<64x1024xf32, #tpu.memory_space<vmem>>) attributes {dimension_semantics = [], scalar_prefetch = 0 : i64, scratch_operands = 1 : i64, tpu.core_type = #tpu.core_type<tc>} {
    %c0 = arith.constant 0 : index
    %c0_0 = arith.constant 0 : index
    %0 = vector.load %arg0[%c0, %c0_0] : memref<64x128xbf16, #tpu.memory_space<vmem>>, vector<64x128xbf16>
    %c0_1 = arith.constant 0 : index
    %c0_2 = arith.constant 0 : index
    %1 = vector.load %arg1[%c0_1, %c0_2] : memref<128x1024xbf16, #tpu.memory_space<vmem>>, vector<128x1024xbf16>
    %cst = arith.constant dense<0.000000e+00> : vector<64x1024xf32>
    %2 = tpu.matmul %0, %1, %cst {dimension_numbers = #tpu.dot_dimension_numbers<[1], [0], [0], [1], [0, 0, 1, 1], [], []>} : vector<64x128xbf16>, vector<128x1024xbf16>, vector<64x1024xf32> -> vector<64x1024xf32>
    %c0_3 = arith.constant 0 : index
    %c0_4 = arith.constant 0 : index
    %3 = vector.load %arg2[%c0_3, %c0_4] : memref<1x1024xf32, #tpu.memory_space<vmem>>, vector<1x1024xf32>
    %4 = vector.broadcast %3 : vector<1x1024xf32> to vector<64x1024xf32>
    %5 = arith.addf %2, %4 : vector<64x1024xf32>
    %c0_5 = arith.constant 0 : index
    %c0_6 = arith.constant 0 : index
    %6 = vector.load %arg9[%c0_5, %c0_6] : memref<64x1024xf32, #tpu.memory_space<vmem>>, vector<64x1024xf32>
    tpu.vector_store %arg9[%c0_5, %c0_6], %5 {strides = array<i32>} : memref<64x1024xf32, #tpu.memory_space<vmem>>, vector<64x1024xf32>,
    %c0_7 = arith.constant 0 : index
    %c0_8 = arith.constant 0 : index
    %7 = vector.load %arg3[%c0_7, %c0_8] : memref<128x512xbf16, #tpu.memory_space<vmem>>, vector<128x512xbf16>
    %c0_9 = arith.constant 0 : index
    %c0_10 = arith.constant 0 : index
    %8 = vector.load %arg4[%c0_9, %c0_10] : memref<128x512xbf16, #tpu.memory_space<vmem>>, vector<128x512xbf16>
    %cst_11 = arith.constant 0.000000e+00 : f32
    %9 = vector.broadcast %cst_11 : f32 to vector<8x128xf32>
    %c0_i32 = arith.constant 0 : i32
    %c8_i32 = arith.constant 8 : i32
    %10 = arith.muli %c0_i32, %c8_i32 : i32
    %11 = tpu.assume_multiple %10, 8 : i32
    %c7_i32 = arith.constant 7 : i32
    %12 = arith.subi %c7_i32, %c0_i32 : i32
    %c8_i32_12 = arith.constant 8 : i32
    %13 = arith.muli %12, %c8_i32_12 : i32
    %14 = tpu.assume_multiple %13, 8 : i32
    %15 = arith.index_cast %11 : i32 to index
    %c0_13 = arith.constant 0 : index
    %16 = vector.load %arg9[%15, %c0_13] : memref<64x1024xf32, #tpu.memory_space<vmem>>, vector<8x512xf32>
    %17 = arith.index_cast %14 : i32 to index
    %c512 = arith.constant 512 : index
    %18 = vector.load %arg9[%17, %c512] : memref<64x1024xf32, #tpu.memory_space<vmem>>, vector<8x512xf32>
    %19 = arith.truncf %9 : vector<8x128xf32> to vector<8x128xbf16>
    %cst_14 = arith.constant dense<0.000000e+00> : vector<8x512xf32>
    %20 = tpu.matmul %19, %7, %cst_14 {dimension_numbers = #tpu.dot_dimension_numbers<[1], [0], [0], [1], [0, 0, 1, 1], [], []>} : vector<8x128xbf16>, vector<128x512xbf16>, vector<8x512xf32> -> vector<8x512xf32>
    %21 = arith.addf %16, %20 : vector<8x512xf32>
    %22 = arith.truncf %9 : vector<8x128xf32> to vector<8x128xbf16>
    %cst_15 = arith.constant dense<0.000000e+00> : vector<8x512xf32>
    %23 = tpu.matmul %22, %8, %cst_15 {dimension_numbers = #tpu.dot_dimension_numbers<[1], [0], [0], [1], [0, 0, 1, 1], [], []>} : vector<8x128xbf16>, vector<128x512xbf16>, vector<8x512xf32> -> vector<8x512xf32>
    %24 = arith.addf %18, %23 : vector<8x512xf32>
    %25 = vector.extract_strided_slice %21 {offsets = [0, 0], sizes = [8, 128], strides = [1, 1]} : vector<8x512xf32> to vector<8x128xf32>
    %26 = arith.negf %25 : vector<8x128xf32>
    %27 = math.exp %26 : vector<8x128xf32>
    %cst_16 = arith.constant 1.000000e+00 : f32
    %28 = vector.broadcast %cst_16 : f32 to vector<8x128xf32>
    %29 = arith.addf %28, %27 : vector<8x128xf32>
    %30 = arith.divf %28, %29 : vector<8x128xf32>
    %31 = vector.extract_strided_slice %21 {offsets = [0, 128], sizes = [8, 128], strides = [1, 1]} : vector<8x512xf32> to vector<8x128xf32>
    %32 = arith.negf %31 : vector<8x128xf32>
    %33 = math.exp %32 : vector<8x128xf32>
    %cst_17 = arith.constant 1.000000e+00 : f32
    %34 = vector.broadcast %cst_17 : f32 to vector<8x128xf32>
    %35 = arith.addf %34, %33 : vector<8x128xf32>
    %36 = arith.divf %34, %35 : vector<8x128xf32>
    %37 = vector.extract_strided_slice %21 {offsets = [0, 256], sizes = [8, 128], strides = [1, 1]} : vector<8x512xf32> to vector<8x128xf32>
    %38 = math.tanh %37 : vector<8x128xf32>
    %39 = vector.extract_strided_slice %21 {offsets = [0, 384], sizes = [8, 128], strides = [1, 1]} : vector<8x512xf32> to vector<8x128xf32>
    %40 = arith.negf %39 : vector<8x128xf32>
    %41 = math.exp %40 : vector<8x128xf32>
    %cst_18 = arith.constant 1.000000e+00 : f32
    %42 = vector.broadcast %cst_18 : f32 to vector<8x128xf32>
    %43 = arith.addf %42, %41 : vector<8x128xf32>
    %44 = arith.divf %42, %43 : vector<8x128xf32>
    %45 = arith.mulf %36, %9 : vector<8x128xf32>
    %46 = arith.mulf %30, %38 : vector<8x128xf32>
    %47 = arith.addf %45, %46 : vector<8x128xf32>
    %48 = math.tanh %47 : vector<8x128xf32>
    %49 = arith.mulf %44, %48 : vector<8x128xf32>
    %50 = vector.extract_strided_slice %24 {offsets = [0, 0], sizes = [8, 128], strides = [1, 1]} : vector<8x512xf32> to vector<8x128xf32>
    %51 = arith.negf %50 : vector<8x128xf32>
    %52 = math.exp %51 : vector<8x128xf32>
    %cst_19 = arith.constant 1.000000e+00 : f32
    %53 = vector.broadcast %cst_19 : f32 to vector<8x128xf32>
    %54 = arith.addf %53, %52 : vector<8x128xf32>
    %55 = arith.divf %53, %54 : vector<8x128xf32>
    %56 = vector.extract_strided_slice %24 {offsets = [0, 128], sizes = [8, 128], strides = [1, 1]} : vector<8x512xf32> to vector<8x128xf32>
    %57 = arith.negf %56 : vector<8x128xf32>
    %58 = math.exp %57 : vector<8x128xf32>
    %cst_20 = arith.constant 1.000000e+00 : f32
    %59 = vector.broadcast %cst_20 : f32 to vector<8x128xf32>
    %60 = arith.addf %59, %58 : vector<8x128xf32>
    %61 = arith.divf %59, %60 : vector<8x128xf32>
    %62 = vector.extract_strided_slice %24 {offsets = [0, 256], sizes = [8, 128], strides = [1, 1]} : vector<8x512xf32> to vector<8x128xf32>
    %63 = math.tanh %62 : vector<8x128xf32>
    %64 = vector.extract_strided_slice %24 {offsets = [0, 384], sizes = [8, 128], strides = [1, 1]} : vector<8x512xf32> to vector<8x128xf32>
    %65 = arith.negf %64 : vector<8x128xf32>
    %66 = math.exp %65 : vector<8x128xf32>
    %cst_21 = arith.constant 1.000000e+00 : f32
    %67 = vector.broadcast %cst_21 : f32 to vector<8x128xf32>
    %68 = arith.addf %67, %66 : vector<8x128xf32>
    %69 = arith.divf %67, %68 : vector<8x128xf32>
    %70 = arith.mulf %61, %9 : vector<8x128xf32>
    %71 = arith.mulf %55, %63 : vector<8x128xf32>
    %72 = arith.addf %70, %71 : vector<8x128xf32>
    %73 = math.tanh %72 : vector<8x128xf32>
    %74 = arith.mulf %69, %73 : vector<8x128xf32>
    %c1_i32 = arith.constant 1 : i32
    %c8_i32_22 = arith.constant 8 : i32
    %75 = arith.muli %c1_i32, %c8_i32_22 : i32
    %76 = tpu.assume_multiple %75, 8 : i32
    %c7_i32_23 = arith.constant 7 : i32
    %77 = arith.subi %c7_i32_23, %c1_i32 : i32
    %c8_i32_24 = arith.constant 8 : i32
    %78 = arith.muli %77, %c8_i32_24 : i32
    %79 = tpu.assume_multiple %78, 8 : i32
    %80 = arith.index_cast %76 : i32 to index
    %c0_25 = arith.constant 0 : index
    %81 = vector.load %arg9[%80, %c0_25] : memref<64x1024xf32, #tpu.memory_space<vmem>>, vector<8x512xf32>
    %82 = arith.index_cast %79 : i32 to index
    %c512_26 = arith.constant 512 : index
    %83 = vector.load %arg9[%82, %c512_26] : memref<64x1024xf32, #tpu.memory_space<vmem>>, vector<8x512xf32>
    %84 = arith.truncf %49 : vector<8x128xf32> to vector<8x128xbf16>
    %cst_27 = arith.constant dense<0.000000e+00> : vector<8x512xf32>
    %85 = tpu.matmul %84, %7, %cst_27 {dimension_numbers = #tpu.dot_dimension_numbers<[1], [0], [0], [1], [0, 0, 1, 1], [], []>} : vector<8x128xbf16>, vector<128x512xbf16>, vector<8x512xf32> -> vector<8x512xf32>
    %86 = arith.addf %81, %85 : vector<8x512xf32>
    %87 = arith.truncf %74 : vector<8x128xf32> to vector<8x128xbf16>
    %cst_28 = arith.constant dense<0.000000e+00> : vector<8x512xf32>
    %88 = tpu.matmul %87, %8, %cst_28 {dimension_numbers = #tpu.dot_dimension_numbers<[1], [0], [0], [1], [0, 0, 1, 1], [], []>} : vector<8x128xbf16>, vector<128x512xbf16>, vector<8x512xf32> -> vector<8x512xf32>
    %89 = arith.addf %83, %88 : vector<8x512xf32>
    %90 = vector.extract_strided_slice %86 {offsets = [0, 0], sizes = [8, 128], strides = [1, 1]} : vector<8x512xf32> to vector<8x128xf32>
    %91 = arith.negf %90 : vector<8x128xf32>
    %92 = math.exp %91 : vector<8x128xf32>
    %cst_29 = arith.constant 1.000000e+00 : f32
    %93 = vector.broadcast %cst_29 : f32 to vector<8x128xf32>
    %94 = arith.addf %93, %92 : vector<8x128xf32>
    %95 = arith.divf %93, %94 : vector<8x128xf32>
    %96 = vector.extract_strided_slice %86 {offsets = [0, 128], sizes = [8, 128], strides = [1, 1]} : vector<8x512xf32> to vector<8x128xf32>
    %97 = arith.negf %96 : vector<8x128xf32>
    %98 = math.exp %97 : vector<8x128xf32>
    %cst_30 = arith.constant 1.000000e+00 : f32
    %99 = vector.broadcast %cst_30 : f32 to vector<8x128xf32>
    %100 = arith.addf %99, %98 : vector<8x128xf32>
    %101 = arith.divf %99, %100 : vector<8x128xf32>
    %102 = vector.extract_strided_slice %86 {offsets = [0, 256], sizes = [8, 128], strides = [1, 1]} : vector<8x512xf32> to vector<8x128xf32>
    %103 = math.tanh %102 : vector<8x128xf32>
    %104 = vector.extract_strided_slice %86 {offsets = [0, 384], sizes = [8, 128], strides = [1, 1]} : vector<8x512xf32> to vector<8x128xf32>
    %105 = arith.negf %104 : vector<8x128xf32>
    %106 = math.exp %105 : vector<8x128xf32>
    %cst_31 = arith.constant 1.000000e+00 : f32
    %107 = vector.broadcast %cst_31 : f32 to vector<8x128xf32>
    %108 = arith.addf %107, %106 : vector<8x128xf32>
    %109 = arith.divf %107, %108 : vector<8x128xf32>
    %110 = arith.mulf %101, %47 : vector<8x128xf32>
    %111 = arith.mulf %95, %103 : vector<8x128xf32>
    %112 = arith.addf %110, %111 : vector<8x128xf32>
    %113 = math.tanh %112 : vector<8x128xf32>
    %114 = arith.mulf %109, %113 : vector<8x128xf32>
    %115 = vector.extract_strided_slice %89 {offsets = [0, 0], sizes = [8, 128], strides = [1, 1]} : vector<8x512xf32> to vector<8x128xf32>
    %116 = arith.negf %115 : vector<8x128xf32>
    %117 = math.exp %116 : vector<8x128xf32>
    %cst_32 = arith.constant 1.000000e+00 : f32
    %118 = vector.broadcast %cst_32 : f32 to vector<8x128xf32>
    %119 = arith.addf %118, %117 : vector<8x128xf32>
    %120 = arith.divf %118, %119 : vector<8x128xf32>
    %121 = vector.extract_strided_slice %89 {offsets = [0, 128], sizes = [8, 128], strides = [1, 1]} : vector<8x512xf32> to vector<8x128xf32>
    %122 = arith.negf %121 : vector<8x128xf32>
    %123 = math.exp %122 : vector<8x128xf32>
    %cst_33 = arith.constant 1.000000e+00 : f32
    %124 = vector.broadcast %cst_33 : f32 to vector<8x128xf32>
    %125 = arith.addf %124, %123 : vector<8x128xf32>
    %126 = arith.divf %124, %125 : vector<8x128xf32>
    %127 = vector.extract_strided_slice %89 {offsets = [0, 256], sizes = [8, 128], strides = [1, 1]} : vector<8x512xf32> to vector<8x128xf32>
    %128 = math.tanh %127 : vector<8x128xf32>
    %129 = vector.extract_strided_slice %89 {offsets = [0, 384], sizes = [8, 128], strides = [1, 1]} : vector<8x512xf32> to vector<8x128xf32>
    %130 = arith.negf %129 : vector<8x128xf32>
    %131 = math.exp %130 : vector<8x128xf32>
    %cst_34 = arith.constant 1.000000e+00 : f32
    %132 = vector.broadcast %cst_34 : f32 to vector<8x128xf32>
    %133 = arith.addf %132, %131 : vector<8x128xf32>
    %134 = arith.divf %132, %133 : vector<8x128xf32>
    %135 = arith.mulf %126, %72 : vector<8x128xf32>
    %136 = arith.mulf %120, %128 : vector<8x128xf32>
    %137 = arith.addf %135, %136 : vector<8x128xf32>
    %138 = math.tanh %137 : vector<8x128xf32>
    %139 = arith.mulf %134, %138 : vector<8x128xf32>
    %c2_i32 = arith.constant 2 : i32
    %c8_i32_35 = arith.constant 8 : i32
    %140 = arith.muli %c2_i32, %c8_i32_35 : i32
    %141 = tpu.assume_multiple %140, 8 : i32
    %c7_i32_36 = arith.constant 7 : i32
    %142 = arith.subi %c7_i32_36, %c2_i32 : i32
    %c8_i32_37 = arith.constant 8 : i32
    %143 = arith.muli %142, %c8_i32_37 : i32
    %144 = tpu.assume_multiple %143, 8 : i32
    %145 = arith.index_cast %141 : i32 to index
    %c0_38 = arith.constant 0 : index
    %146 = vector.load %arg9[%145, %c0_38] : memref<64x1024xf32, #tpu.memory_space<vmem>>, vector<8x512xf32>
    %147 = arith.index_cast %144 : i32 to index
    %c512_39 = arith.constant 512 : index
    %148 = vector.load %arg9[%147, %c512_39] : memref<64x1024xf32, #tpu.memory_space<vmem>>, vector<8x512xf32>
    %149 = arith.truncf %114 : vector<8x128xf32> to vector<8x128xbf16>
    %cst_40 = arith.constant dense<0.000000e+00> : vector<8x512xf32>
    %150 = tpu.matmul %149, %7, %cst_40 {dimension_numbers = #tpu.dot_dimension_numbers<[1], [0], [0], [1], [0, 0, 1, 1], [], []>} : vector<8x128xbf16>, vector<128x512xbf16>, vector<8x512xf32> -> vector<8x512xf32>
    %151 = arith.addf %146, %150 : vector<8x512xf32>
    %152 = arith.truncf %139 : vector<8x128xf32> to vector<8x128xbf16>
    %cst_41 = arith.constant dense<0.000000e+00> : vector<8x512xf32>
    %153 = tpu.matmul %152, %8, %cst_41 {dimension_numbers = #tpu.dot_dimension_numbers<[1], [0], [0], [1], [0, 0, 1, 1], [], []>} : vector<8x128xbf16>, vector<128x512xbf16>, vector<8x512xf32> -> vector<8x512xf32>
    %154 = arith.addf %148, %153 : vector<8x512xf32>
    %155 = vector.extract_strided_slice %151 {offsets = [0, 0], sizes = [8, 128], strides = [1, 1]} : vector<8x512xf32> to vector<8x128xf32>
    %156 = arith.negf %155 : vector<8x128xf32>
    %157 = math.exp %156 : vector<8x128xf32>
    %cst_42 = arith.constant 1.000000e+00 : f32
    %158 = vector.broadcast %cst_42 : f32 to vector<8x128xf32>
    %159 = arith.addf %158, %157 : vector<8x128xf32>
    %160 = arith.divf %158, %159 : vector<8x128xf32>
    %161 = vector.extract_strided_slice %151 {offsets = [0, 128], sizes = [8, 128], strides = [1, 1]} : vector<8x512xf32> to vector<8x128xf32>
    %162 = arith.negf %161 : vector<8x128xf32>
    %163 = math.exp %162 : vector<8x128xf32>
    %cst_43 = arith.constant 1.000000e+00 : f32
    %164 = vector.broadcast %cst_43 : f32 to vector<8x128xf32>
    %165 = arith.addf %164, %163 : vector<8x128xf32>
    %166 = arith.divf %164, %165 : vector<8x128xf32>
    %167 = vector.extract_strided_slice %151 {offsets = [0, 256], sizes = [8, 128], strides = [1, 1]} : vector<8x512xf32> to vector<8x128xf32>
    %168 = math.tanh %167 : vector<8x128xf32>
    %169 = vector.extract_strided_slice %151 {offsets = [0, 384], sizes = [8, 128], strides = [1, 1]} : vector<8x512xf32> to vector<8x128xf32>
    %170 = arith.negf %169 : vector<8x128xf32>
    %171 = math.exp %170 : vector<8x128xf32>
    %cst_44 = arith.constant 1.000000e+00 : f32
    %172 = vector.broadcast %cst_44 : f32 to vector<8x128xf32>
    %173 = arith.addf %172, %171 : vector<8x128xf32>
    %174 = arith.divf %172, %173 : vector<8x128xf32>
    %175 = arith.mulf %166, %112 : vector<8x128xf32>
    %176 = arith.mulf %160, %168 : vector<8x128xf32>
    %177 = arith.addf %175, %176 : vector<8x128xf32>
    %178 = math.tanh %177 : vector<8x128xf32>
    %179 = arith.mulf %174, %178 : vector<8x128xf32>
    %180 = vector.extract_strided_slice %154 {offsets = [0, 0], sizes = [8, 128], strides = [1, 1]} : vector<8x512xf32> to vector<8x128xf32>
    %181 = arith.negf %180 : vector<8x128xf32>
    %182 = math.exp %181 : vector<8x128xf32>
    %cst_45 = arith.constant 1.000000e+00 : f32
    %183 = vector.broadcast %cst_45 : f32 to vector<8x128xf32>
    %184 = arith.addf %183, %182 : vector<8x128xf32>
    %185 = arith.divf %183, %184 : vector<8x128xf32>
    %186 = vector.extract_strided_slice %154 {offsets = [0, 128], sizes = [8, 128], strides = [1, 1]} : vector<8x512xf32> to vector<8x128xf32>
    %187 = arith.negf %186 : vector<8x128xf32>
    %188 = math.exp %187 : vector<8x128xf32>
    %cst_46 = arith.constant 1.000000e+00 : f32
    %189 = vector.broadcast %cst_46 : f32 to vector<8x128xf32>
    %190 = arith.addf %189, %188 : vector<8x128xf32>
    %191 = arith.divf %189, %190 : vector<8x128xf32>
    %192 = vector.extract_strided_slice %154 {offsets = [0, 256], sizes = [8, 128], strides = [1, 1]} : vector<8x512xf32> to vector<8x128xf32>
    %193 = math.tanh %192 : vector<8x128xf32>
    %194 = vector.extract_strided_slice %154 {offsets = [0, 384], sizes = [8, 128], strides = [1, 1]} : vector<8x512xf32> to vector<8x128xf32>
    %195 = arith.negf %194 : vector<8x128xf32>
    %196 = math.exp %195 : vector<8x128xf32>
    %cst_47 = arith.constant 1.000000e+00 : f32
    %197 = vector.broadcast %cst_47 : f32 to vector<8x128xf32>
    %198 = arith.addf %197, %196 : vector<8x128xf32>
    %199 = arith.divf %197, %198 : vector<8x128xf32>
    %200 = arith.mulf %191, %137 : vector<8x128xf32>
    %201 = arith.mulf %185, %193 : vector<8x128xf32>
    %202 = arith.addf %200, %201 : vector<8x128xf32>
    %203 = math.tanh %202 : vector<8x128xf32>
    %204 = arith.mulf %199, %203 : vector<8x128xf32>
    %c3_i32 = arith.constant 3 : i32
    %c8_i32_48 = arith.constant 8 : i32
    %205 = arith.muli %c3_i32, %c8_i32_48 : i32
    %206 = tpu.assume_multiple %205, 8 : i32
    %c7_i32_49 = arith.constant 7 : i32
    %207 = arith.subi %c7_i32_49, %c3_i32 : i32
    %c8_i32_50 = arith.constant 8 : i32
    %208 = arith.muli %207, %c8_i32_50 : i32
    %209 = tpu.assume_multiple %208, 8 : i32
    %210 = arith.index_cast %206 : i32 to index
    %c0_51 = arith.constant 0 : index
    %211 = vector.load %arg9[%210, %c0_51] : memref<64x1024xf32, #tpu.memory_space<vmem>>, vector<8x512xf32>
    %212 = arith.index_cast %209 : i32 to index
    %c512_52 = arith.constant 512 : index
    %213 = vector.load %arg9[%212, %c512_52] : memref<64x1024xf32, #tpu.memory_space<vmem>>, vector<8x512xf32>
    %214 = arith.truncf %179 : vector<8x128xf32> to vector<8x128xbf16>
    %cst_53 = arith.constant dense<0.000000e+00> : vector<8x512xf32>
    %215 = tpu.matmul %214, %7, %cst_53 {dimension_numbers = #tpu.dot_dimension_numbers<[1], [0], [0], [1], [0, 0, 1, 1], [], []>} : vector<8x128xbf16>, vector<128x512xbf16>, vector<8x512xf32> -> vector<8x512xf32>
    %216 = arith.addf %211, %215 : vector<8x512xf32>
    %217 = arith.truncf %204 : vector<8x128xf32> to vector<8x128xbf16>
    %cst_54 = arith.constant dense<0.000000e+00> : vector<8x512xf32>
    %218 = tpu.matmul %217, %8, %cst_54 {dimension_numbers = #tpu.dot_dimension_numbers<[1], [0], [0], [1], [0, 0, 1, 1], [], []>} : vector<8x128xbf16>, vector<128x512xbf16>, vector<8x512xf32> -> vector<8x512xf32>
    %219 = arith.addf %213, %218 : vector<8x512xf32>
    %220 = vector.extract_strided_slice %216 {offsets = [0, 0], sizes = [8, 128], strides = [1, 1]} : vector<8x512xf32> to vector<8x128xf32>
    %221 = arith.negf %220 : vector<8x128xf32>
    %222 = math.exp %221 : vector<8x128xf32>
    %cst_55 = arith.constant 1.000000e+00 : f32
    %223 = vector.broadcast %cst_55 : f32 to vector<8x128xf32>
    %224 = arith.addf %223, %222 : vector<8x128xf32>
    %225 = arith.divf %223, %224 : vector<8x128xf32>
    %226 = vector.extract_strided_slice %216 {offsets = [0, 128], sizes = [8, 128], strides = [1, 1]} : vector<8x512xf32> to vector<8x128xf32>
    %227 = arith.negf %226 : vector<8x128xf32>
    %228 = math.exp %227 : vector<8x128xf32>
    %cst_56 = arith.constant 1.000000e+00 : f32
    %229 = vector.broadcast %cst_56 : f32 to vector<8x128xf32>
    %230 = arith.addf %229, %228 : vector<8x128xf32>
    %231 = arith.divf %229, %230 : vector<8x128xf32>
    %232 = vector.extract_strided_slice %216 {offsets = [0, 256], sizes = [8, 128], strides = [1, 1]} : vector<8x512xf32> to vector<8x128xf32>
    %233 = math.tanh %232 : vector<8x128xf32>
    %234 = vector.extract_strided_slice %216 {offsets = [0, 384], sizes = [8, 128], strides = [1, 1]} : vector<8x512xf32> to vector<8x128xf32>
    %235 = arith.negf %234 : vector<8x128xf32>
    %236 = math.exp %235 : vector<8x128xf32>
    %cst_57 = arith.constant 1.000000e+00 : f32
    %237 = vector.broadcast %cst_57 : f32 to vector<8x128xf32>
    %238 = arith.addf %237, %236 : vector<8x128xf32>
    %239 = arith.divf %237, %238 : vector<8x128xf32>
    %240 = arith.mulf %231, %177 : vector<8x128xf32>
    %241 = arith.mulf %225, %233 : vector<8x128xf32>
    %242 = arith.addf %240, %241 : vector<8x128xf32>
    %243 = math.tanh %242 : vector<8x128xf32>
    %244 = arith.mulf %239, %243 : vector<8x128xf32>
    %245 = vector.extract_strided_slice %219 {offsets = [0, 0], sizes = [8, 128], strides = [1, 1]} : vector<8x512xf32> to vector<8x128xf32>
    %246 = arith.negf %245 : vector<8x128xf32>
    %247 = math.exp %246 : vector<8x128xf32>
    %cst_58 = arith.constant 1.000000e+00 : f32
    %248 = vector.broadcast %cst_58 : f32 to vector<8x128xf32>
    %249 = arith.addf %248, %247 : vector<8x128xf32>
    %250 = arith.divf %248, %249 : vector<8x128xf32>
    %251 = vector.extract_strided_slice %219 {offsets = [0, 128], sizes = [8, 128], strides = [1, 1]} : vector<8x512xf32> to vector<8x128xf32>
    %252 = arith.negf %251 : vector<8x128xf32>
    %253 = math.exp %252 : vector<8x128xf32>
    %cst_59 = arith.constant 1.000000e+00 : f32
    %254 = vector.broadcast %cst_59 : f32 to vector<8x128xf32>
    %255 = arith.addf %254, %253 : vector<8x128xf32>
    %256 = arith.divf %254, %255 : vector<8x128xf32>
    %257 = vector.extract_strided_slice %219 {offsets = [0, 256], sizes = [8, 128], strides = [1, 1]} : vector<8x512xf32> to vector<8x128xf32>
    %258 = math.tanh %257 : vector<8x128xf32>
    %259 = vector.extract_strided_slice %219 {offsets = [0, 384], sizes = [8, 128], strides = [1, 1]} : vector<8x512xf32> to vector<8x128xf32>
    %260 = arith.negf %259 : vector<8x128xf32>
    %261 = math.exp %260 : vector<8x128xf32>
    %cst_60 = arith.constant 1.000000e+00 : f32
    %262 = vector.broadcast %cst_60 : f32 to vector<8x128xf32>
    %263 = arith.addf %262, %261 : vector<8x128xf32>
    %264 = arith.divf %262, %263 : vector<8x128xf32>
    %265 = arith.mulf %256, %202 : vector<8x128xf32>
    %266 = arith.mulf %250, %258 : vector<8x128xf32>
    %267 = arith.addf %265, %266 : vector<8x128xf32>
    %268 = math.tanh %267 : vector<8x128xf32>
    %269 = arith.mulf %264, %268 : vector<8x128xf32>
    %c4_i32 = arith.constant 4 : i32
    %c8_i32_61 = arith.constant 8 : i32
    %270 = arith.muli %c4_i32, %c8_i32_61 : i32
    %271 = tpu.assume_multiple %270, 8 : i32
    %c7_i32_62 = arith.constant 7 : i32
    %272 = arith.subi %c7_i32_62, %c4_i32 : i32
    %c8_i32_63 = arith.constant 8 : i32
    %273 = arith.muli %272, %c8_i32_63 : i32
    %274 = tpu.assume_multiple %273, 8 : i32
    %275 = arith.index_cast %271 : i32 to index
    %c0_64 = arith.constant 0 : index
    %276 = vector.load %arg9[%275, %c0_64] : memref<64x1024xf32, #tpu.memory_space<vmem>>, vector<8x512xf32>
    %277 = arith.index_cast %274 : i32 to index
    %c512_65 = arith.constant 512 : index
    %278 = vector.load %arg9[%277, %c512_65] : memref<64x1024xf32, #tpu.memory_space<vmem>>, vector<8x512xf32>
    %279 = arith.truncf %244 : vector<8x128xf32> to vector<8x128xbf16>
    %cst_66 = arith.constant dense<0.000000e+00> : vector<8x512xf32>
    %280 = tpu.matmul %279, %7, %cst_66 {dimension_numbers = #tpu.dot_dimension_numbers<[1], [0], [0], [1], [0, 0, 1, 1], [], []>} : vector<8x128xbf16>, vector<128x512xbf16>, vector<8x512xf32> -> vector<8x512xf32>
    %281 = arith.addf %276, %280 : vector<8x512xf32>
    %282 = arith.truncf %269 : vector<8x128xf32> to vector<8x128xbf16>
    %cst_67 = arith.constant dense<0.000000e+00> : vector<8x512xf32>
    %283 = tpu.matmul %282, %8, %cst_67 {dimension_numbers = #tpu.dot_dimension_numbers<[1], [0], [0], [1], [0, 0, 1, 1], [], []>} : vector<8x128xbf16>, vector<128x512xbf16>, vector<8x512xf32> -> vector<8x512xf32>
    %284 = arith.addf %278, %283 : vector<8x512xf32>
    %285 = vector.extract_strided_slice %281 {offsets = [0, 0], sizes = [8, 128], strides = [1, 1]} : vector<8x512xf32> to vector<8x128xf32>
    %286 = arith.negf %285 : vector<8x128xf32>
    %287 = math.exp %286 : vector<8x128xf32>
    %cst_68 = arith.constant 1.000000e+00 : f32
    %288 = vector.broadcast %cst_68 : f32 to vector<8x128xf32>
    %289 = arith.addf %288, %287 : vector<8x128xf32>
    %290 = arith.divf %288, %289 : vector<8x128xf32>
    %291 = vector.extract_strided_slice %281 {offsets = [0, 128], sizes = [8, 128], strides = [1, 1]} : vector<8x512xf32> to vector<8x128xf32>
    %292 = arith.negf %291 : vector<8x128xf32>
    %293 = math.exp %292 : vector<8x128xf32>
    %cst_69 = arith.constant 1.000000e+00 : f32
    %294 = vector.broadcast %cst_69 : f32 to vector<8x128xf32>
    %295 = arith.addf %294, %293 : vector<8x128xf32>
    %296 = arith.divf %294, %295 : vector<8x128xf32>
    %297 = vector.extract_strided_slice %281 {offsets = [0, 256], sizes = [8, 128], strides = [1, 1]} : vector<8x512xf32> to vector<8x128xf32>
    %298 = math.tanh %297 : vector<8x128xf32>
    %299 = vector.extract_strided_slice %281 {offsets = [0, 384], sizes = [8, 128], strides = [1, 1]} : vector<8x512xf32> to vector<8x128xf32>
    %300 = arith.negf %299 : vector<8x128xf32>
    %301 = math.exp %300 : vector<8x128xf32>
    %cst_70 = arith.constant 1.000000e+00 : f32
    %302 = vector.broadcast %cst_70 : f32 to vector<8x128xf32>
    %303 = arith.addf %302, %301 : vector<8x128xf32>
    %304 = arith.divf %302, %303 : vector<8x128xf32>
    %305 = arith.mulf %296, %242 : vector<8x128xf32>
    %306 = arith.mulf %290, %298 : vector<8x128xf32>
    %307 = arith.addf %305, %306 : vector<8x128xf32>
    %308 = math.tanh %307 : vector<8x128xf32>
    %309 = arith.mulf %304, %308 : vector<8x128xf32>
    %310 = vector.extract_strided_slice %284 {offsets = [0, 0], sizes = [8, 128], strides = [1, 1]} : vector<8x512xf32> to vector<8x128xf32>
    %311 = arith.negf %310 : vector<8x128xf32>
    %312 = math.exp %311 : vector<8x128xf32>
    %cst_71 = arith.constant 1.000000e+00 : f32
    %313 = vector.broadcast %cst_71 : f32 to vector<8x128xf32>
    %314 = arith.addf %313, %312 : vector<8x128xf32>
    %315 = arith.divf %313, %314 : vector<8x128xf32>
    %316 = vector.extract_strided_slice %284 {offsets = [0, 128], sizes = [8, 128], strides = [1, 1]} : vector<8x512xf32> to vector<8x128xf32>
    %317 = arith.negf %316 : vector<8x128xf32>
    %318 = math.exp %317 : vector<8x128xf32>
    %cst_72 = arith.constant 1.000000e+00 : f32
    %319 = vector.broadcast %cst_72 : f32 to vector<8x128xf32>
    %320 = arith.addf %319, %318 : vector<8x128xf32>
    %321 = arith.divf %319, %320 : vector<8x128xf32>
    %322 = vector.extract_strided_slice %284 {offsets = [0, 256], sizes = [8, 128], strides = [1, 1]} : vector<8x512xf32> to vector<8x128xf32>
    %323 = math.tanh %322 : vector<8x128xf32>
    %324 = vector.extract_strided_slice %284 {offsets = [0, 384], sizes = [8, 128], strides = [1, 1]} : vector<8x512xf32> to vector<8x128xf32>
    %325 = arith.negf %324 : vector<8x128xf32>
    %326 = math.exp %325 : vector<8x128xf32>
    %cst_73 = arith.constant 1.000000e+00 : f32
    %327 = vector.broadcast %cst_73 : f32 to vector<8x128xf32>
    %328 = arith.addf %327, %326 : vector<8x128xf32>
    %329 = arith.divf %327, %328 : vector<8x128xf32>
    %330 = arith.mulf %321, %267 : vector<8x128xf32>
    %331 = arith.mulf %315, %323 : vector<8x128xf32>
    %332 = arith.addf %330, %331 : vector<8x128xf32>
    %333 = math.tanh %332 : vector<8x128xf32>
    %334 = arith.mulf %329, %333 : vector<8x128xf32>
    %c5_i32 = arith.constant 5 : i32
    %c8_i32_74 = arith.constant 8 : i32
    %335 = arith.muli %c5_i32, %c8_i32_74 : i32
    %336 = tpu.assume_multiple %335, 8 : i32
    %c7_i32_75 = arith.constant 7 : i32
    %337 = arith.subi %c7_i32_75, %c5_i32 : i32
    %c8_i32_76 = arith.constant 8 : i32
    %338 = arith.muli %337, %c8_i32_76 : i32
    %339 = tpu.assume_multiple %338, 8 : i32
    %340 = arith.index_cast %336 : i32 to index
    %c0_77 = arith.constant 0 : index
    %341 = vector.load %arg9[%340, %c0_77] : memref<64x1024xf32, #tpu.memory_space<vmem>>, vector<8x512xf32>
    %342 = arith.index_cast %339 : i32 to index
    %c512_78 = arith.constant 512 : index
    %343 = vector.load %arg9[%342, %c512_78] : memref<64x1024xf32, #tpu.memory_space<vmem>>, vector<8x512xf32>
    %344 = arith.truncf %309 : vector<8x128xf32> to vector<8x128xbf16>
    %cst_79 = arith.constant dense<0.000000e+00> : vector<8x512xf32>
    %345 = tpu.matmul %344, %7, %cst_79 {dimension_numbers = #tpu.dot_dimension_numbers<[1], [0], [0], [1], [0, 0, 1, 1], [], []>} : vector<8x128xbf16>, vector<128x512xbf16>, vector<8x512xf32> -> vector<8x512xf32>
    %346 = arith.addf %341, %345 : vector<8x512xf32>
    %347 = arith.truncf %334 : vector<8x128xf32> to vector<8x128xbf16>
    %cst_80 = arith.constant dense<0.000000e+00> : vector<8x512xf32>
    %348 = tpu.matmul %347, %8, %cst_80 {dimension_numbers = #tpu.dot_dimension_numbers<[1], [0], [0], [1], [0, 0, 1, 1], [], []>} : vector<8x128xbf16>, vector<128x512xbf16>, vector<8x512xf32> -> vector<8x512xf32>
    %349 = arith.addf %343, %348 : vector<8x512xf32>
    %350 = vector.extract_strided_slice %346 {offsets = [0, 0], sizes = [8, 128], strides = [1, 1]} : vector<8x512xf32> to vector<8x128xf32>
    %351 = arith.negf %350 : vector<8x128xf32>
    %352 = math.exp %351 : vector<8x128xf32>
    %cst_81 = arith.constant 1.000000e+00 : f32
    %353 = vector.broadcast %cst_81 : f32 to vector<8x128xf32>
    %354 = arith.addf %353, %352 : vector<8x128xf32>
    %355 = arith.divf %353, %354 : vector<8x128xf32>
    %356 = vector.extract_strided_slice %346 {offsets = [0, 128], sizes = [8, 128], strides = [1, 1]} : vector<8x512xf32> to vector<8x128xf32>
    %357 = arith.negf %356 : vector<8x128xf32>
    %358 = math.exp %357 : vector<8x128xf32>
    %cst_82 = arith.constant 1.000000e+00 : f32
    %359 = vector.broadcast %cst_82 : f32 to vector<8x128xf32>
    %360 = arith.addf %359, %358 : vector<8x128xf32>
    %361 = arith.divf %359, %360 : vector<8x128xf32>
    %362 = vector.extract_strided_slice %346 {offsets = [0, 256], sizes = [8, 128], strides = [1, 1]} : vector<8x512xf32> to vector<8x128xf32>
    %363 = math.tanh %362 : vector<8x128xf32>
    %364 = vector.extract_strided_slice %346 {offsets = [0, 384], sizes = [8, 128], strides = [1, 1]} : vector<8x512xf32> to vector<8x128xf32>
    %365 = arith.negf %364 : vector<8x128xf32>
    %366 = math.exp %365 : vector<8x128xf32>
    %cst_83 = arith.constant 1.000000e+00 : f32
    %367 = vector.broadcast %cst_83 : f32 to vector<8x128xf32>
    %368 = arith.addf %367, %366 : vector<8x128xf32>
    %369 = arith.divf %367, %368 : vector<8x128xf32>
    %370 = arith.mulf %361, %307 : vector<8x128xf32>
    %371 = arith.mulf %355, %363 : vector<8x128xf32>
    %372 = arith.addf %370, %371 : vector<8x128xf32>
    %373 = math.tanh %372 : vector<8x128xf32>
    %374 = arith.mulf %369, %373 : vector<8x128xf32>
    %375 = vector.extract_strided_slice %349 {offsets = [0, 0], sizes = [8, 128], strides = [1, 1]} : vector<8x512xf32> to vector<8x128xf32>
    %376 = arith.negf %375 : vector<8x128xf32>
    %377 = math.exp %376 : vector<8x128xf32>
    %cst_84 = arith.constant 1.000000e+00 : f32
    %378 = vector.broadcast %cst_84 : f32 to vector<8x128xf32>
    %379 = arith.addf %378, %377 : vector<8x128xf32>
    %380 = arith.divf %378, %379 : vector<8x128xf32>
    %381 = vector.extract_strided_slice %349 {offsets = [0, 128], sizes = [8, 128], strides = [1, 1]} : vector<8x512xf32> to vector<8x128xf32>
    %382 = arith.negf %381 : vector<8x128xf32>
    %383 = math.exp %382 : vector<8x128xf32>
    %cst_85 = arith.constant 1.000000e+00 : f32
    %384 = vector.broadcast %cst_85 : f32 to vector<8x128xf32>
    %385 = arith.addf %384, %383 : vector<8x128xf32>
    %386 = arith.divf %384, %385 : vector<8x128xf32>
    %387 = vector.extract_strided_slice %349 {offsets = [0, 256], sizes = [8, 128], strides = [1, 1]} : vector<8x512xf32> to vector<8x128xf32>
    %388 = math.tanh %387 : vector<8x128xf32>
    %389 = vector.extract_strided_slice %349 {offsets = [0, 384], sizes = [8, 128], strides = [1, 1]} : vector<8x512xf32> to vector<8x128xf32>
    %390 = arith.negf %389 : vector<8x128xf32>
    %391 = math.exp %390 : vector<8x128xf32>
    %cst_86 = arith.constant 1.000000e+00 : f32
    %392 = vector.broadcast %cst_86 : f32 to vector<8x128xf32>
    %393 = arith.addf %392, %391 : vector<8x128xf32>
    %394 = arith.divf %392, %393 : vector<8x128xf32>
    %395 = arith.mulf %386, %332 : vector<8x128xf32>
    %396 = arith.mulf %380, %388 : vector<8x128xf32>
    %397 = arith.addf %395, %396 : vector<8x128xf32>
    %398 = math.tanh %397 : vector<8x128xf32>
    %399 = arith.mulf %394, %398 : vector<8x128xf32>
    %c6_i32 = arith.constant 6 : i32
    %c8_i32_87 = arith.constant 8 : i32
    %400 = arith.muli %c6_i32, %c8_i32_87 : i32
    %401 = tpu.assume_multiple %400, 8 : i32
    %c7_i32_88 = arith.constant 7 : i32
    %402 = arith.subi %c7_i32_88, %c6_i32 : i32
    %c8_i32_89 = arith.constant 8 : i32
    %403 = arith.muli %402, %c8_i32_89 : i32
    %404 = tpu.assume_multiple %403, 8 : i32
    %405 = arith.index_cast %401 : i32 to index
    %c0_90 = arith.constant 0 : index
    %406 = vector.load %arg9[%405, %c0_90] : memref<64x1024xf32, #tpu.memory_space<vmem>>, vector<8x512xf32>
    %407 = arith.index_cast %404 : i32 to index
    %c512_91 = arith.constant 512 : index
    %408 = vector.load %arg9[%407, %c512_91] : memref<64x1024xf32, #tpu.memory_space<vmem>>, vector<8x512xf32>
    %409 = arith.truncf %374 : vector<8x128xf32> to vector<8x128xbf16>
    %cst_92 = arith.constant dense<0.000000e+00> : vector<8x512xf32>
    %410 = tpu.matmul %409, %7, %cst_92 {dimension_numbers = #tpu.dot_dimension_numbers<[1], [0], [0], [1], [0, 0, 1, 1], [], []>} : vector<8x128xbf16>, vector<128x512xbf16>, vector<8x512xf32> -> vector<8x512xf32>
    %411 = arith.addf %406, %410 : vector<8x512xf32>
    %412 = arith.truncf %399 : vector<8x128xf32> to vector<8x128xbf16>
    %cst_93 = arith.constant dense<0.000000e+00> : vector<8x512xf32>
    %413 = tpu.matmul %412, %8, %cst_93 {dimension_numbers = #tpu.dot_dimension_numbers<[1], [0], [0], [1], [0, 0, 1, 1], [], []>} : vector<8x128xbf16>, vector<128x512xbf16>, vector<8x512xf32> -> vector<8x512xf32>
    %414 = arith.addf %408, %413 : vector<8x512xf32>
    %415 = vector.extract_strided_slice %411 {offsets = [0, 0], sizes = [8, 128], strides = [1, 1]} : vector<8x512xf32> to vector<8x128xf32>
    %416 = arith.negf %415 : vector<8x128xf32>
    %417 = math.exp %416 : vector<8x128xf32>
    %cst_94 = arith.constant 1.000000e+00 : f32
    %418 = vector.broadcast %cst_94 : f32 to vector<8x128xf32>
    %419 = arith.addf %418, %417 : vector<8x128xf32>
    %420 = arith.divf %418, %419 : vector<8x128xf32>
    %421 = vector.extract_strided_slice %411 {offsets = [0, 128], sizes = [8, 128], strides = [1, 1]} : vector<8x512xf32> to vector<8x128xf32>
    %422 = arith.negf %421 : vector<8x128xf32>
    %423 = math.exp %422 : vector<8x128xf32>
    %cst_95 = arith.constant 1.000000e+00 : f32
    %424 = vector.broadcast %cst_95 : f32 to vector<8x128xf32>
    %425 = arith.addf %424, %423 : vector<8x128xf32>
    %426 = arith.divf %424, %425 : vector<8x128xf32>
    %427 = vector.extract_strided_slice %411 {offsets = [0, 256], sizes = [8, 128], strides = [1, 1]} : vector<8x512xf32> to vector<8x128xf32>
    %428 = math.tanh %427 : vector<8x128xf32>
    %429 = vector.extract_strided_slice %411 {offsets = [0, 384], sizes = [8, 128], strides = [1, 1]} : vector<8x512xf32> to vector<8x128xf32>
    %430 = arith.negf %429 : vector<8x128xf32>
    %431 = math.exp %430 : vector<8x128xf32>
    %cst_96 = arith.constant 1.000000e+00 : f32
    %432 = vector.broadcast %cst_96 : f32 to vector<8x128xf32>
    %433 = arith.addf %432, %431 : vector<8x128xf32>
    %434 = arith.divf %432, %433 : vector<8x128xf32>
    %435 = arith.mulf %426, %372 : vector<8x128xf32>
    %436 = arith.mulf %420, %428 : vector<8x128xf32>
    %437 = arith.addf %435, %436 : vector<8x128xf32>
    %438 = math.tanh %437 : vector<8x128xf32>
    %439 = arith.mulf %434, %438 : vector<8x128xf32>
    %440 = vector.extract_strided_slice %414 {offsets = [0, 0], sizes = [8, 128], strides = [1, 1]} : vector<8x512xf32> to vector<8x128xf32>
    %441 = arith.negf %440 : vector<8x128xf32>
    %442 = math.exp %441 : vector<8x128xf32>
    %cst_97 = arith.constant 1.000000e+00 : f32
    %443 = vector.broadcast %cst_97 : f32 to vector<8x128xf32>
    %444 = arith.addf %443, %442 : vector<8x128xf32>
    %445 = arith.divf %443, %444 : vector<8x128xf32>
    %446 = vector.extract_strided_slice %414 {offsets = [0, 128], sizes = [8, 128], strides = [1, 1]} : vector<8x512xf32> to vector<8x128xf32>
    %447 = arith.negf %446 : vector<8x128xf32>
    %448 = math.exp %447 : vector<8x128xf32>
    %cst_98 = arith.constant 1.000000e+00 : f32
    %449 = vector.broadcast %cst_98 : f32 to vector<8x128xf32>
    %450 = arith.addf %449, %448 : vector<8x128xf32>
    %451 = arith.divf %449, %450 : vector<8x128xf32>
    %452 = vector.extract_strided_slice %414 {offsets = [0, 256], sizes = [8, 128], strides = [1, 1]} : vector<8x512xf32> to vector<8x128xf32>
    %453 = math.tanh %452 : vector<8x128xf32>
    %454 = vector.extract_strided_slice %414 {offsets = [0, 384], sizes = [8, 128], strides = [1, 1]} : vector<8x512xf32> to vector<8x128xf32>
    %455 = arith.negf %454 : vector<8x128xf32>
    %456 = math.exp %455 : vector<8x128xf32>
    %cst_99 = arith.constant 1.000000e+00 : f32
    %457 = vector.broadcast %cst_99 : f32 to vector<8x128xf32>
    %458 = arith.addf %457, %456 : vector<8x128xf32>
    %459 = arith.divf %457, %458 : vector<8x128xf32>
    %460 = arith.mulf %451, %397 : vector<8x128xf32>
    %461 = arith.mulf %445, %453 : vector<8x128xf32>
    %462 = arith.addf %460, %461 : vector<8x128xf32>
    %463 = math.tanh %462 : vector<8x128xf32>
    %464 = arith.mulf %459, %463 : vector<8x128xf32>
    %c7_i32_100 = arith.constant 7 : i32
    %c8_i32_101 = arith.constant 8 : i32
    %465 = arith.muli %c7_i32_100, %c8_i32_101 : i32
    %466 = tpu.assume_multiple %465, 8 : i32
    %c7_i32_102 = arith.constant 7 : i32
    %467 = arith.subi %c7_i32_102, %c7_i32_100 : i32
    %c8_i32_103 = arith.constant 8 : i32
    %468 = arith.muli %467, %c8_i32_103 : i32
    %469 = tpu.assume_multiple %468, 8 : i32
    %470 = arith.index_cast %466 : i32 to index
    %c0_104 = arith.constant 0 : index
    %471 = vector.load %arg9[%470, %c0_104] : memref<64x1024xf32, #tpu.memory_space<vmem>>, vector<8x512xf32>
    %472 = arith.index_cast %469 : i32 to index
    %c512_105 = arith.constant 512 : index
    %473 = vector.load %arg9[%472, %c512_105] : memref<64x1024xf32, #tpu.memory_space<vmem>>, vector<8x512xf32>
    %474 = arith.truncf %439 : vector<8x128xf32> to vector<8x128xbf16>
    %cst_106 = arith.constant dense<0.000000e+00> : vector<8x512xf32>
    %475 = tpu.matmul %474, %7, %cst_106 {dimension_numbers = #tpu.dot_dimension_numbers<[1], [0], [0], [1], [0, 0, 1, 1], [], []>} : vector<8x128xbf16>, vector<128x512xbf16>, vector<8x512xf32> -> vector<8x512xf32>
    %476 = arith.addf %471, %475 : vector<8x512xf32>
    %477 = arith.truncf %464 : vector<8x128xf32> to vector<8x128xbf16>
    %cst_107 = arith.constant dense<0.000000e+00> : vector<8x512xf32>
    %478 = tpu.matmul %477, %8, %cst_107 {dimension_numbers = #tpu.dot_dimension_numbers<[1], [0], [0], [1], [0, 0, 1, 1], [], []>} : vector<8x128xbf16>, vector<128x512xbf16>, vector<8x512xf32> -> vector<8x512xf32>
    %479 = arith.addf %473, %478 : vector<8x512xf32>
    %480 = vector.extract_strided_slice %476 {offsets = [0, 0], sizes = [8, 128], strides = [1, 1]} : vector<8x512xf32> to vector<8x128xf32>
    %481 = arith.negf %480 : vector<8x128xf32>
    %482 = math.exp %481 : vector<8x128xf32>
    %cst_108 = arith.constant 1.000000e+00 : f32
    %483 = vector.broadcast %cst_108 : f32 to vector<8x128xf32>
    %484 = arith.addf %483, %482 : vector<8x128xf32>
    %485 = arith.divf %483, %484 : vector<8x128xf32>
    %486 = vector.extract_strided_slice %476 {offsets = [0, 128], sizes = [8, 128], strides = [1, 1]} : vector<8x512xf32> to vector<8x128xf32>
    %487 = arith.negf %486 : vector<8x128xf32>
    %488 = math.exp %487 : vector<8x128xf32>
    %cst_109 = arith.constant 1.000000e+00 : f32
    %489 = vector.broadcast %cst_109 : f32 to vector<8x128xf32>
    %490 = arith.addf %489, %488 : vector<8x128xf32>
    %491 = arith.divf %489, %490 : vector<8x128xf32>
    %492 = vector.extract_strided_slice %476 {offsets = [0, 256], sizes = [8, 128], strides = [1, 1]} : vector<8x512xf32> to vector<8x128xf32>
    %493 = math.tanh %492 : vector<8x128xf32>
    %494 = vector.extract_strided_slice %476 {offsets = [0, 384], sizes = [8, 128], strides = [1, 1]} : vector<8x512xf32> to vector<8x128xf32>
    %495 = arith.negf %494 : vector<8x128xf32>
    %496 = math.exp %495 : vector<8x128xf32>
    %cst_110 = arith.constant 1.000000e+00 : f32
    %497 = vector.broadcast %cst_110 : f32 to vector<8x128xf32>
    %498 = arith.addf %497, %496 : vector<8x128xf32>
    %499 = arith.divf %497, %498 : vector<8x128xf32>
    %500 = arith.mulf %491, %437 : vector<8x128xf32>
    %501 = arith.mulf %485, %493 : vector<8x128xf32>
    %502 = arith.addf %500, %501 : vector<8x128xf32>
    %503 = math.tanh %502 : vector<8x128xf32>
    %504 = arith.mulf %499, %503 : vector<8x128xf32>
    %505 = vector.extract_strided_slice %479 {offsets = [0, 0], sizes = [8, 128], strides = [1, 1]} : vector<8x512xf32> to vector<8x128xf32>
    %506 = arith.negf %505 : vector<8x128xf32>
    %507 = math.exp %506 : vector<8x128xf32>
    %cst_111 = arith.constant 1.000000e+00 : f32
    %508 = vector.broadcast %cst_111 : f32 to vector<8x128xf32>
    %509 = arith.addf %508, %507 : vector<8x128xf32>
    %510 = arith.divf %508, %509 : vector<8x128xf32>
    %511 = vector.extract_strided_slice %479 {offsets = [0, 128], sizes = [8, 128], strides = [1, 1]} : vector<8x512xf32> to vector<8x128xf32>
    %512 = arith.negf %511 : vector<8x128xf32>
    %513 = math.exp %512 : vector<8x128xf32>
    %cst_112 = arith.constant 1.000000e+00 : f32
    %514 = vector.broadcast %cst_112 : f32 to vector<8x128xf32>
    %515 = arith.addf %514, %513 : vector<8x128xf32>
    %516 = arith.divf %514, %515 : vector<8x128xf32>
    %517 = vector.extract_strided_slice %479 {offsets = [0, 256], sizes = [8, 128], strides = [1, 1]} : vector<8x512xf32> to vector<8x128xf32>
    %518 = math.tanh %517 : vector<8x128xf32>
    %519 = vector.extract_strided_slice %479 {offsets = [0, 384], sizes = [8, 128], strides = [1, 1]} : vector<8x512xf32> to vector<8x128xf32>
    %520 = arith.negf %519 : vector<8x128xf32>
    %521 = math.exp %520 : vector<8x128xf32>
    %cst_113 = arith.constant 1.000000e+00 : f32
    %522 = vector.broadcast %cst_113 : f32 to vector<8x128xf32>
    %523 = arith.addf %522, %521 : vector<8x128xf32>
    %524 = arith.divf %522, %523 : vector<8x128xf32>
    %525 = arith.mulf %516, %462 : vector<8x128xf32>
    %526 = arith.mulf %510, %518 : vector<8x128xf32>
    %527 = arith.addf %525, %526 : vector<8x128xf32>
    %528 = math.tanh %527 : vector<8x128xf32>
    %529 = arith.mulf %524, %528 : vector<8x128xf32>
    %c8_i32_114 = arith.constant 8 : i32
    %c0_115 = arith.constant 0 : index
    %c0_116 = arith.constant 0 : index
    %530 = vector.load %arg5[%c0_115, %c0_116] : memref<128x128xf32, #tpu.memory_space<vmem>>, vector<128x128xf32>
    %cst_117 = arith.constant dense<0.000000e+00> : vector<8x128xf32>
    %531 = tpu.matmul %504, %530, %cst_117 {dimension_numbers = #tpu.dot_dimension_numbers<[1], [0], [0], [1], [0, 0, 1, 1], [], []>} : vector<8x128xf32>, vector<128x128xf32>, vector<8x128xf32> -> vector<8x128xf32>
    %c0_118 = arith.constant 0 : index
    %c0_119 = arith.constant 0 : index
    %532 = vector.load %arg6[%c0_118, %c0_119] : memref<128x128xf32, #tpu.memory_space<vmem>>, vector<128x128xf32>
    %cst_120 = arith.constant dense<0.000000e+00> : vector<8x128xf32>
    %533 = tpu.matmul %529, %532, %cst_120 {dimension_numbers = #tpu.dot_dimension_numbers<[1], [0], [0], [1], [0, 0, 1, 1], [], []>} : vector<8x128xf32>, vector<128x128xf32>, vector<8x128xf32> -> vector<8x128xf32>
    %534 = arith.addf %531, %533 : vector<8x128xf32>
    %c0_121 = arith.constant 0 : index
    %c0_122 = arith.constant 0 : index
    %535 = vector.load %arg7[%c0_121, %c0_122] : memref<1x128xf32, #tpu.memory_space<vmem>>, vector<1x128xf32>
    %536 = vector.broadcast %535 : vector<1x128xf32> to vector<8x128xf32>
    %537 = arith.addf %534, %536 : vector<8x128xf32>
    %c0_123 = arith.constant 0 : index
    %c0_124 = arith.constant 0 : index
    %538 = vector.load %arg8[%c0_123, %c0_124] : memref<8x128xf32, #tpu.memory_space<vmem>>, vector<8x128xf32>
    tpu.vector_store %arg8[%c0_123, %c0_124], %537 {strides = array<i32>} : memref<8x128xf32, #tpu.memory_space<vmem>>, vector<8x128xf32>,
    return
  }
}

</mosaic_0001>

<bundles_post_ra>
// kernel: tpu_custom_call.1
= control target key start
LH: loop header
LB: loop body
LE: loop exit
PB: predicated region body
PF: predicated region fallthrough
CT: control target
= control target key end

     0   :  { %13 = vsyncpa [#allocation4], 0  ;;  %s5728_s0 = inlined_call_operand.hbm [shape: bf16[64,128], index: 0, kind: input, shape index: {}]   ;;  %s5729_s1 = inlined_call_operand.hbm [shape: bf16[128,1024], index: 1, kind: input, shape index: {}]   ;;  %s5730_s2 = inlined_call_operand.hbm [shape: f32[1,1024], index: 2, kind: input, shape index: {}]   ;;  %s5731_s3 = inlined_call_operand.hbm [shape: bf16[128,512], index: 3, kind: input, shape index: {}]   ;;  %s5732_s4 = inlined_call_operand.hbm [shape: bf16[128,512], index: 4, kind: input, shape index: {}]   ;;  %s5733_s5 = inlined_call_operand.hbm [shape: f32[128,128], index: 5, kind: input, shape index: {}]   ;;  %s5734_s6 = inlined_call_operand.hbm [shape: f32[128,128], index: 6, kind: input, shape index: {}]   ;;  %s5735_s7 = inlined_call_operand.vmem [shape: f32[1,128], index: 7, kind: input, shape index: {}]   ;;  %s5736_s8 = inlined_call_operand.hbm [shape: f32[8,128], index: 8, kind: output, shape index: {}]  }
   0x1   :  { %14 = vsyncpa [#allocation7], 0 }
   0x2   :  { %15 = vsyncpa [#allocation10], 0 }
   0x3   :  { %16 = vsyncpa [#allocation13], 0 }
   0x4   :  { %17 = vsyncpa [#allocation5], 0  ;;  %s4413_s27 = smov [#allocation6]   ;;  %s4227_s9 = scalar_lea.hbm %s5729_s1, 8192 }
   0x5   :  { %s35_s28 = sshll.u32 %s4413_s27, 4  ;;  %p4228_p0 = scmp.ne.s32.totalorder %s5729_s1, %s4227_s9  ;;  %s36_s28 = int_to_ptr.vmem [resolvable:$true] %s35_s28 }
   0x6   :  { %p4231_p1 = scmp.lt.u32.totalorder %s4227_s9, %s5729_s1 }
   0x8   :  { %p4233_p2 = pnand %p4231_p1, %p4228_p0 }
   0xa   :  { %4236 = shalt.err (!%p4233_p2)
}
   0xb   :  { %s4237_s14 = scalar_lea.vmem %s36_s28, 8192  ;;  %p4242_p4 = scmp.lt.s32.totalorder %s36_s28, %s36_s28 }
   0xc   :  { %p4238_p3 = scmp.ne.s32.totalorder %s36_s28, %s4237_s14  ;;  %p4243_p5 = scmp.lt.s32.totalorder %s4237_s14, %s4237_s14 }
   0xe   :  { %p4244_p6 = por %p4243_p5, %p4242_p4 }
  0x10   :  { %p4245_p7 = pnand %p4244_p6, %p4238_p3 }
  0x12   :  { %4248 = shalt.err (!%p4245_p7)
}
  0x13   :  { %s4414_s15 = smov 512   ;;  %s4415_s16 = smov 32  }
  0x14   :  { %41 = dma.hbm_to_vmem [thread:$0]  %s5729_s1, 8192, %s36_s28, [#allocation7], %s4414_s15, %s4414_s15, %s4415_s16  }
  0x15   :  { %s4416_s19 = smov [#allocation9]   ;;  %s4249_s23 = scalar_lea.hbm %s5731_s3, 4096 }
  0x16   :  { %s57_s20 = sshll.u32 %s4416_s19, 4  ;;  %p4250_p8 = scmp.ne.s32.totalorder %s5731_s3, %s4249_s23  ;;  %s58_s20 = int_to_ptr.vmem [resolvable:$true] %s57_s20 }
  0x17   :  { %p4253_p9 = scmp.lt.u32.totalorder %s4249_s23, %s5731_s3 }
  0x19   :  { %p4255_p10 = pnand %p4253_p9, %p4250_p8 }
  0x1b   :  { %4258 = shalt.err (!%p4255_p10)
}
  0x1c   :  { %s4259_s29 = scalar_lea.vmem %s58_s20, 4096  ;;  %p4264_p12 = scmp.lt.s32.totalorder %s58_s20, %s58_s20 }
  0x1d   :  { %p4260_p11 = scmp.ne.s32.totalorder %s58_s20, %s4259_s29  ;;  %p4265_p13 = scmp.lt.s32.totalorder %s4259_s29, %s4259_s29 }
  0x1f   :  { %p4266_p0 = por %p4265_p13, %p4264_p12 }
  0x21   :  { %p4267_p1 = pnand %p4266_p0, %p4260_p11 }
  0x23   :  { %4270 = shalt.err (!%p4267_p1)
}
  0x24   :  { %s4417_s1 = smov 256   ;;  %s4418_s28 = smov 16  }
  0x25   :  { %63 = dma.hbm_to_vmem [thread:$0]  %s5731_s3, 4096, %s58_s20, [#allocation10], %s4417_s1, %s4417_s1, %s4418_s28  }
  0x26   :  { %s4419_s10 = smov [#allocation12]   ;;  %s4271_s14 = scalar_lea.hbm %s5733_s5, 2048 }
  0x27   :  { %s81_s11 = sshll.u32 %s4419_s10, 4  ;;  %p4272_p2 = scmp.ne.s32.totalorder %s5733_s5, %s4271_s14  ;;  %s82_s11 = int_to_ptr.vmem [resolvable:$true] %s81_s11 }
  0x28   :  { %p4275_p3 = scmp.lt.u32.totalorder %s4271_s14, %s5733_s5 }
  0x2a   :  { %p4277_p4 = pnand %p4275_p3, %p4272_p2 }
  0x2c   :  { %4280 = shalt.err (!%p4277_p4)
}
  0x2d   :  { %s4281_s19 = scalar_lea.vmem %s82_s11, 2048  ;;  %p4286_p6 = scmp.lt.s32.totalorder %s82_s11, %s82_s11 }
  0x2e   :  { %p4282_p5 = scmp.ne.s32.totalorder %s82_s11, %s4281_s19  ;;  %p4287_p7 = scmp.lt.s32.totalorder %s4281_s19, %s4281_s19 }
  0x30   :  { %p4288_p8 = por %p4287_p7, %p4286_p6 }
  0x32   :  { %p4289_p9 = pnand %p4288_p8, %p4282_p5 }
  0x34   :  { %4292 = shalt.err (!%p4289_p9)
}
  0x35   :  { %s4420_s3 = smov 128   ;;  %s4421_s20 = smov 8  }
  0x36   :  { %87 = dma.hbm_to_vmem [thread:$0]  %s5733_s5, 2048, %s82_s11, [#allocation13], %s4420_s3, %s4420_s3, %s4421_s20  }
  0x37   :  { %s4422_s23 = smov [#allocation3]   ;;  %s4293_s27 = scalar_lea.hbm %s5728_s0, 512 }
  0x38   :  { %s23_s24 = sshll.u32 %s4422_s23, 4  ;;  %p4294_p10 = scmp.ne.s32.totalorder %s5728_s0, %s4293_s27  ;;  %s24_s24 = int_to_ptr.vmem [resolvable:$true] %s23_s24 }
  0x39   :  { %p4297_p11 = scmp.lt.u32.totalorder %s4293_s27, %s5728_s0 }
  0x3b   :  { %p4299_p12 = pnand %p4297_p11, %p4294_p10 }
  0x3d   :  { %4302 = shalt.err (!%p4299_p12)
}
  0x3e   :  { %s4303_s12 = scalar_lea.vmem %s24_s24, 512  ;;  %p4308_p0 = scmp.lt.s32.totalorder %s24_s24, %s24_s24 }
  0x3f   :  { %p4304_p13 = scmp.ne.s32.totalorder %s24_s24, %s4303_s12  ;;  %p4309_p1 = scmp.lt.s32.totalorder %s4303_s12, %s4303_s12 }
  0x41   :  { %p4310_p2 = por %p4309_p1, %p4308_p0 }
  0x43   :  { %p4311_p3 = pnand %p4310_p2, %p4304_p13 }
  0x45   :  { %4314 = shalt.err (!%p4311_p3)
}
  0x46   :  { %s4423_s5 = smov 64   ;;  %s4424_s11 = smov 4  }
  0x47   :  { %29 = dma.hbm_to_vmem [thread:$0]  %s5728_s0, 512, %s24_s24, [#allocation4], %s4423_s5, %s4423_s5, %s4424_s11  }
  0x48   :  { %s4425_s15 = smov [#allocation8]   ;;  %s4426_s17 = smov [#allocation11]  }
  0x49   :  { %s48_s16 = sshll.u32 %s4425_s15, 4  ;;  %s69_s18 = sshll.u32 %s4426_s17, 4  ;;  %s49_s16 = int_to_ptr.vmem [resolvable:$true] %s48_s16  ;;  %s4532_s18 = int_to_ptr.vmem [resolvable:$true] %s69_s18 }
  0x4a   :  { %s4315_s22 = scalar_lea.hbm %s5730_s2, 128 }
  0x4b   :  { %p4316_p4 = scmp.ne.s32.totalorder %s5730_s2, %s4315_s22  ;;  %p4319_p5 = scmp.lt.u32.totalorder %s4315_s22, %s5730_s2 }
  0x4d   :  { %p4321_p6 = pnand %p4319_p5, %p4316_p4 }
  0x4f   :  { %4324 = shalt.err (!%p4321_p6)
}
  0x50   :  { %s4325_s0 = scalar_lea.vmem %s49_s16, 128  ;;  %p4330_p8 = scmp.lt.s32.totalorder %s49_s16, %s49_s16 }
  0x51   :  { %p4326_p7 = scmp.ne.s32.totalorder %s49_s16, %s4325_s0  ;;  %p4331_p9 = scmp.lt.s32.totalorder %s4325_s0, %s4325_s0 }
  0x53   :  { %p4332_p10 = por %p4331_p9, %p4330_p8 }
  0x55   :  { %p4333_p11 = pnand %p4332_p10, %p4326_p7 }
  0x57   :  { %4336 = shalt.err (!%p4333_p11)
}
  0x58   :  { %51 = dma.hbm_to_vmem [thread:$0]  %s5730_s2, 128, %s49_s16, [#allocation7]  }
  0x59   :  { %s4337_s10 = scalar_lea.hbm %s5732_s4, 4096 }
  0x5a   :  { %p4338_p12 = scmp.ne.s32.totalorder %s5732_s4, %s4337_s10  ;;  %p4341_p13 = scmp.lt.u32.totalorder %s4337_s10, %s5732_s4 }
  0x5c   :  { %p4343_p0 = pnand %p4341_p13, %p4338_p12 }
  0x5e   :  { %4346 = shalt.err (!%p4343_p0)
}
  0x5f   :  { %s4347_s14 = scalar_lea.vmem %s4532_s18, 4096  ;;  %p4352_p2 = scmp.lt.s32.totalorder %s4532_s18, %s4532_s18 }
  0x60   :  { %p4348_p1 = scmp.ne.s32.totalorder %s4532_s18, %s4347_s14  ;;  %p4353_p3 = scmp.lt.s32.totalorder %s4347_s14, %s4347_s14 }
  0x62   :  { %p4354_p4 = por %p4353_p3, %p4352_p2 }
  0x64   :  { %p4355_p5 = pnand %p4354_p4, %p4348_p1 }
  0x66   :  { %4358 = shalt.err (!%p4355_p5)
}
  0x67   :  { %75 = dma.hbm_to_vmem [thread:$0]  %s5732_s4, 4096, %s4532_s18, [#allocation10], %s4417_s1, %s4417_s1, %s4418_s28  }
  0x68   :  { %s4427_s16 = smov [#allocation14]   ;;  %s4359_s22 = scalar_lea.hbm %s5734_s6, 2048 }
  0x69   :  { %s93_s17 = sshll.u32 %s4427_s16, 4  ;;  %p4360_p6 = scmp.ne.s32.totalorder %s5734_s6, %s4359_s22  ;;  %s94_s17 = int_to_ptr.vmem [resolvable:$true] %s93_s17 }
  0x6a   :  { %p4363_p7 = scmp.lt.u32.totalorder %s4359_s22, %s5734_s6 }
  0x6c   :  { %p4365_p8 = pnand %p4363_p7, %p4360_p6 }
  0x6e   :  { %4368 = shalt.err (!%p4365_p8)
}
  0x6f   :  { %s4369_s0 = scalar_lea.vmem %s94_s17, 2048  ;;  %p4374_p10 = scmp.lt.s32.totalorder %s94_s17, %s94_s17 }
  0x70   :  { %p4370_p9 = scmp.ne.s32.totalorder %s94_s17, %s4369_s0  ;;  %p4375_p11 = scmp.lt.s32.totalorder %s4369_s0, %s4369_s0 }
  0x72   :  { %p4376_p12 = por %p4375_p11, %p4374_p10 }
  0x74   :  { %p4377_p13 = pnand %p4376_p12, %p4370_p9 }
  0x76   :  { %4380 = shalt.err (!%p4377_p13)
}
  0x77   :  { %99 = dma.hbm_to_vmem [thread:$0]  %s5734_s6, 2048, %s94_s17, [#allocation13], %s4420_s3, %s4420_s3, %s4421_s20  }
  0x78   :  { %4403 = dma.done.wait [#allocation4], 512  }
  0x79   :  { %4404 = vsyncadd [#allocation4], 4294966784 }
  0x7a   :  { %4405 = dma.done.wait [#allocation7], 8320  }
  0x7b   :  { %4406 = vsyncadd [#allocation7], 4294958976 }
  0x7c   :  { %4407 = dma.done.wait [#allocation10], 8192  }
  0x7d   :  { %4408 = vsyncadd [#allocation10], 4294959104 }
  0x7e   :  { %4409 = dma.done.wait [#allocation13], 4096  }
  0x7f   :  { %4410 = vsyncadd [#allocation13], 4294963200  ;;  %v5737_v0 = vmov 0   ;;  %v132_v1 = vld [vmem:[#allocation6] sm:$0xff]  ;;  %v133_v3 = vld [vmem:[#allocation6 + $0x8] sm:$0xff]  ;;  %vm4430_vm0 = vmmov 0  }
  0x80   :  { %614 = vmatprep.mubr.bf16.mxu0 %v5737_v0  ;;  %687 = vmatprep.mubr.bf16.mxu1 %v5737_v0  ;;  %v136_v2 = vld [vmem:[#allocation6 + $0x20] sm:$0xff]  ;;  %v137_v5 = vld [vmem:[#allocation6 + $0x28] sm:$0xff]  ;;  %v134_v62 = vld [vmem:[#allocation6 + $0x10] sm:$0xff]  ;;  %s4432_s3 = smov [#allocation15]  }
  0x81   :  { %v3395_v4 = vcombine.high %v132_v1, %v136_v2  ;;  %v3394_v6 = vcombine.low %v132_v1, %v136_v2  ;;  %v140_v7 = vld [vmem:[#allocation6 + $0x40] sm:$0xff]  ;;  %v3397_v9 = vcombine.high %v133_v3, %v137_v5  ;;  %v3396_v10 = vcombine.low %v133_v3, %v137_v5  ;;  %v141_v12 = vld [vmem:[#allocation6 + $0x48] sm:$0xff]  ;;  %v138_v1 = vld [vmem:[#allocation6 + $0x30] sm:$0xff]  ;;  %s3371_s20 = sshll.u32 %s4432_s3, 4  ;;  %s3372_s20 = int_to_ptr.vmem [resolvable:$true] %s3371_s20 }
  0x82   :  { %v144_v8 = vld [vmem:[#allocation6 + $0x60] sm:$0xff]  ;;  %v145_v13 = vld [vmem:[#allocation6 + $0x68] sm:$0xff]  ;;  %v135_v2 = vld [vmem:[#allocation6 + $0x18] sm:$0xff]  ;;  %s4381_s18 = scalar_lea.vmem %s3372_s20, 128  ;;  %p4386_p1 = scmp.lt.s32.totalorder %s3372_s20, %s3372_s20 }
  0x83   :  { %v3403_v11 = vcombine.high %v140_v7, %v144_v8  ;;  %v148_v14 = vld [vmem:[#allocation6 + $0x80] sm:$0xff]  ;;  %582 = vmatprep.subr.bf16.mxu0 %v3395_v4  ;;  %v3405_v15 = vcombine.high %v141_v12, %v145_v13  ;;  %v149_v17 = vld [vmem:[#allocation6 + $0x88] sm:$0xff]  ;;  %655 = vmatprep.subr.bf16.mxu1 %v3397_v9  ;;  %v3402_v19 = vcombine.low %v140_v7, %v144_v8  ;;  %v139_v3 = vld [vmem:[#allocation6 + $0x38] sm:$0xff]  ;;  %p4382_p0 = scmp.ne.s32.totalorder %s3372_s20, %s4381_s18  ;;  %p4387_p2 = scmp.lt.s32.totalorder %s4381_s18, %s4381_s18 }
  0x84   :  { %v152_v16 = vld [vmem:[#allocation6 + $0xa0] sm:$0xff]  ;;  %v153_v18 = vld [vmem:[#allocation6 + $0xa8] sm:$0xff]  ;;  %583 = vmatpush1.bf16.msra.mxu0 %v3394_v6  ;;  %656 = vmatpush1.bf16.msra.mxu1 %v3396_v10  ;;  %v3404_v20 = vcombine.low %v141_v12, %v145_v13  ;;  %v3399_v7 = vcombine.high %v134_v62, %v138_v1  ;;  %v142_v8 = vld [vmem:[#allocation6 + $0x50] sm:$0xff]  ;;  %v3401_v9 = vcombine.high %v135_v2, %v139_v3 }
  0x85   :  { %584 = vmatprep.subr.bf16.mxu0 %v3403_v11  ;;  %v3411_v21 = vcombine.high %v148_v14, %v152_v16  ;;  %657 = vmatprep.subr.bf16.mxu1 %v3405_v15  ;;  %v3413_v22 = vcombine.high %v149_v17, %v153_v18  ;;  %v156_v23 = vld [vmem:[#allocation6 + $0xc0] sm:$0xff]  ;;  %v157_v25 = vld [vmem:[#allocation6 + $0xc8] sm:$0xff]  ;;  %v3410_v27 = vcombine.low %v148_v14, %v152_v16  ;;  %v146_v10 = vld [vmem:[#allocation6 + $0x70] sm:$0xff]  ;;  %p4388_p3 = por %p4387_p2, %p4386_p1 }
  0x86   :  { %v160_v24 = vld [vmem:[#allocation6 + $0xe0] sm:$0xff]  ;;  %v161_v26 = vld [vmem:[#allocation6 + $0xe8] sm:$0xff]  ;;  %v3412_v28 = vcombine.low %v149_v17, %v153_v18  ;;  %v143_v11 = vld [vmem:[#allocation6 + $0x58] sm:$0xff]  ;;  %v3398_v13 = vcombine.low %v134_v62, %v138_v1  ;;  %v3400_v14 = vcombine.low %v135_v2, %v139_v3  ;;  %v3407_v15 = vcombine.high %v142_v8, %v146_v10 }
  0x87   :  { %v3419_v29 = vcombine.high %v156_v23, %v160_v24  ;;  %v3421_v30 = vcombine.high %v157_v25, %v161_v26  ;;  %v164_v31 = vld [vmem:[#allocation6 + $0x100] sm:$0xff]  ;;  %v165_v33 = vld [vmem:[#allocation6 + $0x108] sm:$0xff]  ;;  %v3418_v35 = vcombine.low %v156_v23, %v160_v24  ;;  %v3420_v36 = vcombine.low %v157_v25, %v161_v26  ;;  %v147_v12 = vld [vmem:[#allocation6 + $0x78] sm:$0xff]  ;;  %p4389_p4 = pnand %p4388_p3, %p4382_p0 }
  0x88   :  { %585 = vmatpush1.bf16.msra.mxu0 %v3402_v19  ;;  %658 = vmatpush1.bf16.msra.mxu1 %v3404_v20  ;;  %v168_v32 = vld [vmem:[#allocation6 + $0x120] sm:$0xff]  ;;  %v169_v34 = vld [vmem:[#allocation6 + $0x128] sm:$0xff]  ;;  %v150_v16 = vld [vmem:[#allocation6 + $0x90] sm:$0xff]  ;;  %v3409_v17 = vcombine.high %v143_v11, %v147_v12 }
  0x89   :  { %586 = vmatprep.subr.bf16.mxu0 %v3411_v21  ;;  %659 = vmatprep.subr.bf16.mxu1 %v3413_v22  ;;  %v3427_v37 = vcombine.high %v164_v31, %v168_v32  ;;  %v172_v38 = vld [vmem:[#allocation6 + $0x140] sm:$0xff]  ;;  %v3429_v39 = vcombine.high %v165_v33, %v169_v34  ;;  %v173_v41 = vld [vmem:[#allocation6 + $0x148] sm:$0xff]  ;;  %v3426_v43 = vcombine.low %v164_v31, %v168_v32  ;;  %v154_v18 = vld [vmem:[#allocation6 + $0xb0] sm:$0xff] }
  0x8a   :  { %v176_v40 = vld [vmem:[#allocation6 + $0x160] sm:$0xff]  ;;  %v177_v42 = vld [vmem:[#allocation6 + $0x168] sm:$0xff]  ;;  %v3428_v44 = vcombine.low %v165_v33, %v169_v34  ;;  %v151_v19 = vld [vmem:[#allocation6 + $0x98] sm:$0xff]  ;;  %v3406_v21 = vcombine.low %v142_v8, %v146_v10  ;;  %v3408_v22 = vcombine.low %v143_v11, %v147_v12  ;;  %v3415_v24 = vcombine.high %v150_v16, %v154_v18 }
  0x8b   :  { %v3435_v45 = vcombine.high %v172_v38, %v176_v40  ;;  %v180_v46 = vld [vmem:[#allocation6 + $0x180] sm:$0xff]  ;;  %v3437_v47 = vcombine.high %v173_v41, %v177_v42  ;;  %v181_v49 = vld [vmem:[#allocation6 + $0x188] sm:$0xff]  ;;  %v3434_v51 = vcombine.low %v172_v38, %v176_v40  ;;  %v3436_v52 = vcombine.low %v173_v41, %v177_v42  ;;  %v155_v20 = vld [vmem:[#allocation6 + $0xb8] sm:$0xff] }
  0x8c   :  { %587 = vmatpush1.bf16.msra.mxu0 %v3410_v27  ;;  %660 = vmatpush1.bf16.msra.mxu1 %v3412_v28  ;;  %v184_v48 = vld [vmem:[#allocation6 + $0x1a0] sm:$0xff]  ;;  %v185_v50 = vld [vmem:[#allocation6 + $0x1a8] sm:$0xff]  ;;  %v158_v25 = vld [vmem:[#allocation6 + $0xd0] sm:$0xff]  ;;  %v3417_v26 = vcombine.high %v151_v19, %v155_v20  ;;  %v3416_v31 = vcombine.low %v151_v19, %v155_v20 }
  0x8d   :  { %588 = vmatprep.subr.bf16.mxu0 %v3419_v29  ;;  %661 = vmatprep.subr.bf16.mxu1 %v3421_v30  ;;  %v3443_v53 = vcombine.high %v180_v46, %v184_v48  ;;  %v3445_v54 = vcombine.high %v181_v49, %v185_v50  ;;  %v188_v55 = vld [vmem:[#allocation6 + $0x1c0] sm:$0xff]  ;;  %v189_v57 = vld [vmem:[#allocation6 + $0x1c8] sm:$0xff]  ;;  %v3442_v59 = vcombine.low %v180_v46, %v184_v48  ;;  %v162_v27 = vld [vmem:[#allocation6 + $0xf0] sm:$0xff] }
  0x8e   :  { %v192_v56 = vld [vmem:[#allocation6 + $0x1e0] sm:$0xff]  ;;  %v193_v58 = vld [vmem:[#allocation6 + $0x1e8] sm:$0xff]  ;;  %v3444_v60 = vcombine.low %v181_v49, %v185_v50  ;;  %v159_v28 = vld [vmem:[#allocation6 + $0xd8] sm:$0xff]  ;;  %v3414_v30 = vcombine.low %v150_v16, %v154_v18  ;;  %v3423_v32 = vcombine.high %v158_v25, %v162_v27  ;;  %v3422_v38 = vcombine.low %v158_v25, %v162_v27 }
  0x8f   :  { %v3451_v61 = vcombine.high %v188_v55, %v192_v56  ;;  %v3453_v63 = vcombine.high %v189_v57, %v193_v58  ;;  %v3450_v4 = vcombine.low %v188_v55, %v192_v56  ;;  %v3452_v5 = vcombine.low %v189_v57, %v193_v58  ;;  %v4583_v6 = vld [vmem:[#allocation3] sm:$0xff]   ;;  %v4587_v23 = vld [vmem:[#allocation3 + $0x8] sm:$0xff]   ;;  %v163_v29 = vld [vmem:[#allocation6 + $0xf8] sm:$0xff] }
  0x90   :  { %589 = vmatpush1.bf16.msra.mxu0 %v3418_v35  ;;  %662 = vmatpush1.bf16.msra.mxu1 %v3420_v36  ;;  %v166_v33 = vld [vmem:[#allocation6 + $0x110] sm:$0xff]  ;;  %v3425_v34 = vcombine.high %v159_v28, %v163_v29  ;;  %v167_v36 = vld [vmem:[#allocation6 + $0x118] sm:$0xff] }
  0x91   :  { %590 = vmatprep.subr.bf16.mxu0 %v3427_v37  ;;  %663 = vmatprep.subr.bf16.mxu1 %v3429_v39  ;;  %v170_v35 = vld [vmem:[#allocation6 + $0x130] sm:$0xff]  ;;  %v171_v37 = vld [vmem:[#allocation6 + $0x138] sm:$0xff]  ;;  %v3424_v39 = vcombine.low %v159_v28, %v163_v29 }
  0x92   :  { %v4593_v40 = vld [vmem:[#allocation3 + $0x10] sm:$0xff]   ;;  %v3431_v41 = vcombine.high %v166_v33, %v170_v35  ;;  %v179_v46 = vld [vmem:[#allocation6 + $0x178] sm:$0xff]  ;;  %v3432_v48 = vcombine.low %v167_v36, %v171_v37 }
  0x93   :  { %v174_v42 = vld [vmem:[#allocation6 + $0x150] sm:$0xff]  ;;  %v4599_v57 = vld [vmem:[#allocation3 + $0x18] sm:$0xff]  }
  0x94   :  { %591 = vmatpush1.bf16.msra.mxu0 %v3426_v43  ;;  %664 = vmatpush1.bf16.msra.mxu1 %v3428_v44  ;;  %v3433_v43 = vcombine.high %v167_v36, %v171_v37  ;;  %v178_v44 = vld [vmem:[#allocation6 + $0x170] sm:$0xff]  ;;  %v191_v62 = vld [vmem:[#allocation6 + $0x1d8] sm:$0xff] }
  0x95   :  { %592 = vmatprep.subr.bf16.mxu0 %v3435_v45  ;;  %665 = vmatprep.subr.bf16.mxu1 %v3437_v47  ;;  %v175_v45 = vld [vmem:[#allocation6 + $0x158] sm:$0xff]  ;;  %v3430_v47 = vcombine.low %v166_v33, %v170_v35  ;;  %v3439_v49 = vcombine.high %v174_v42, %v178_v44  ;;  %v182_v50 = vld [vmem:[#allocation6 + $0x190] sm:$0xff]  ;;  %v3438_v55 = vcombine.low %v174_v42, %v178_v44 }
  0x96   :  { %v3440_v56 = vcombine.low %v175_v45, %v179_v46  ;;  %v4605_v8 = vld [vmem:[#allocation9 + $0x4] ss:$16 sps:$4 sm:$0xff]   ;;  %v4611_v10 = vld [vmem:[#allocation9] ss:$16 sps:$4 sm:$0xff]   ;;  %v4613_v11 = vld [vmem:[#allocation9 + $0x8] ss:$16 sps:$4 sm:$0xff]  }
  0x97   :  { %5828 = vst [vmem:[#allocation21_spill] sm:$0xff] %v4611_v10  ;;  %5829 = vst [vmem:[#allocation22_spill] sm:$0xff] %v4613_v11  ;;  %v4616_v12 = vld [vmem:[#allocation9 + $0x24] ss:$16 sps:$4 sm:$0xff]   ;;  %v4642_v18 = vld [vmem:[#allocation9 + $0x48] ss:$16 sps:$4 sm:$0xff]  }
  0x98   :  { %593 = vmatpush1.bf16.msra.mxu0 %v3434_v51  ;;  %666 = vmatpush1.bf16.msra.mxu1 %v3436_v52  ;;  %v3441_v51 = vcombine.high %v175_v45, %v179_v46  ;;  %v186_v52 = vld [vmem:[#allocation6 + $0x1b0] sm:$0xff]  ;;  %5830 = vst [vmem:[#allocation23_spill] sm:$0xff] %v4616_v12  ;;  %v4630_v16 = vld [vmem:[#allocation9 + $0x44] ss:$16 sps:$4 sm:$0xff]   ;;  %5837 = vst [vmem:[#allocation30_spill] sm:$0xff] %v4642_v18 }
  0x99   :  { %594 = vmatprep.subr.bf16.mxu0 %v3443_v53  ;;  %667 = vmatprep.subr.bf16.mxu1 %v3445_v54  ;;  %v183_v53 = vld [vmem:[#allocation6 + $0x198] sm:$0xff]  ;;  %v3447_v58 = vcombine.high %v182_v50, %v186_v52  ;;  %v3446_v1 = vcombine.low %v182_v50, %v186_v52  ;;  %5834 = vst [vmem:[#allocation27_spill] sm:$0xff] %v4630_v16  ;;  %v4647_v20 = vld [vmem:[#allocation9 + $0x6c] ss:$16 sps:$4 sm:$0xff]   ;;  %v4726_v42 = vld [vmem:[#allocation11 + $0x8] ss:$16 sps:$4 sm:$0xff]  }
  0x9a   :  { %v187_v54 = vld [vmem:[#allocation6 + $0x1b8] sm:$0xff]  ;;  %5839 = vst [vmem:[#allocation32_spill] sm:$0xff] %v4647_v20  ;;  %v4662_v25 = vld [vmem:[#allocation9 + $0x8c] ss:$16 sps:$4 sm:$0xff]   ;;  %v4740_v46 = vld [vmem:[#allocation11 + $0x28] ss:$16 sps:$4 sm:$0xff]  }
  0x9b   :  { %v3448_v2 = vcombine.low %v183_v53, %v187_v54  ;;  %v4644_v19 = vld [vmem:[#allocation9 + $0x64] ss:$16 sps:$4 sm:$0xff]   ;;  %5843 = vst [vmem:[#allocation36_spill] sm:$0xff] %v4662_v25  ;;  %v4675_v28 = vld [vmem:[#allocation9 + $0xac] ss:$16 sps:$4 sm:$0xff]  }
  0x9c   :  { %595 = vmatpush1.bf16.msra.mxu0 %v3442_v59  ;;  %668 = vmatpush1.bf16.msra.mxu1 %v3444_v60  ;;  %v190_v59 = vld [vmem:[#allocation6 + $0x1d0] sm:$0xff]  ;;  %v3449_v60 = vcombine.high %v183_v53, %v187_v54  ;;  %5838 = vst [vmem:[#allocation31_spill] sm:$0xff] %v4644_v19  ;;  %v4672_v27 = vld [vmem:[#allocation9 + $0xa4] ss:$16 sps:$4 sm:$0xff]   ;;  %5847 = vst [vmem:[#allocation40_spill] sm:$0xff] %v4675_v28 }
  0x9d   :  { %596 = vmatprep.subr.bf16.mxu0 %v3451_v61  ;;  %669 = vmatprep.subr.bf16.mxu1 %v3453_v63  ;;  %v194_v61 = vld [vmem:[#allocation6 + $0x1f0] sm:$0xff]  ;;  %v195_v63 = vld [vmem:[#allocation6 + $0x1f8] sm:$0xff]  ;;  %5846 = vst [vmem:[#allocation39_spill] sm:$0xff] %v4672_v27 }
  0x9e   :  { %v3455_v3 = vcombine.high %v190_v59, %v194_v61  ;;  %v4680_v29 = vld [vmem:[#allocation9 + $0xa0] ss:$16 sps:$4 sm:$0xff]   ;;  %v4700_v35 = vld [vmem:[#allocation9 + $0xe4] ss:$16 sps:$4 sm:$0xff]   ;;  %v4703_v36 = vld [vmem:[#allocation9 + $0xec] ss:$16 sps:$4 sm:$0xff]  }
  0x9f   :  { %5848 = vst [vmem:[#allocation41_spill] sm:$0xff] %v4680_v29  ;;  %v4694_v33 = vld [vmem:[#allocation9 + $0xc0] ss:$16 sps:$4 sm:$0xff]   ;;  %5854 = vst [vmem:[#allocation47_spill] sm:$0xff] %v4700_v35  ;;  %v4731_v44 = vld [vmem:[#allocation11 + $0x2c] ss:$16 sps:$4 sm:$0xff]  }
  0xa0   :  { %597 = vmatpush1.bf16.msra.mxu0 %v3450_v4  ;;  %670 = vmatpush1.bf16.msra.mxu1 %v3452_v5  ;;  %v3457_v4 = vcombine.high %v191_v62, %v195_v63  ;;  %v3454_v5 = vcombine.low %v190_v59, %v194_v61  ;;  %5852 = vst [vmem:[#allocation45_spill] sm:$0xff] %v4694_v33  ;;  %5855 = vst [vmem:[#allocation48_spill] sm:$0xff] %v4703_v36  ;;  %v4708_v37 = vld [vmem:[#allocation9 + $0xe0] ss:$16 sps:$4 sm:$0xff]   ;;  %v4754_v50 = vld [vmem:[#allocation11 + $0x48] ss:$16 sps:$4 sm:$0xff]  }
  0xa1   :  { %728 = vmatprep.subr.bf16.mxu0 %v3399_v7  ;;  %801 = vmatprep.subr.bf16.mxu1 %v3401_v9  ;;  %v3456_v7 = vcombine.low %v191_v62, %v195_v63  ;;  %v4608_v9 = vld [vmem:[#allocation9 + $0xc] ss:$16 sps:$4 sm:$0xff]   ;;  %5856 = vst [vmem:[#allocation49_spill] sm:$0xff] %v4708_v37  ;;  %v4736_v45 = vld [vmem:[#allocation11 + $0x20] ss:$16 sps:$4 sm:$0xff]  }
  0xa2   :  { %v4759_v52 = vld [vmem:[#allocation11 + $0x6c] ss:$16 sps:$4 sm:$0xff]   ;;  %v4762_v53 = vld [vmem:[#allocation11 + $0x60] ss:$16 sps:$4 sm:$0xff]   ;;  %v4766_v54 = vld [vmem:[#allocation11 + $0x68] ss:$16 sps:$4 sm:$0xff]  }
  0xa3   :  { %615 = vmatmul.mubr.bf16.vlgmr.msra.gmra.mrb[0].mxu0 %v4583_v6  ;;  %688 = vmatmul.mubr.bf16.vlgmr.msra.gmra.mrb[0].mxu1 %v4583_v6  ;;  %v4780_v59 = vld [vmem:[#allocation11 + $0xa4] ss:$16 sps:$4 sm:$0xff]   ;;  %v4786_v61 = vld [vmem:[#allocation11 + $0xa0] ss:$16 sps:$4 sm:$0xff]   ;;  %v4790_v62 = vld [vmem:[#allocation11 + $0xa8] ss:$16 sps:$4 sm:$0xff]  }
  0xa4   :  { %729 = vmatpush1.bf16.msra.mxu0 %v3398_v13  ;;  %802 = vmatpush1.bf16.msra.mxu1 %v3400_v14  ;;  %v4619_v13 = vld [vmem:[#allocation9 + $0x2c] ss:$16 sps:$4 sm:$0xff]   ;;  %v4624_v14 = vld [vmem:[#allocation9 + $0x20] ss:$16 sps:$4 sm:$0xff]   ;;  %v4792_v63 = vld [vmem:[#allocation11 + $0xc4] ss:$16 sps:$4 sm:$0xff]  }
  0xa5   :  { %730 = vmatprep.subr.bf16.mxu0 %v3407_v15  ;;  %803 = vmatprep.subr.bf16.mxu1 %v3409_v17  ;;  %5831 = vst [vmem:[#allocation24_spill] sm:$0xff] %v4619_v13  ;;  %5832 = vst [vmem:[#allocation25_spill] sm:$0xff] %v4624_v14  ;;  %v4628_v15 = vld [vmem:[#allocation9 + $0x28] ss:$16 sps:$4 sm:$0xff]   ;;  %v4634_v17 = vld [vmem:[#allocation9 + $0x4c] ss:$16 sps:$4 sm:$0xff]  }
  0xa6   :  { %624 = vmatprep.mubr.bf16.mxu0 %v5737_v0  ;;  %697 = vmatprep.mubr.bf16.mxu1 %v5737_v0  ;;  %5833 = vst [vmem:[#allocation26_spill] sm:$0xff] %v4628_v15  ;;  %5835 = vst [vmem:[#allocation28_spill] sm:$0xff] %v4634_v17 }
  0xa8   :  { %731 = vmatpush1.bf16.msra.mxu0 %v3406_v21  ;;  %804 = vmatpush1.bf16.msra.mxu1 %v3408_v22  ;;  %v4652_v21 = vld [vmem:[#allocation9 + $0x60] ss:$16 sps:$4 sm:$0xff]   ;;  %v4656_v22 = vld [vmem:[#allocation9 + $0x68] ss:$16 sps:$4 sm:$0xff]  }
  0xa9   :  { %732 = vmatprep.subr.bf16.mxu0 %v3415_v24  ;;  %805 = vmatprep.subr.bf16.mxu1 %v3417_v26  ;;  %5840 = vst [vmem:[#allocation33_spill] sm:$0xff] %v4652_v21  ;;  %5841 = vst [vmem:[#allocation34_spill] sm:$0xff] %v4656_v22  ;;  %v4658_v24 = vld [vmem:[#allocation9 + $0x84] ss:$16 sps:$4 sm:$0xff]   ;;  %v4670_v26 = vld [vmem:[#allocation9 + $0x88] ss:$16 sps:$4 sm:$0xff]  }
  0xaa   :  { %5842 = vst [vmem:[#allocation35_spill] sm:$0xff] %v4658_v24  ;;  %5845 = vst [vmem:[#allocation38_spill] sm:$0xff] %v4670_v26 }
  0xab   :  { %625 = vmatmul.mubr.bf16.gmra.mrb[4].mxu0 %v4587_v23  ;;  %698 = vmatmul.mubr.bf16.gmra.mrb[4].mxu1 %v4587_v23 }
  0xac   :  { %733 = vmatpush1.bf16.msra.mxu0 %v3414_v30  ;;  %806 = vmatpush1.bf16.msra.mxu1 %v3416_v31  ;;  %v4684_v30 = vld [vmem:[#allocation9 + $0xa8] ss:$16 sps:$4 sm:$0xff]   ;;  %v4686_v31 = vld [vmem:[#allocation9 + $0xc4] ss:$16 sps:$4 sm:$0xff]  }
  0xad   :  { %734 = vmatprep.subr.bf16.mxu0 %v3423_v32  ;;  %807 = vmatprep.subr.bf16.mxu1 %v3425_v34  ;;  %5849 = vst [vmem:[#allocation42_spill] sm:$0xff] %v4684_v30  ;;  %5850 = vst [vmem:[#allocation43_spill] sm:$0xff] %v4686_v31  ;;  %v4690_v32 = vld [vmem:[#allocation9 + $0xcc] ss:$16 sps:$4 sm:$0xff]   ;;  %v4698_v34 = vld [vmem:[#allocation9 + $0xc8] ss:$16 sps:$4 sm:$0xff]  }
  0xae   :  { %634 = vmatprep.mubr.bf16.mxu0 %v5737_v0  ;;  %707 = vmatprep.mubr.bf16.mxu1 %v5737_v0  ;;  %5851 = vst [vmem:[#allocation44_spill] sm:$0xff] %v4690_v32  ;;  %5853 = vst [vmem:[#allocation46_spill] sm:$0xff] %v4698_v34 }
  0xb0   :  { %735 = vmatpush1.bf16.msra.mxu0 %v3422_v38  ;;  %808 = vmatpush1.bf16.msra.mxu1 %v3424_v39  ;;  %v4712_v38 = vld [vmem:[#allocation9 + $0xe8] ss:$16 sps:$4 sm:$0xff]   ;;  %v4714_v39 = vld [vmem:[#allocation11 + $0x4] ss:$16 sps:$4 sm:$0xff]  }
  0xb1   :  { %736 = vmatprep.subr.bf16.mxu0 %v3431_v41  ;;  %809 = vmatprep.subr.bf16.mxu1 %v3433_v43  ;;  %5857 = vst [vmem:[#allocation50_spill] sm:$0xff] %v4712_v38  ;;  %5858 = vst [vmem:[#allocation51_spill] sm:$0xff] %v4714_v39  ;;  %v4722_v41 = vld [vmem:[#allocation11] ss:$16 sps:$4 sm:$0xff]   ;;  %v4728_v43 = vld [vmem:[#allocation11 + $0x24] ss:$16 sps:$4 sm:$0xff]  }
  0xb3   :  { %635 = vmatmul.mubr.bf16.gmra.mrb[8].mxu0 %v4593_v40  ;;  %708 = vmatmul.mubr.bf16.gmra.mrb[8].mxu1 %v4593_v40 }
  0xb4   :  { %737 = vmatpush1.bf16.msra.mxu0 %v3430_v47  ;;  %810 = vmatpush1.bf16.msra.mxu1 %v3432_v48  ;;  %v4742_v47 = vld [vmem:[#allocation11 + $0x44] ss:$16 sps:$4 sm:$0xff]   ;;  %v4745_v48 = vld [vmem:[#allocation11 + $0x4c] ss:$16 sps:$4 sm:$0xff]  }
  0xb5   :  { %738 = vmatprep.subr.bf16.mxu0 %v3439_v49  ;;  %811 = vmatprep.subr.bf16.mxu1 %v3441_v51  ;;  %v4750_v49 = vld [vmem:[#allocation11 + $0x40] ss:$16 sps:$4 sm:$0xff]   ;;  %v4756_v51 = vld [vmem:[#allocation11 + $0x64] ss:$16 sps:$4 sm:$0xff]  }
  0xb6   :  { %644 = vmatprep.mubr.bf16.mxu0 %v5737_v0  ;;  %717 = vmatprep.mubr.bf16.mxu1 %v5737_v0 }
  0xb8   :  { %739 = vmatpush1.bf16.msra.mxu0 %v3438_v55  ;;  %812 = vmatpush1.bf16.msra.mxu1 %v3440_v56  ;;  %v4768_v55 = vld [vmem:[#allocation11 + $0x84] ss:$16 sps:$4 sm:$0xff]   ;;  %v4771_v56 = vld [vmem:[#allocation11 + $0x8c] ss:$16 sps:$4 sm:$0xff]  }
  0xb9   :  { %740 = vmatprep.subr.bf16.mxu0 %v3447_v58  ;;  %813 = vmatprep.subr.bf16.mxu1 %v3449_v60  ;;  %v4778_v58 = vld [vmem:[#allocation11 + $0x88] ss:$16 sps:$4 sm:$0xff]   ;;  %v4783_v60 = vld [vmem:[#allocation11 + $0xac] ss:$16 sps:$4 sm:$0xff]  }
  0xbb   :  { %645 = vmatmul.mubr.bf16.gmra.mrb[12].mxu0 %v4599_v57  ;;  %718 = vmatmul.mubr.bf16.gmra.mrb[12].mxu1 %v4599_v57 }
  0xbc   :  { %741 = vmatpush1.bf16.msra.mxu0 %v3446_v1  ;;  %814 = vmatpush1.bf16.msra.mxu1 %v3448_v2  ;;  %v4795_v1 = vld [vmem:[#allocation11 + $0xcc] ss:$16 sps:$4 sm:$0xff]   ;;  %v4798_v2 = vld [vmem:[#allocation11 + $0xc0] ss:$16 sps:$4 sm:$0xff]  }
  0xbd   :  { %742 = vmatprep.subr.bf16.mxu0 %v3455_v3  ;;  %815 = vmatprep.subr.bf16.mxu1 %v3457_v4  ;;  %5860 = vst [vmem:[#allocation53_spill] sm:$0xff] %v4795_v1  ;;  %v4802_v3 = vld [vmem:[#allocation11 + $0xc8] ss:$16 sps:$4 sm:$0xff]   ;;  %v4804_v4 = vld [vmem:[#allocation11 + $0xe4] ss:$16 sps:$4 sm:$0xff]  }
  0xbe   :  { %760 = vmatprep.mubr.bf16.mxu0 %v5737_v0  ;;  %833 = vmatprep.mubr.bf16.mxu1 %v5737_v0 }
  0xc0   :  { %743 = vmatpush1.bf16.msra.mxu0 %v3454_v5  ;;  %816 = vmatpush1.bf16.msra.mxu1 %v3456_v7  ;;  %v4807_v5 = vld [vmem:[#allocation11 + $0xec] ss:$16 sps:$4 sm:$0xff]   ;;  %v4810_v7 = vld [vmem:[#allocation11 + $0xe0] ss:$16 sps:$4 sm:$0xff]  }
  0xc1   :  { %1176 = vmatprep.subr.bf16.mxu0 %v4605_v8  ;;  %1217 = vmatprep.subr.bf16.mxu1 %v4608_v9 }
  0xc3   :  { %761 = vmatmul.mubr.bf16.vlgmr.msra.gmra.mrb[16].mxu0 %v4583_v6  ;;  %834 = vmatmul.mubr.bf16.vlgmr.msra.gmra.mrb[16].mxu1 %v4583_v6  ;;  %v4638_v6 = vld [vmem:[#allocation9 + $0x40] ss:$16 sps:$4 sm:$0xff]  }
  0xc4   :  { %1177 = vmatpush1.bf16.msra.mxu0 %v4611_v10  ;;  %1218 = vmatpush1.bf16.msra.mxu1 %v4613_v11  ;;  %5836 = vst [vmem:[#allocation29_spill] sm:$0xff] %v4638_v6 }
  0xc5   :  { %1178 = vmatprep.subr.bf16.mxu0 %v4616_v12  ;;  %1219 = vmatprep.subr.bf16.mxu1 %v4619_v13 }
  0xc6   :  { %770 = vmatprep.mubr.bf16.mxu0 %v5737_v0  ;;  %843 = vmatprep.mubr.bf16.mxu1 %v5737_v0 }
  0xc8   :  { %1179 = vmatpush1.bf16.msra.mxu0 %v4624_v14  ;;  %1220 = vmatpush1.bf16.msra.mxu1 %v4628_v15 }
  0xc9   :  { %1180 = vmatprep.subr.bf16.mxu0 %v4630_v16  ;;  %1221 = vmatprep.subr.bf16.mxu1 %v4634_v17 }
  0xcb   :  { %771 = vmatmul.mubr.bf16.gmra.mrb[20].mxu0 %v4587_v23  ;;  %844 = vmatmul.mubr.bf16.gmra.mrb[20].mxu1 %v4587_v23  ;;  %v4666_v23 = vld [vmem:[#allocation9 + $0x80] ss:$16 sps:$4 sm:$0xff]  }
  0xcc   :  { %1181 = vmatpush1.bf16.msra.mxu0 %v4638_v6  ;;  %1222 = vmatpush1.bf16.msra.mxu1 %v4642_v18  ;;  %5844 = vst [vmem:[#allocation37_spill] sm:$0xff] %v4666_v23 }
  0xcd   :  { %1182 = vmatprep.subr.bf16.mxu0 %v4644_v19  ;;  %1223 = vmatprep.subr.bf16.mxu1 %v4647_v20 }
  0xce   :  { %780 = vmatprep.mubr.bf16.mxu0 %v5737_v0  ;;  %853 = vmatprep.mubr.bf16.mxu1 %v5737_v0 }
  0xd0   :  { %1183 = vmatpush1.bf16.msra.mxu0 %v4652_v21  ;;  %1224 = vmatpush1.bf16.msra.mxu1 %v4656_v22 }
  0xd1   :  { %1184 = vmatprep.subr.bf16.mxu0 %v4658_v24  ;;  %1225 = vmatprep.subr.bf16.mxu1 %v4662_v25 }
  0xd3   :  { %781 = vmatmul.mubr.bf16.gmra.mrb[24].mxu0 %v4593_v40  ;;  %854 = vmatmul.mubr.bf16.gmra.mrb[24].mxu1 %v4593_v40  ;;  %v4718_v40 = vld [vmem:[#allocation11 + $0xc] ss:$16 sps:$4 sm:$0xff]  }
  0xd4   :  { %1185 = vmatpush1.bf16.msra.mxu0 %v4666_v23  ;;  %1226 = vmatpush1.bf16.msra.mxu1 %v4670_v26  ;;  %5859 = vst [vmem:[#allocation52_spill] sm:$0xff] %v4718_v40 }
  0xd5   :  { %1186 = vmatprep.subr.bf16.mxu0 %v4672_v27  ;;  %1227 = vmatprep.subr.bf16.mxu1 %v4675_v28 }
  0xd6   :  { %790 = vmatprep.mubr.bf16.mxu0 %v5737_v0  ;;  %863 = vmatprep.mubr.bf16.mxu1 %v5737_v0 }
  0xd8   :  { %1187 = vmatpush1.bf16.msra.mxu0 %v4680_v29  ;;  %1228 = vmatpush1.bf16.msra.mxu1 %v4684_v30 }
  0xd9   :  { %1188 = vmatprep.subr.bf16.mxu0 %v4686_v31  ;;  %1229 = vmatprep.subr.bf16.mxu1 %v4690_v32 }
  0xdb   :  { %791 = vmatmul.mubr.bf16.gmra.mrb[28].mxu0 %v4599_v57  ;;  %864 = vmatmul.mubr.bf16.gmra.mrb[28].mxu1 %v4599_v57  ;;  %v4774_v57 = vld [vmem:[#allocation11 + $0x80] ss:$16 sps:$4 sm:$0xff]  }
  0xdc   :  { %1189 = vmatpush1.bf16.msra.mxu0 %v4694_v33  ;;  %1230 = vmatpush1.bf16.msra.mxu1 %v4698_v34 }
  0xdd   :  { %1190 = vmatprep.subr.bf16.mxu0 %v4700_v35  ;;  %1231 = vmatprep.subr.bf16.mxu1 %v4703_v36 }
  0xde   :  { %1208 = vmatprep.mubr.bf16.mxu0 %v5737_v0  ;;  %1249 = vmatprep.mubr.bf16.mxu1 %v5737_v0 }
  0xe0   :  { %1191 = vmatpush1.bf16.msra.mxu0 %v4708_v37  ;;  %1232 = vmatpush1.bf16.msra.mxu1 %v4712_v38 }
  0xe1   :  { %1422 = vmatprep.subr.bf16.mxu0 %v4714_v39  ;;  %1463 = vmatprep.subr.bf16.mxu1 %v4718_v40 }
  0xe3   :  { %1209 = vmatmul.mubr.bf16.vlgmr.msra.gmra.mrb[32].mxu0 %v5737_v0  ;;  %1250 = vmatmul.mubr.bf16.vlgmr.msra.gmra.mrb[32].mxu1 %v5737_v0 }
  0xe4   :  { %1423 = vmatpush1.bf16.msra.mxu0 %v4722_v41  ;;  %1464 = vmatpush1.bf16.msra.mxu1 %v4726_v42 }
  0xe5   :  { %1424 = vmatprep.subr.bf16.mxu0 %v4728_v43  ;;  %1465 = vmatprep.subr.bf16.mxu1 %v4731_v44 }
  0xe6   :  { %1454 = vmatprep.mubr.bf16.mxu0 %v5737_v0  ;;  %1495 = vmatprep.mubr.bf16.mxu1 %v5737_v0  ;;  %v4814_v0 = vld [vmem:[#allocation11 + $0xe8] ss:$16 sps:$4 sm:$0xff]  }
  0xe8   :  { %1425 = vmatpush1.bf16.msra.mxu0 %v4736_v45  ;;  %1466 = vmatpush1.bf16.msra.mxu1 %v4740_v46 }
  0xe9   :  { %1426 = vmatprep.subr.bf16.mxu0 %v4742_v47  ;;  %1467 = vmatprep.subr.bf16.mxu1 %v4745_v48 }
  0xec   :  { %1427 = vmatpush1.bf16.msra.mxu0 %v4750_v49  ;;  %1468 = vmatpush1.bf16.msra.mxu1 %v4754_v50 }
  0xed   :  { %1428 = vmatprep.subr.bf16.mxu0 %v4756_v51  ;;  %1469 = vmatprep.subr.bf16.mxu1 %v4759_v52 }
  0xf0   :  { %1429 = vmatpush1.bf16.msra.mxu0 %v4762_v53  ;;  %1470 = vmatpush1.bf16.msra.mxu1 %v4766_v54 }
  0xf1   :  { %1430 = vmatprep.subr.bf16.mxu0 %v4768_v55  ;;  %1471 = vmatprep.subr.bf16.mxu1 %v4771_v56 }
  0xf4   :  { %1431 = vmatpush1.bf16.msra.mxu0 %v4774_v57  ;;  %1472 = vmatpush1.bf16.msra.mxu1 %v4778_v58 }
  0xf5   :  { %1432 = vmatprep.subr.bf16.mxu0 %v4780_v59  ;;  %1473 = vmatprep.subr.bf16.mxu1 %v4783_v60 }
  0xf8   :  { %1433 = vmatpush1.bf16.msra.mxu0 %v4786_v61  ;;  %1474 = vmatpush1.bf16.msra.mxu1 %v4790_v62 }
  0xf9   :  { %1434 = vmatprep.subr.bf16.mxu0 %v4792_v63  ;;  %1475 = vmatprep.subr.bf16.mxu1 %v4795_v1  ;;  %v5861_v1 = vmov 0  }
  0xfc   :  { %1435 = vmatpush1.bf16.msra.mxu0 %v4798_v2  ;;  %1476 = vmatpush1.bf16.msra.mxu1 %v4802_v3 }
  0xfd   :  { %1436 = vmatprep.subr.bf16.mxu0 %v4804_v4  ;;  %1477 = vmatprep.subr.bf16.mxu1 %v4807_v5 }
 0x100   :  { %1437 = vmatpush1.bf16.msra.mxu0 %v4810_v7  ;;  %1478 = vmatpush1.bf16.msra.mxu1 %v4814_v0 }
 0x101   :  { %1571 = vmatprep.subr.bf16.mxu0 %v4605_v8  ;;  %1612 = vmatprep.subr.bf16.mxu1 %v4608_v9 }
 0x103   :  { %1455 = vmatmul.mubr.bf16.vlgmr.msra.gmra.mrb[36].mxu0 %v5861_v1  ;;  %1496 = vmatmul.mubr.bf16.vlgmr.msra.gmra.mrb[36].mxu1 %v5861_v1 }
 0x104   :  { %1572 = vmatpush1.bf16.msra.mxu0 %v4611_v10  ;;  %1613 = vmatpush1.bf16.msra.mxu1 %v4613_v11 }
 0x105   :  { %1573 = vmatprep.subr.bf16.mxu0 %v4616_v12  ;;  %1614 = vmatprep.subr.bf16.mxu1 %v4619_v13 }
 0x106   :  { %1603 = vmatprep.mubr.bf16.mxu0 %v5861_v1  ;;  %1644 = vmatprep.mubr.bf16.mxu1 %v5861_v1 }
 0x108   :  { %1574 = vmatpush1.bf16.msra.mxu0 %v4624_v14  ;;  %1615 = vmatpush1.bf16.msra.mxu1 %v4628_v15 }
 0x109   :  { %1575 = vmatprep.subr.bf16.mxu0 %v4630_v16  ;;  %1616 = vmatprep.subr.bf16.mxu1 %v4634_v17 }
 0x10c   :  { %1576 = vmatpush1.bf16.msra.mxu0 %v4638_v6  ;;  %1617 = vmatpush1.bf16.msra.mxu1 %v4642_v18 }
 0x10d   :  { %1577 = vmatprep.subr.bf16.mxu0 %v4644_v19  ;;  %1618 = vmatprep.subr.bf16.mxu1 %v4647_v20 }
 0x110   :  { %1578 = vmatpush1.bf16.msra.mxu0 %v4652_v21  ;;  %1619 = vmatpush1.bf16.msra.mxu1 %v4656_v22 }
 0x111   :  { %1579 = vmatprep.subr.bf16.mxu0 %v4658_v24  ;;  %1620 = vmatprep.subr.bf16.mxu1 %v4662_v25 }
 0x114   :  { %1580 = vmatpush1.bf16.msra.mxu0 %v4666_v23  ;;  %1621 = vmatpush1.bf16.msra.mxu1 %v4670_v26 }
 0x115   :  { %1581 = vmatprep.subr.bf16.mxu0 %v4672_v27  ;;  %1622 = vmatprep.subr.bf16.mxu1 %v4675_v28 }
 0x118   :  { %1582 = vmatpush1.bf16.msra.mxu0 %v4680_v29  ;;  %1623 = vmatpush1.bf16.msra.mxu1 %v4684_v30  ;;  %v198_v30 = vlaneseq }
 0x119   :  { %1583 = vmatprep.subr.bf16.mxu0 %v4686_v31  ;;  %1624 = vmatprep.subr.bf16.mxu1 %v4690_v32 }
 0x11a   :  { %v4857_v31 = vshrl.u32 %v198_v30, 7 }
 0x11c   :  { %1584 = vmatpush1.bf16.msra.mxu0 %v4694_v33  ;;  %1625 = vmatpush1.bf16.msra.mxu1 %v4698_v34  ;;  %v200_v32 = vsub.s32 0, %v4857_v31  ;;  %v4860_v33 = vld [vmem:[#allocation8] sm:$0xff]  ;;  %v208_v34 = vsub.s32 2, %v4857_v31 }
 0x11d   :  { %1585 = vmatprep.subr.bf16.mxu0 %v4700_v35  ;;  %1626 = vmatprep.subr.bf16.mxu1 %v4703_v36  ;;  %v212_v35 = vsub.s32 3, %v4857_v31  ;;  %v204_v36 = vsub.s32 1, %v4857_v31 }
 0x11f   :  { %v4878_v29 = vrot.slane %v4860_v33, %v212_v35  ;;  %v4881_v28 = vrot.slane %v4860_v33, %v204_v36 }
 0x120   :  { %1586 = vmatpush1.bf16.msra.mxu0 %v4708_v37  ;;  %1627 = vmatpush1.bf16.msra.mxu1 %v4712_v38  ;;  %v4866_v37 = vrot.slane %v4860_v33, %v200_v32 }
 0x121   :  { %1658 = vmatprep.subr.bf16.mxu0 %v4714_v39  ;;  %1699 = vmatprep.subr.bf16.mxu1 %v4718_v40  ;;  %v4871_v40 = vrot.slane %v4860_v33, %v208_v34 }
 0x176   :  { %v4868_v38 = vpop.f32.mrb[0].mxu0  ;;  %v4875_v39 = vpop.f32.mrb[0].mxu1 }
 0x177   :  { %v4873_v30 = vpop.f32.mrb[1].mxu0  ;;  %v4883_v26 = vpop.f32.mrb[1].mxu1 }
 0x178   :  { %v620_v27 = vpop.f32.mrb[2].mxu0  ;;  %v693_v25 = vpop.f32.mrb[2].mxu1 }
 0x179   :  { %v4886_v32 = vadd.f32 %v620_v27, %v4866_v37  ;;  %v622_v23 = vpop.f32.mrb[3].mxu0  ;;  %v4892_v24 = vadd.f32 %v693_v25, %v4871_v40  ;;  %v695_v22 = vpop.f32.mrb[3].mxu1 }
 0x17a   :  { %v4889_v34 = vadd.f32 %v622_v23, %v4881_v28  ;;  %v4895_v35 = vadd.f32 %v695_v22, %v4878_v29 }
 0x17b   :  { %5862 = vst [vmem:[#allocation54_spill] sm:$0xff] %v4886_v32  ;;  %5864 = vst [vmem:[#allocation56_spill] sm:$0xff] %v4892_v24 }
 0x17c   :  { %5863 = vst [vmem:[#allocation55_spill] sm:$0xff] %v4889_v34  ;;  %5865 = vst [vmem:[#allocation57_spill] sm:$0xff] %v4895_v35 }
 0x17e   :  { %v626_v36 = vpop.f32.mrb[4].mxu0  ;;  %v699_v19 = vpop.f32.mrb[4].mxu1 }
 0x17f   :  { %v4898_v21 = vadd.f32 %v626_v36, %v4866_v37  ;;  %v628_v20 = vpop.f32.mrb[5].mxu0  ;;  %v4904_v23 = vadd.f32 %v699_v19, %v4871_v40  ;;  %v701_v34 = vpop.f32.mrb[5].mxu1 }
 0x180   :  { %v4901_v27 = vadd.f32 %v628_v20, %v4881_v28  ;;  %v630_v32 = vpop.f32.mrb[6].mxu0  ;;  %v4910_v22 = vadd.f32 %v701_v34, %v4878_v29  ;;  %v703_v35 = vpop.f32.mrb[6].mxu1 }
 0x181   :  { %5866 = vst [vmem:[#allocation58_spill] sm:$0xff] %v4898_v21  ;;  %5868 = vst [vmem:[#allocation60_spill] sm:$0xff] %v4904_v23  ;;  %v4907_v25 = vadd.f32 %v630_v32, %v4866_v37  ;;  %v632_v24 = vpop.f32.mrb[7].mxu0  ;;  %v4916_v21 = vadd.f32 %v703_v35, %v4871_v40  ;;  %v705_v20 = vpop.f32.mrb[7].mxu1 }
 0x182   :  { %5867 = vst [vmem:[#allocation59_spill] sm:$0xff] %v4901_v27  ;;  %5870 = vst [vmem:[#allocation62_spill] sm:$0xff] %v4910_v22  ;;  %v4913_v36 = vadd.f32 %v632_v24, %v4881_v28  ;;  %v4919_v27 = vadd.f32 %v705_v20, %v4878_v29 }
 0x183   :  { %5869 = vst [vmem:[#allocation61_spill] sm:$0xff] %v4907_v25  ;;  %5872 = vst [vmem:[#allocation64_spill] sm:$0xff] %v4916_v21 }
 0x184   :  { %5871 = vst [vmem:[#allocation63_spill] sm:$0xff] %v4913_v36  ;;  %5873 = vst [vmem:[#allocation65_spill] sm:$0xff] %v4919_v27 }
 0x186   :  { %v636_v19 = vpop.f32.mrb[8].mxu0  ;;  %v709_v25 = vpop.f32.mrb[8].mxu1 }
 0x187   :  { %v4922_v23 = vadd.f32 %v636_v19, %v4866_v37  ;;  %v638_v32 = vpop.f32.mrb[9].mxu0  ;;  %v4928_v24 = vadd.f32 %v709_v25, %v4871_v40  ;;  %v711_v36 = vpop.f32.mrb[9].mxu1 }
 0x188   :  { %v4925_v34 = vadd.f32 %v638_v32, %v4881_v28  ;;  %v640_v22 = vpop.f32.mrb[10].mxu0  ;;  %v4934_v20 = vadd.f32 %v711_v36, %v4878_v29  ;;  %v713_v27 = vpop.f32.mrb[10].mxu1 }
 0x189   :  { %5874 = vst [vmem:[#allocation66_spill] sm:$0xff] %v4922_v23  ;;  %5876 = vst [vmem:[#allocation68_spill] sm:$0xff] %v4928_v24  ;;  %v4931_v35 = vadd.f32 %v640_v22, %v4866_v37  ;;  %v642_v21 = vpop.f32.mrb[11].mxu0  ;;  %v4940_v23 = vadd.f32 %v713_v27, %v4871_v40  ;;  %v715_v32 = vpop.f32.mrb[11].mxu1 }
 0x18a   :  { %5875 = vst [vmem:[#allocation67_spill] sm:$0xff] %v4925_v34  ;;  %5878 = vst [vmem:[#allocation70_spill] sm:$0xff] %v4934_v20  ;;  %v4937_v19 = vadd.f32 %v642_v21, %v4881_v28  ;;  %v4943_v34 = vadd.f32 %v715_v32, %v4878_v29  ;;  %v224_v32 = vsub.s32 6, %v4857_v31 }
 0x18b   :  { %5877 = vst [vmem:[#allocation69_spill] sm:$0xff] %v4931_v35  ;;  %5880 = vst [vmem:[#allocation72_spill] sm:$0xff] %v4940_v23  ;;  %v216_v35 = vsub.s32 4, %v4857_v31 }
 0x18c   :  { %5879 = vst [vmem:[#allocation71_spill] sm:$0xff] %v4937_v19  ;;  %5881 = vst [vmem:[#allocation73_spill] sm:$0xff] %v4943_v34  ;;  %v220_v19 = vsub.s32 5, %v4857_v31 }
 0x18e   :  { %v646_v25 = vpop.f32.mrb[12].mxu0  ;;  %v719_v36 = vpop.f32.mrb[12].mxu1 }
 0x18f   :  { %v4946_v24 = vadd.f32 %v646_v25, %v4866_v37  ;;  %v648_v22 = vpop.f32.mrb[13].mxu0  ;;  %v4954_v27 = vadd.f32 %v719_v36, %v4871_v40  ;;  %v721_v23 = vpop.f32.mrb[13].mxu1 }
 0x190   :  { %v4950_v20 = vadd.f32 %v648_v22, %v4881_v28  ;;  %v650_v21 = vpop.f32.mrb[14].mxu0  ;;  %v723_v18 = vpop.f32.mrb[14].mxu1  ;;  %v228_v22 = vsub.s32 7, %v4857_v31 }
 0x191   :  { %5882 = vst [vmem:[#allocation74_spill] sm:$0xff] %v4946_v24  ;;  %5884 = vst [vmem:[#allocation76_spill] sm:$0xff] %v4954_v27  ;;  %v4958_v34 = vadd.f32 %v650_v21, %v4866_v37  ;;  %v652_v25 = vpop.f32.mrb[15].mxu0  ;;  %v4961_v24 = vadd.f32 %v721_v23, %v4878_v29  ;;  %v4968_v6 = vadd.f32 %v723_v18, %v4871_v40  ;;  %v725_v36 = vpop.f32.mrb[15].mxu1 }
 0x192   :  { %5883 = vst [vmem:[#allocation75_spill] sm:$0xff] %v4950_v20  ;;  %v4965_v20 = vadd.f32 %v652_v25, %v4881_v28  ;;  %v4971_v27 = vrot.slane %v4860_v33, %v216_v35  ;;  %v4974_v21 = vadd.f32 %v725_v36, %v4878_v29  ;;  %v4980_v23 = vrot.slane %v4860_v33, %v224_v32 }
 0x193   :  { %5885 = vst [vmem:[#allocation77_spill] sm:$0xff] %v4958_v34  ;;  %5886 = vst [vmem:[#allocation78_spill] sm:$0xff] %v4961_v24  ;;  %v4977_v34 = vrot.slane %v4860_v33, %v220_v19  ;;  %v4983_v31 = vrot.slane %v4860_v33, %v228_v22 }
 0x194   :  { %5887 = vst [vmem:[#allocation79_spill] sm:$0xff] %v4965_v20  ;;  %5888 = vst [vmem:[#allocation80_spill] sm:$0xff] %v4968_v6 }
 0x195   :  { %5889 = vst [vmem:[#allocation81_spill] sm:$0xff] %v4974_v21 }
 0x196   :  { %v762_v25 = vpop.f32.mrb[16].mxu0  ;;  %v835_v6 = vpop.f32.mrb[16].mxu1 }
 0x197   :  { %v4986_v18 = vadd.f32 %v762_v25, %v4971_v27  ;;  %v764_v20 = vpop.f32.mrb[17].mxu0  ;;  %v4992_v21 = vadd.f32 %v835_v6, %v4980_v23  ;;  %v837_v19 = vpop.f32.mrb[17].mxu1 }
 0x198   :  { %v4989_v35 = vadd.f32 %v764_v20, %v4977_v34  ;;  %v766_v36 = vpop.f32.mrb[18].mxu0  ;;  %v4998_v33 = vadd.f32 %v837_v19, %v4983_v31  ;;  %v839_v22 = vpop.f32.mrb[18].mxu1 }
 0x199   :  { %5890 = vst [vmem:[#allocation82_spill] sm:$0xff] %v4986_v18  ;;  %5892 = vst [vmem:[#allocation84_spill] sm:$0xff] %v4992_v21  ;;  %v4995_v32 = vadd.f32 %v766_v36, %v4971_v27  ;;  %v768_v24 = vpop.f32.mrb[19].mxu0  ;;  %v5004_v18 = vadd.f32 %v839_v22, %v4980_v23  ;;  %v841_v20 = vpop.f32.mrb[19].mxu1 }
 0x19a   :  { %5891 = vst [vmem:[#allocation83_spill] sm:$0xff] %v4989_v35  ;;  %5894 = vst [vmem:[#allocation86_spill] sm:$0xff] %v4998_v33  ;;  %v5001_v25 = vadd.f32 %v768_v24, %v4977_v34  ;;  %v5007_v35 = vadd.f32 %v841_v20, %v4983_v31 }
 0x19b   :  { %5893 = vst [vmem:[#allocation85_spill] sm:$0xff] %v4995_v32  ;;  %5896 = vst [vmem:[#allocation88_spill] sm:$0xff] %v5004_v18 }
 0x19c   :  { %5895 = vst [vmem:[#allocation87_spill] sm:$0xff] %v5001_v25  ;;  %5897 = vst [vmem:[#allocation89_spill] sm:$0xff] %v5007_v35 }
 0x19e   :  { %v772_v6 = vpop.f32.mrb[20].mxu0  ;;  %v845_v32 = vpop.f32.mrb[20].mxu1 }
 0x19f   :  { %v5010_v21 = vadd.f32 %v772_v6, %v4971_v27  ;;  %v774_v36 = vpop.f32.mrb[21].mxu0  ;;  %v5016_v24 = vadd.f32 %v845_v32, %v4980_v23  ;;  %v847_v25 = vpop.f32.mrb[21].mxu1 }
 0x1a0   :  { %v5013_v19 = vadd.f32 %v774_v36, %v4977_v34  ;;  %v776_v33 = vpop.f32.mrb[22].mxu0  ;;  %v5022_v20 = vadd.f32 %v847_v25, %v4983_v31  ;;  %v849_v35 = vpop.f32.mrb[22].mxu1 }
 0x1a1   :  { %5898 = vst [vmem:[#allocation90_spill] sm:$0xff] %v5010_v21  ;;  %5900 = vst [vmem:[#allocation92_spill] sm:$0xff] %v5016_v24  ;;  %v5019_v22 = vadd.f32 %v776_v33, %v4971_v27  ;;  %v778_v18 = vpop.f32.mrb[23].mxu0  ;;  %v5028_v21 = vadd.f32 %v849_v35, %v4980_v23  ;;  %v851_v36 = vpop.f32.mrb[23].mxu1 }
 0x1a2   :  { %5899 = vst [vmem:[#allocation91_spill] sm:$0xff] %v5013_v19  ;;  %5902 = vst [vmem:[#allocation94_spill] sm:$0xff] %v5022_v20  ;;  %v5025_v6 = vadd.f32 %v778_v18, %v4977_v34  ;;  %v5031_v19 = vadd.f32 %v851_v36, %v4983_v31 }
 0x1a3   :  { %5901 = vst [vmem:[#allocation93_spill] sm:$0xff] %v5019_v22  ;;  %5904 = vst [vmem:[#allocation96_spill] sm:$0xff] %v5028_v21 }
 0x1a4   :  { %5903 = vst [vmem:[#allocation95_spill] sm:$0xff] %v5025_v6  ;;  %5905 = vst [vmem:[#allocation97_spill] sm:$0xff] %v5031_v19 }
 0x1a6   :  { %v782_v32 = vpop.f32.mrb[24].mxu0  ;;  %v855_v22 = vpop.f32.mrb[24].mxu1 }
 0x1a7   :  { %v5034_v24 = vadd.f32 %v782_v32, %v4971_v27  ;;  %v784_v33 = vpop.f32.mrb[25].mxu0  ;;  %v5040_v18 = vadd.f32 %v855_v22, %v4980_v23  ;;  %v857_v6 = vpop.f32.mrb[25].mxu1 }
 0x1a8   :  { %v5037_v25 = vadd.f32 %v784_v33, %v4977_v34  ;;  %v786_v20 = vpop.f32.mrb[26].mxu0  ;;  %v5046_v36 = vadd.f32 %v857_v6, %v4983_v31  ;;  %v859_v19 = vpop.f32.mrb[26].mxu1 }
 0x1a9   :  { %5906 = vst [vmem:[#allocation98_spill] sm:$0xff] %v5034_v24  ;;  %5908 = vst [vmem:[#allocation100_spill] sm:$0xff] %v5040_v18  ;;  %v5043_v35 = vadd.f32 %v786_v20, %v4971_v27  ;;  %v788_v21 = vpop.f32.mrb[27].mxu0  ;;  %v5052_v24 = vadd.f32 %v859_v19, %v4980_v23  ;;  %v861_v33 = vpop.f32.mrb[27].mxu1 }
 0x1aa   :  { %5907 = vst [vmem:[#allocation99_spill] sm:$0xff] %v5037_v25  ;;  %5910 = vst [vmem:[#allocation102_spill] sm:$0xff] %v5046_v36  ;;  %v5049_v32 = vadd.f32 %v788_v21, %v4977_v34  ;;  %v5055_v25 = vadd.f32 %v861_v33, %v4983_v31 }
 0x1ab   :  { %5909 = vst [vmem:[#allocation101_spill] sm:$0xff] %v5043_v35  ;;  %5912 = vst [vmem:[#allocation104_spill] sm:$0xff] %v5052_v24 }
 0x1ac   :  { %5911 = vst [vmem:[#allocation103_spill] sm:$0xff] %v5049_v32  ;;  %5913 = vst [vmem:[#allocation105_spill] sm:$0xff] %v5055_v25 }
 0x1ae   :  { %v792_v22 = vpop.f32.mrb[28].mxu0  ;;  %v865_v35 = vpop.f32.mrb[28].mxu1 }
 0x1af   :  { %v5058_v18 = vadd.f32 %v792_v22, %v4971_v27  ;;  %v794_v20 = vpop.f32.mrb[29].mxu0  ;;  %v5064_v21 = vadd.f32 %v865_v35, %v4980_v23  ;;  %v867_v32 = vpop.f32.mrb[29].mxu1  ;;  %v617_v22 = vadd.f32 %v4868_v38, %v4866_v37  ;;  %v692_v35 = vadd.f32 %v4883_v26, %v4878_v29 }
 0x1b0   :  { %v5061_v6 = vadd.f32 %v794_v20, %v4977_v34  ;;  %v796_v36 = vpop.f32.mrb[30].mxu0  ;;  %v5067_v24 = vadd.f32 %v867_v32, %v4983_v31  ;;  %v869_v33 = vpop.f32.mrb[30].mxu1  ;;  %v690_v20 = vadd.f32 %v4875_v39, %v4871_v40 }
 0x1b1   :  { %5914 = vst [vmem:[#allocation106_spill] sm:$0xff] %v5058_v18  ;;  %5916 = vst [vmem:[#allocation108_spill] sm:$0xff] %v5064_v21  ;;  %v798_v19 = vpop.f32.mrb[31].mxu0  ;;  %v871_v25 = vpop.f32.mrb[31].mxu1  ;;  %v619_v18 = vadd.f32 %v4873_v30, %v4881_v28 }
 0x1b2   :  { %5915 = vst [vmem:[#allocation107_spill] sm:$0xff] %v5061_v6  ;;  %5917 = vst [vmem:[#allocation109_spill] sm:$0xff] %v5067_v24 }
 0x1b6   :  { %v1210_v6 = vpop.f32.mrb[32].mxu0  ;;  %v1251_v17 = vpop.f32.mrb[32].mxu1 }
 0x1b7   :  { %v1258_v21 = vadd.f32 %v1210_v6, %v617_v22  ;;  %v1212_v16 = vpop.f32.mrb[33].mxu0  ;;  %v1260_v32 = vadd.f32 %v1251_v17, %v690_v20  ;;  %v1253_v15 = vpop.f32.mrb[33].mxu1  ;;  %v872_v22 = vadd.f32 %v871_v25, %v4983_v31 }
 0x1b8   :  { %v1259_v24 = vadd.f32 %v1212_v16, %v619_v18  ;;  %v1214_v14 = vpop.f32.mrb[34].mxu0  ;;  %v1261_v12 = vadd.f32 %v1253_v15, %v692_v35  ;;  %v1255_v38 = vpop.f32.mrb[34].mxu1 }
 0x1b9   :  { %v3522_v13 = vmul.f32 -1.442695, %v1258_v21  ;;  %v1215_v37 = vpop.f32.mrb[35].mxu0  ;;  %v1256_v28 = vpop.f32.mrb[35].mxu1 }
 0x1ba   :  { %v3523_v11 = vmul.f32 -1.442695, %v1259_v24  ;;  %v3524_v39 = vmul.f32 -1.442695, %v1261_v12  ;;  %v797_v24 = vadd.f32 %v796_v36, %v4971_v27  ;;  %v870_v12 = vadd.f32 %v869_v33, %v4980_v23 }
 0x1bb   :  { %3843 = vpow2.f32 %v3522_v13 }
 0x1bc   :  { %3845 = vpow2.f32 %v3523_v11  ;;  %v799_v11 = vadd.f32 %v798_v19, %v4977_v34 }
 0x1bd   :  { %3847 = vpow2.f32 %v3524_v39 }
 0x1be   :  { %3849 = vtanh.f32 %v1260_v32 }
 0x1c5   :  { %v3844_v40 = vpop.eup %3843 }
 0x1c6   :  { %v3846_v30 = vpop.eup %3845  ;;  %v1511_v10 = vadd.f32 1.0, %v3844_v40 }
 0x1c7   :  { %v1517_v26 = vadd.f32 1.0, %v3846_v30  ;;  %v3848_v16 = vpop.eup %3847 }
 0x1c8   :  { %3851 = vrcp.f32 %v1511_v10  ;;  %v3850_v17 = vpop.eup %3849  ;;  %v1524_v18 = vadd.f32 1.0, %v3848_v16 }
 0x1c9   :  { %3853 = vrcp.f32 %v1517_v26 }
 0x1ca   :  { %3855 = vrcp.f32 %v1524_v18 }
 0x1d2   :  { %v3852_v14 = vpop.eup %3851 }
 0x1d3   :  { %v3854_v29 = vpop.eup %3853  ;;  %v1528_v15 = vmul.f32 %v3852_v14, %v3850_v17 }
 0x1d4   :  { %v1527_v6 = vmul.f32 0.0, %v3854_v29  ;;  %v3856_v39 = vpop.eup %3855 }
 0x1d6   :  { %v5080_v13 = vadd.f32 %v1528_v15, %v1527_v6  ;;  %v1456_v21 = vpop.f32.mrb[36].mxu0  ;;  %v1497_v20 = vpop.f32.mrb[36].mxu1 }
 0x1d7   :  { %v1504_v10 = vadd.f32 %v1456_v21, %v797_v24  ;;  %v1458_v35 = vpop.f32.mrb[37].mxu0  ;;  %v1506_v32 = vadd.f32 %v1497_v20, %v870_v12  ;;  %v1499_v38 = vpop.f32.mrb[37].mxu1 }
 0x1d8   :  { %3857 = vtanh.f32 %v5080_v13  ;;  %v1505_v37 = vadd.f32 %v1458_v35, %v799_v11  ;;  %v1460_v28 = vpop.f32.mrb[38].mxu0  ;;  %v1507_v36 = vadd.f32 %v1499_v38, %v872_v22  ;;  %v1501_v19 = vpop.f32.mrb[38].mxu1  ;;  %v5918_v22 = vld [vmem:[#allocation53_spill] sm:$0xff]  ;;  %v5920_v38 = vld [vmem:[#allocation22_spill] sm:$0xff] }
 0x1d9   :  { %v3525_v27 = vmul.f32 -1.442695, %v1504_v10  ;;  %v1461_v34 = vpop.f32.mrb[39].mxu0  ;;  %v1502_v33 = vpop.f32.mrb[39].mxu1  ;;  %v5921_v28 = vld [vmem:[#allocation23_spill] sm:$0xff]  ;;  %v5927_v19 = vld [vmem:[#allocation29_spill] sm:$0xff] }
 0x1da   :  { %v3526_v23 = vmul.f32 -1.442695, %v1505_v37  ;;  %v3527_v25 = vmul.f32 -1.442695, %v1507_v36  ;;  %v5919_v37 = vld [vmem:[#allocation21_spill] sm:$0xff]  ;;  %v5924_v34 = vld [vmem:[#allocation26_spill] sm:$0xff] }
 0x1db   :  { %3859 = vpow2.f32 %v3525_v27  ;;  %v5922_v27 = vld [vmem:[#allocation24_spill] sm:$0xff]  ;;  %v5923_v36 = vld [vmem:[#allocation25_spill] sm:$0xff]  ;;  %v5929_v33 = vld [vmem:[#allocation31_spill] sm:$0xff] }
 0x1dc   :  { %3861 = vpow2.f32 %v3526_v23  ;;  %v5928_v23 = vld [vmem:[#allocation30_spill] sm:$0xff] }
 0x1dd   :  { %3863 = vpow2.f32 %v3527_v25  ;;  %v5932_v25 = vld [vmem:[#allocation34_spill] sm:$0xff] }
 0x1de   :  { %3865 = vtanh.f32 %v1506_v32 }
 0x1e2   :  { %v3858_v31 = vpop.eup %3857 }
 0x1e3   :  { %v1531_v40 = vmul.f32 %v3858_v31, %v3856_v39  ;;  %v5930_v39 = vld [vmem:[#allocation32_spill] sm:$0xff]  ;;  %v5931_v31 = vld [vmem:[#allocation33_spill] sm:$0xff] }
 0x1e5   :  { %v3860_v30 = vpop.eup %3859  ;;  %v1570_v26 = vpack.c.bf16 %v1531_v40, %v1531_v40  ;;  %v5933_v40 = vld [vmem:[#allocation35_spill] sm:$0xff] }
 0x1e6   :  { %v3862_v16 = vpop.eup %3861  ;;  %v1535_v17 = vadd.f32 1.0, %v3860_v30  ;;  %v5934_v30 = vld [vmem:[#allocation36_spill] sm:$0xff] }
 0x1e7   :  { %v1541_v14 = vadd.f32 1.0, %v3862_v16  ;;  %1604 = vmatmul.mubr.bf16.vlgmr.msra.gmra.mrb[40].mxu0 %v1570_v26  ;;  %1645 = vmatmul.mubr.bf16.vlgmr.msra.gmra.mrb[40].mxu1 %v1570_v26  ;;  %v3864_v29 = vpop.eup %3863  ;;  %v5935_v26 = vld [vmem:[#allocation37_spill] sm:$0xff]  ;;  %v5936_v16 = vld [vmem:[#allocation38_spill] sm:$0xff] }
 0x1e8   :  { %3867 = vrcp.f32 %v1535_v17  ;;  %1659 = vmatpush1.bf16.msra.mxu0 %v4722_v41  ;;  %1700 = vmatpush1.bf16.msra.mxu1 %v4726_v42  ;;  %v3866_v15 = vpop.eup %3865  ;;  %v1548_v11 = vadd.f32 1.0, %v3864_v29  ;;  %v5937_v17 = vld [vmem:[#allocation39_spill] sm:$0xff]  ;;  %v5939_v29 = vld [vmem:[#allocation41_spill] sm:$0xff] }
 0x1e9   :  { %3869 = vrcp.f32 %v1541_v14  ;;  %1660 = vmatprep.subr.bf16.mxu0 %v4728_v43  ;;  %1701 = vmatprep.subr.bf16.mxu1 %v4731_v44  ;;  %v5938_v14 = vld [vmem:[#allocation40_spill] sm:$0xff] }
 0x1ea   :  { %1690 = vmatprep.mubr.bf16.mxu0 %v5861_v1  ;;  %1731 = vmatprep.mubr.bf16.mxu1 %v5861_v1  ;;  %3871 = vrcp.f32 %v1548_v11  ;;  %v5944_v11 = vld [vmem:[#allocation46_spill] sm:$0xff] }
 0x1ec   :  { %1661 = vmatpush1.bf16.msra.mxu0 %v4736_v45  ;;  %1702 = vmatpush1.bf16.msra.mxu1 %v4740_v46 }
 0x1ed   :  { %1662 = vmatprep.subr.bf16.mxu0 %v4742_v47  ;;  %1703 = vmatprep.subr.bf16.mxu1 %v4745_v48 }
 0x1f0   :  { %1663 = vmatpush1.bf16.msra.mxu0 %v4750_v49  ;;  %1704 = vmatpush1.bf16.msra.mxu1 %v4754_v50 }
 0x1f1   :  { %1664 = vmatprep.subr.bf16.mxu0 %v4756_v51  ;;  %1705 = vmatprep.subr.bf16.mxu1 %v4759_v52 }
 0x1f2   :  { %v3868_v18 = vpop.eup %3867 }
 0x1f3   :  { %v3870_v6 = vpop.eup %3869  ;;  %v1552_v24 = vmul.f32 %v3868_v18, %v3866_v15  ;;  %v5940_v15 = vld [vmem:[#allocation42_spill] sm:$0xff]  ;;  %v5941_v18 = vld [vmem:[#allocation43_spill] sm:$0xff] }
 0x1f4   :  { %v1551_v12 = vmul.f32 0.0, %v3870_v6  ;;  %1665 = vmatpush1.bf16.msra.mxu0 %v4762_v53  ;;  %1706 = vmatpush1.bf16.msra.mxu1 %v4766_v54  ;;  %v3872_v10 = vpop.eup %3871  ;;  %v5942_v6 = vld [vmem:[#allocation44_spill] sm:$0xff] }
 0x1f5   :  { %1666 = vmatprep.subr.bf16.mxu0 %v4768_v55  ;;  %1707 = vmatprep.subr.bf16.mxu1 %v4771_v56 }
 0x1f6   :  { %v5102_v21 = vadd.f32 %v1552_v24, %v1551_v12  ;;  %v5943_v24 = vld [vmem:[#allocation45_spill] sm:$0xff]  ;;  %v5945_v12 = vld [vmem:[#allocation47_spill] sm:$0xff] }
 0x1f8   :  { %3873 = vtanh.f32 %v5102_v21  ;;  %1667 = vmatpush1.bf16.msra.mxu0 %v4774_v57  ;;  %1708 = vmatpush1.bf16.msra.mxu1 %v4778_v58 }
 0x1f9   :  { %1668 = vmatprep.subr.bf16.mxu0 %v4780_v59  ;;  %1709 = vmatprep.subr.bf16.mxu1 %v4783_v60 }
 0x1fc   :  { %1669 = vmatpush1.bf16.msra.mxu0 %v4786_v61  ;;  %1710 = vmatpush1.bf16.msra.mxu1 %v4790_v62 }
 0x1fd   :  { %1670 = vmatprep.subr.bf16.mxu0 %v4792_v63  ;;  %1711 = vmatprep.subr.bf16.mxu1 %v5918_v22 }
 0x200   :  { %1671 = vmatpush1.bf16.msra.mxu0 %v4798_v2  ;;  %1712 = vmatpush1.bf16.msra.mxu1 %v4802_v3 }
 0x201   :  { %1672 = vmatprep.subr.bf16.mxu0 %v4804_v4  ;;  %1713 = vmatprep.subr.bf16.mxu1 %v4807_v5 }
 0x202   :  { %v3874_v20 = vpop.eup %3873 }
 0x203   :  { %v1555_v35 = vmul.f32 %v3874_v20, %v3872_v10  ;;  %v5946_v10 = vld [vmem:[#allocation48_spill] sm:$0xff]  ;;  %v5947_v20 = vld [vmem:[#allocation49_spill] sm:$0xff] }
 0x204   :  { %1673 = vmatpush1.bf16.msra.mxu0 %v4810_v7  ;;  %1714 = vmatpush1.bf16.msra.mxu1 %v4814_v0 }
 0x205   :  { %v1657_v32 = vpack.c.bf16 %v1555_v35, %v1555_v35  ;;  %1807 = vmatprep.subr.bf16.mxu0 %v4605_v8  ;;  %1848 = vmatprep.subr.bf16.mxu1 %v4608_v9  ;;  %v5925_v8 = vld [vmem:[#allocation27_spill] sm:$0xff]  ;;  %v5926_v9 = vld [vmem:[#allocation28_spill] sm:$0xff]  ;;  %v5948_v35 = vld [vmem:[#allocation50_spill] sm:$0xff] }
 0x207   :  { %1691 = vmatmul.mubr.bf16.vlgmr.msra.gmra.mrb[44].mxu0 %v1657_v32  ;;  %1732 = vmatmul.mubr.bf16.vlgmr.msra.gmra.mrb[44].mxu1 %v1657_v32  ;;  %v5949_v32 = vld [vmem:[#allocation51_spill] sm:$0xff] }
 0x208   :  { %1808 = vmatpush1.bf16.msra.mxu0 %v5919_v37  ;;  %1849 = vmatpush1.bf16.msra.mxu1 %v5920_v38  ;;  %v5950_v37 = vld [vmem:[#allocation52_spill] sm:$0xff] }
 0x209   :  { %1809 = vmatprep.subr.bf16.mxu0 %v5921_v28  ;;  %1850 = vmatprep.subr.bf16.mxu1 %v5922_v27  ;;  %v5951_v27 = vld [vmem:[#allocation54_spill] sm:$0xff] }
 0x20a   :  { %1839 = vmatprep.mubr.bf16.mxu0 %v5861_v1  ;;  %1880 = vmatprep.mubr.bf16.mxu1 %v5861_v1 }
 0x20c   :  { %1810 = vmatpush1.bf16.msra.mxu0 %v5923_v36  ;;  %1851 = vmatpush1.bf16.msra.mxu1 %v5924_v34  ;;  %v5952_v34 = vld [vmem:[#allocation56_spill] sm:$0xff] }
 0x20d   :  { %1811 = vmatprep.subr.bf16.mxu0 %v5925_v8  ;;  %1852 = vmatprep.subr.bf16.mxu1 %v5926_v9 }
 0x210   :  { %1812 = vmatpush1.bf16.msra.mxu0 %v5927_v19  ;;  %1853 = vmatpush1.bf16.msra.mxu1 %v5928_v23  ;;  %v5953_v23 = vld [vmem:[#allocation55_spill] sm:$0xff] }
 0x211   :  { %1813 = vmatprep.subr.bf16.mxu0 %v5929_v33  ;;  %1854 = vmatprep.subr.bf16.mxu1 %v5930_v39  ;;  %v5954_v39 = vld [vmem:[#allocation57_spill] sm:$0xff] }
 0x214   :  { %1814 = vmatpush1.bf16.msra.mxu0 %v5931_v31  ;;  %1855 = vmatpush1.bf16.msra.mxu1 %v5932_v25 }
 0x215   :  { %1815 = vmatprep.subr.bf16.mxu0 %v5933_v40  ;;  %1856 = vmatprep.subr.bf16.mxu1 %v5934_v30 }
 0x218   :  { %1816 = vmatpush1.bf16.msra.mxu0 %v5935_v26  ;;  %1857 = vmatpush1.bf16.msra.mxu1 %v5936_v16 }
 0x219   :  { %1817 = vmatprep.subr.bf16.mxu0 %v5937_v17  ;;  %1858 = vmatprep.subr.bf16.mxu1 %v5938_v14 }
 0x21c   :  { %1818 = vmatpush1.bf16.msra.mxu0 %v5939_v29  ;;  %1859 = vmatpush1.bf16.msra.mxu1 %v5940_v15 }
 0x21d   :  { %1819 = vmatprep.subr.bf16.mxu0 %v5941_v18  ;;  %1860 = vmatprep.subr.bf16.mxu1 %v5942_v6 }
 0x220   :  { %1820 = vmatpush1.bf16.msra.mxu0 %v5943_v24  ;;  %1861 = vmatpush1.bf16.msra.mxu1 %v5944_v11 }
 0x221   :  { %1821 = vmatprep.subr.bf16.mxu0 %v5945_v12  ;;  %1862 = vmatprep.subr.bf16.mxu1 %v5946_v10 }
 0x224   :  { %1822 = vmatpush1.bf16.msra.mxu0 %v5947_v20  ;;  %1863 = vmatpush1.bf16.msra.mxu1 %v5948_v35 }
 0x225   :  { %1894 = vmatprep.subr.bf16.mxu0 %v5949_v32  ;;  %1935 = vmatprep.subr.bf16.mxu1 %v5950_v37 }
 0x2ba   :  { %v1605_v38 = vpop.f32.mrb[40].mxu0  ;;  %v1646_v28 = vpop.f32.mrb[40].mxu1 }
 0x2bb   :  { %v1653_v36 = vadd.f32 %v1605_v38, %v5951_v27  ;;  %v1655_v8 = vadd.f32 %v1646_v28, %v5952_v34  ;;  %v1607_v9 = vpop.f32.mrb[41].mxu0  ;;  %v1648_v19 = vpop.f32.mrb[41].mxu1  ;;  %v5955_v27 = vld [vmem:[#allocation106_spill] sm:$0xff]  ;;  %v5956_v34 = vld [vmem:[#allocation108_spill] sm:$0xff] }
 0x2bc   :  { %v1654_v33 = vadd.f32 %v1607_v9, %v5953_v23  ;;  %v1656_v31 = vadd.f32 %v1648_v19, %v5954_v39  ;;  %v1609_v25 = vpop.f32.mrb[42].mxu0  ;;  %v1650_v40 = vpop.f32.mrb[42].mxu1  ;;  %v5957_v23 = vld [vmem:[#allocation107_spill] sm:$0xff]  ;;  %v5958_v39 = vld [vmem:[#allocation109_spill] sm:$0xff] }
 0x2bd   :  { %v3528_v30 = vmul.f32 -1.442695, %v1653_v36  ;;  %v1610_v26 = vpop.f32.mrb[43].mxu0  ;;  %v1651_v16 = vpop.f32.mrb[43].mxu1 }
 0x2be   :  { %v3529_v17 = vmul.f32 -1.442695, %v1654_v33  ;;  %v3530_v14 = vmul.f32 -1.442695, %v1656_v31 }
 0x2bf   :  { %3875 = vpow2.f32 %v3528_v30 }
 0x2c0   :  { %3877 = vpow2.f32 %v3529_v17 }
 0x2c1   :  { %3879 = vpow2.f32 %v3530_v14 }
 0x2c2   :  { %3881 = vtanh.f32 %v1655_v8 }
 0x2c9   :  { %v3876_v29 = vpop.eup %3875 }
 0x2ca   :  { %v3878_v15 = vpop.eup %3877  ;;  %v1747_v18 = vadd.f32 1.0, %v3876_v29 }
 0x2cb   :  { %v1753_v6 = vadd.f32 1.0, %v3878_v15  ;;  %v3880_v24 = vpop.eup %3879 }
 0x2cc   :  { %3883 = vrcp.f32 %v1747_v18  ;;  %v3882_v11 = vpop.eup %3881  ;;  %v1760_v35 = vadd.f32 1.0, %v3880_v24 }
 0x2cd   :  { %3885 = vrcp.f32 %v1753_v6 }
 0x2ce   :  { %3887 = vrcp.f32 %v1760_v35  ;;  %v5268_v35 = vld [vmem:[#allocation9 + $0xac] ss:$16 sps:$4 sm:$0xff]  }
 0x2cf   :  { %5970 = vst [vmem:[#allocation31_spill] sm:$0xff] %v5268_v35 }
 0x2d6   :  { %v3884_v12 = vpop.eup %3883 }
 0x2d7   :  { %v3886_v10 = vpop.eup %3885  ;;  %v1764_v20 = vmul.f32 %v3884_v12, %v3882_v11 }
 0x2d8   :  { %v1763_v32 = vmul.f32 %v3886_v10, %v5080_v13  ;;  %v3888_v17 = vpop.eup %3887 }
 0x2da   :  { %v5160_v37 = vadd.f32 %v1764_v20, %v1763_v32  ;;  %v1692_v38 = vpop.f32.mrb[44].mxu0  ;;  %v1733_v28 = vpop.f32.mrb[44].mxu1  ;;  %v5265_v20 = vld [vmem:[#allocation9 + $0xa4] ss:$16 sps:$4 sm:$0xff]   ;;  %v5271_v32 = vld [vmem:[#allocation9 + $0xa0] ss:$16 sps:$4 sm:$0xff]  }
 0x2db   :  { %v1740_v36 = vadd.f32 %v1692_v38, %v5955_v27  ;;  %v1742_v8 = vadd.f32 %v1733_v28, %v5956_v34  ;;  %v1694_v9 = vpop.f32.mrb[45].mxu0  ;;  %v1735_v19 = vpop.f32.mrb[45].mxu1  ;;  %5969 = vst [vmem:[#allocation30_spill] sm:$0xff] %v5265_v20  ;;  %5971 = vst [vmem:[#allocation32_spill] sm:$0xff] %v5271_v32  ;;  %v5274_v38 = vld [vmem:[#allocation9 + $0xa8] ss:$16 sps:$4 sm:$0xff]  }
 0x2dc   :  { %v1741_v33 = vadd.f32 %v1694_v9, %v5957_v23  ;;  %v1743_v31 = vadd.f32 %v1735_v19, %v5958_v39  ;;  %v1696_v25 = vpop.f32.mrb[46].mxu0  ;;  %v1737_v40 = vpop.f32.mrb[46].mxu1  ;;  %3889 = vtanh.f32 %v5160_v37  ;;  %5972 = vst [vmem:[#allocation33_spill] sm:$0xff] %v5274_v38  ;;  %v5277_v28 = vld [vmem:[#allocation9 + $0xc4] ss:$16 sps:$4 sm:$0xff]  }
 0x2dd   :  { %v3531_v13 = vmul.f32 -1.442695, %v1740_v36  ;;  %v1697_v30 = vpop.f32.mrb[47].mxu0  ;;  %v1738_v26 = vpop.f32.mrb[47].mxu1  ;;  %5973 = vst [vmem:[#allocation34_spill] sm:$0xff] %v5277_v28  ;;  %v5983_v40 = vld [vmem:[#allocation58_spill] sm:$0xff] }
 0x2de   :  { %v3532_v16 = vmul.f32 -1.442695, %v1741_v33  ;;  %v3533_v29 = vmul.f32 -1.442695, %v1743_v31  ;;  %v5280_v27 = vld [vmem:[#allocation9 + $0xcc] ss:$16 sps:$4 sm:$0xff]  }
 0x2df   :  { %3891 = vpow2.f32 %v3531_v13  ;;  %5974 = vst [vmem:[#allocation35_spill] sm:$0xff] %v5280_v27  ;;  %v5283_v36 = vld [vmem:[#allocation9 + $0xc0] ss:$16 sps:$4 sm:$0xff]   ;;  %v5286_v34 = vld [vmem:[#allocation9 + $0xc8] ss:$16 sps:$4 sm:$0xff]  }
 0x2e0   :  { %3893 = vpow2.f32 %v3532_v16  ;;  %5975 = vst [vmem:[#allocation36_spill] sm:$0xff] %v5283_v36  ;;  %5976 = vst [vmem:[#allocation37_spill] sm:$0xff] %v5286_v34  ;;  %v5292_v9 = vld [vmem:[#allocation9 + $0xec] ss:$16 sps:$4 sm:$0xff]   ;;  %v5295_v19 = vld [vmem:[#allocation9 + $0xe0] ss:$16 sps:$4 sm:$0xff]  }
 0x2e1   :  { %3895 = vpow2.f32 %v3533_v29  ;;  %5978 = vst [vmem:[#allocation39_spill] sm:$0xff] %v5292_v9  ;;  %5979 = vst [vmem:[#allocation40_spill] sm:$0xff] %v5295_v19  ;;  %v5298_v23 = vld [vmem:[#allocation9 + $0xe8] ss:$16 sps:$4 sm:$0xff]   ;;  %v5301_v33 = vld [vmem:[#allocation11 + $0x4] ss:$16 sps:$4 sm:$0xff]  }
 0x2e2   :  { %3897 = vtanh.f32 %v1742_v8  ;;  %v5289_v8 = vld [vmem:[#allocation9 + $0xe4] ss:$16 sps:$4 sm:$0xff]   ;;  %5980 = vst [vmem:[#allocation41_spill] sm:$0xff] %v5298_v23  ;;  %5981 = vst [vmem:[#allocation42_spill] sm:$0xff] %v5301_v33  ;;  %v5304_v39 = vld [vmem:[#allocation11 + $0xc] ss:$16 sps:$4 sm:$0xff]  }
 0x2e3   :  { %5977 = vst [vmem:[#allocation38_spill] sm:$0xff] %v5289_v8  ;;  %5982 = vst [vmem:[#allocation43_spill] sm:$0xff] %v5304_v39  ;;  %v5984_v30 = vld [vmem:[#allocation60_spill] sm:$0xff] }
 0x2e6   :  { %v3890_v14 = vpop.eup %3889 }
 0x2e7   :  { %v1767_v15 = vmul.f32 %v3890_v14, %v3888_v17  ;;  %v5985_v14 = vld [vmem:[#allocation59_spill] sm:$0xff] }
 0x2e9   :  { %v3892_v18 = vpop.eup %3891  ;;  %v1806_v6 = vpack.c.bf16 %v1767_v15, %v1767_v15  ;;  %v5986_v15 = vld [vmem:[#allocation62_spill] sm:$0xff] }
 0x2ea   :  { %v3894_v24 = vpop.eup %3893  ;;  %v1771_v11 = vadd.f32 1.0, %v3892_v18 }
 0x2eb   :  { %v1777_v12 = vadd.f32 1.0, %v3894_v24  ;;  %1840 = vmatmul.mubr.bf16.vlgmr.msra.gmra.mrb[48].mxu0 %v1806_v6  ;;  %1881 = vmatmul.mubr.bf16.vlgmr.msra.gmra.mrb[48].mxu1 %v1806_v6 }
 0x2ec   :  { %3899 = vrcp.f32 %v1771_v11  ;;  %1895 = vmatpush1.bf16.msra.mxu0 %v4722_v41  ;;  %1936 = vmatpush1.bf16.msra.mxu1 %v4726_v42  ;;  %v3896_v41 = vpop.eup %3895 }
 0x2ed   :  { %3901 = vrcp.f32 %v1777_v12  ;;  %1896 = vmatprep.subr.bf16.mxu0 %v4728_v43  ;;  %1937 = vmatprep.subr.bf16.mxu1 %v4731_v44  ;;  %v3898_v42 = vpop.eup %3897 }
 0x2ee   :  { %1926 = vmatprep.mubr.bf16.mxu0 %v5861_v1  ;;  %1967 = vmatprep.mubr.bf16.mxu1 %v5861_v1 }
 0x2f0   :  { %1897 = vmatpush1.bf16.msra.mxu0 %v4736_v45  ;;  %1938 = vmatpush1.bf16.msra.mxu1 %v4740_v46  ;;  %v1784_v45 = vadd.f32 1.0, %v3896_v41 }
 0x2f1   :  { %1898 = vmatprep.subr.bf16.mxu0 %v4742_v47  ;;  %1939 = vmatprep.subr.bf16.mxu1 %v4745_v48 }
 0x2f2   :  { %3903 = vrcp.f32 %v1784_v45 }
 0x2f4   :  { %1899 = vmatpush1.bf16.msra.mxu0 %v4750_v49  ;;  %1940 = vmatpush1.bf16.msra.mxu1 %v4754_v50 }
 0x2f5   :  { %1900 = vmatprep.subr.bf16.mxu0 %v4756_v51  ;;  %1941 = vmatprep.subr.bf16.mxu1 %v4759_v52  ;;  %v5203_v52 = vld [vmem:[#allocation9 + $0x4] ss:$16 sps:$4 sm:$0xff]  }
 0x2f6   :  { %v3900_v43 = vpop.eup %3899 }
 0x2f7   :  { %v3902_v44 = vpop.eup %3901  ;;  %v1788_v10 = vmul.f32 %v3900_v43, %v3898_v42 }
 0x2f8   :  { %v1787_v46 = vmul.f32 %v3902_v44, %v5102_v21  ;;  %1901 = vmatpush1.bf16.msra.mxu0 %v4762_v53  ;;  %1942 = vmatpush1.bf16.msra.mxu1 %v4766_v54  ;;  %v5206_v53 = vld [vmem:[#allocation9 + $0xc] ss:$16 sps:$4 sm:$0xff]   ;;  %v5209_v54 = vld [vmem:[#allocation9] ss:$16 sps:$4 sm:$0xff]  }
 0x2f9   :  { %1902 = vmatprep.subr.bf16.mxu0 %v4768_v55  ;;  %1943 = vmatprep.subr.bf16.mxu1 %v4771_v56  ;;  %v5212_v55 = vld [vmem:[#allocation9 + $0x8] ss:$16 sps:$4 sm:$0xff]   ;;  %v5218_v56 = vld [vmem:[#allocation9 + $0x2c] ss:$16 sps:$4 sm:$0xff]   ;;  %v5259_v21 = vld [vmem:[#allocation9 + $0x80] ss:$16 sps:$4 sm:$0xff]  }
 0x2fa   :  { %v5186_v47 = vadd.f32 %v1788_v10, %v1787_v46  ;;  %5967 = vst [vmem:[#allocation28_spill] sm:$0xff] %v5259_v21 }
 0x2fc   :  { %1903 = vmatpush1.bf16.msra.mxu0 %v4774_v57  ;;  %1944 = vmatpush1.bf16.msra.mxu1 %v4778_v58  ;;  %3905 = vtanh.f32 %v5186_v47  ;;  %v3904_v48 = vpop.eup %3903  ;;  %v5223_v57 = vld [vmem:[#allocation9 + $0x20] ss:$16 sps:$4 sm:$0xff]   ;;  %v5226_v58 = vld [vmem:[#allocation9 + $0x28] ss:$16 sps:$4 sm:$0xff]  }
 0x2fd   :  { %1904 = vmatprep.subr.bf16.mxu0 %v4780_v59  ;;  %1945 = vmatprep.subr.bf16.mxu1 %v4783_v60  ;;  %v5229_v59 = vld [vmem:[#allocation9 + $0x44] ss:$16 sps:$4 sm:$0xff]   ;;  %v5232_v60 = vld [vmem:[#allocation9 + $0x4c] ss:$16 sps:$4 sm:$0xff]  }
 0x300   :  { %1905 = vmatpush1.bf16.msra.mxu0 %v4786_v61  ;;  %1946 = vmatpush1.bf16.msra.mxu1 %v4790_v62  ;;  %v5235_v61 = vld [vmem:[#allocation9 + $0x40] ss:$16 sps:$4 sm:$0xff]   ;;  %v5238_v62 = vld [vmem:[#allocation9 + $0x48] ss:$16 sps:$4 sm:$0xff]  }
 0x301   :  { %1906 = vmatprep.subr.bf16.mxu0 %v4792_v63  ;;  %1947 = vmatprep.subr.bf16.mxu1 %v5918_v22  ;;  %5959 = vst [vmem:[#allocation53_spill] sm:$0xff] %v5235_v61  ;;  %5960 = vst [vmem:[#allocation21_spill] sm:$0xff] %v5238_v62  ;;  %v5241_v63 = vld [vmem:[#allocation9 + $0x64] ss:$16 sps:$4 sm:$0xff]   ;;  %v5262_v22 = vld [vmem:[#allocation9 + $0x88] ss:$16 sps:$4 sm:$0xff]  }
 0x302   :  { %5961 = vst [vmem:[#allocation22_spill] sm:$0xff] %v5241_v63  ;;  %5968 = vst [vmem:[#allocation29_spill] sm:$0xff] %v5262_v22 }
 0x304   :  { %1907 = vmatpush1.bf16.msra.mxu0 %v4798_v2  ;;  %1948 = vmatpush1.bf16.msra.mxu1 %v4802_v3  ;;  %v5244_v2 = vld [vmem:[#allocation9 + $0x6c] ss:$16 sps:$4 sm:$0xff]   ;;  %v5247_v3 = vld [vmem:[#allocation9 + $0x60] ss:$16 sps:$4 sm:$0xff]  }
 0x305   :  { %1908 = vmatprep.subr.bf16.mxu0 %v4804_v4  ;;  %1949 = vmatprep.subr.bf16.mxu1 %v4807_v5  ;;  %5962 = vst [vmem:[#allocation23_spill] sm:$0xff] %v5244_v2  ;;  %5963 = vst [vmem:[#allocation24_spill] sm:$0xff] %v5247_v3  ;;  %v5250_v4 = vld [vmem:[#allocation9 + $0x68] ss:$16 sps:$4 sm:$0xff]   ;;  %v5253_v5 = vld [vmem:[#allocation9 + $0x84] ss:$16 sps:$4 sm:$0xff]  }
 0x306   :  { %v3906_v49 = vpop.eup %3905  ;;  %5964 = vst [vmem:[#allocation25_spill] sm:$0xff] %v5250_v4  ;;  %5965 = vst [vmem:[#allocation26_spill] sm:$0xff] %v5253_v5 }
 0x307   :  { %v1791_v50 = vmul.f32 %v3906_v49, %v3904_v48 }
 0x308   :  { %1909 = vmatpush1.bf16.msra.mxu0 %v4810_v7  ;;  %1950 = vmatpush1.bf16.msra.mxu1 %v4814_v0  ;;  %v5215_v0 = vld [vmem:[#allocation9 + $0x24] ss:$16 sps:$4 sm:$0xff]   ;;  %v5256_v7 = vld [vmem:[#allocation9 + $0x8c] ss:$16 sps:$4 sm:$0xff]  }
 0x309   :  { %v1893_v51 = vpack.c.bf16 %v1791_v50, %v1791_v50  ;;  %2043 = vmatprep.subr.bf16.mxu0 %v5203_v52  ;;  %2084 = vmatprep.subr.bf16.mxu1 %v5206_v53  ;;  %5966 = vst [vmem:[#allocation27_spill] sm:$0xff] %v5256_v7 }
 0x30b   :  { %1927 = vmatmul.mubr.bf16.vlgmr.msra.gmra.mrb[52].mxu0 %v1893_v51  ;;  %1968 = vmatmul.mubr.bf16.vlgmr.msra.gmra.mrb[52].mxu1 %v1893_v51 }
 0x30c   :  { %2044 = vmatpush1.bf16.msra.mxu0 %v5209_v54  ;;  %2085 = vmatpush1.bf16.msra.mxu1 %v5212_v55 }
 0x30d   :  { %2045 = vmatprep.subr.bf16.mxu0 %v5215_v0  ;;  %2086 = vmatprep.subr.bf16.mxu1 %v5218_v56 }
 0x30e   :  { %2075 = vmatprep.mubr.bf16.mxu0 %v5861_v1  ;;  %2116 = vmatprep.mubr.bf16.mxu1 %v5861_v1 }
 0x310   :  { %2046 = vmatpush1.bf16.msra.mxu0 %v5223_v57  ;;  %2087 = vmatpush1.bf16.msra.mxu1 %v5226_v58 }
 0x311   :  { %2047 = vmatprep.subr.bf16.mxu0 %v5229_v59  ;;  %2088 = vmatprep.subr.bf16.mxu1 %v5232_v60 }
 0x314   :  { %2048 = vmatpush1.bf16.msra.mxu0 %v5235_v61  ;;  %2089 = vmatpush1.bf16.msra.mxu1 %v5238_v62 }
 0x315   :  { %2049 = vmatprep.subr.bf16.mxu0 %v5241_v63  ;;  %2090 = vmatprep.subr.bf16.mxu1 %v5244_v2 }
 0x318   :  { %2050 = vmatpush1.bf16.msra.mxu0 %v5247_v3  ;;  %2091 = vmatpush1.bf16.msra.mxu1 %v5250_v4 }
 0x319   :  { %2051 = vmatprep.subr.bf16.mxu0 %v5253_v5  ;;  %2092 = vmatprep.subr.bf16.mxu1 %v5256_v7 }
 0x31c   :  { %2052 = vmatpush1.bf16.msra.mxu0 %v5259_v21  ;;  %2093 = vmatpush1.bf16.msra.mxu1 %v5262_v22 }
 0x31d   :  { %2053 = vmatprep.subr.bf16.mxu0 %v5265_v20  ;;  %2094 = vmatprep.subr.bf16.mxu1 %v5268_v35 }
 0x320   :  { %2054 = vmatpush1.bf16.msra.mxu0 %v5271_v32  ;;  %2095 = vmatpush1.bf16.msra.mxu1 %v5274_v38 }
 0x321   :  { %2055 = vmatprep.subr.bf16.mxu0 %v5277_v28  ;;  %2096 = vmatprep.subr.bf16.mxu1 %v5280_v27 }
 0x324   :  { %2056 = vmatpush1.bf16.msra.mxu0 %v5283_v36  ;;  %2097 = vmatpush1.bf16.msra.mxu1 %v5286_v34 }
 0x325   :  { %2057 = vmatprep.subr.bf16.mxu0 %v5289_v8  ;;  %2098 = vmatprep.subr.bf16.mxu1 %v5292_v9 }
 0x328   :  { %2058 = vmatpush1.bf16.msra.mxu0 %v5295_v19  ;;  %2099 = vmatpush1.bf16.msra.mxu1 %v5298_v23 }
 0x329   :  { %2130 = vmatprep.subr.bf16.mxu0 %v5301_v33  ;;  %2171 = vmatprep.subr.bf16.mxu1 %v5304_v39 }
 0x3be   :  { %v1841_v31 = vpop.f32.mrb[48].mxu0  ;;  %v1882_v25 = vpop.f32.mrb[48].mxu1 }
 0x3bf   :  { %v1889_v13 = vadd.f32 %v1841_v31, %v5983_v40  ;;  %v1891_v26 = vadd.f32 %v1882_v25, %v5984_v30  ;;  %v1843_v16 = vpop.f32.mrb[49].mxu0  ;;  %v1884_v17 = vpop.f32.mrb[49].mxu1 }
 0x3c0   :  { %v1890_v29 = vadd.f32 %v1843_v16, %v5985_v14  ;;  %v1892_v18 = vadd.f32 %v1884_v17, %v5986_v15  ;;  %v1845_v6 = vpop.f32.mrb[50].mxu0  ;;  %v1886_v24 = vpop.f32.mrb[50].mxu1  ;;  %v5987_v17 = vld [vmem:[#allocation101_spill] sm:$0xff] }
 0x3c1   :  { %v3534_v11 = vmul.f32 -1.442695, %v1889_v13  ;;  %v1846_v12 = vpop.f32.mrb[51].mxu0  ;;  %v1887_v41 = vpop.f32.mrb[51].mxu1  ;;  %v5989_v6 = vld [vmem:[#allocation103_spill] sm:$0xff] }
 0x3c2   :  { %v3535_v42 = vmul.f32 -1.442695, %v1890_v29  ;;  %v3536_v43 = vmul.f32 -1.442695, %v1892_v18  ;;  %v5988_v29 = vld [vmem:[#allocation104_spill] sm:$0xff] }
 0x3c3   :  { %3907 = vpow2.f32 %v3534_v11  ;;  %v5990_v11 = vld [vmem:[#allocation105_spill] sm:$0xff] }
 0x3c4   :  { %3909 = vpow2.f32 %v3535_v42 }
 0x3c5   :  { %3911 = vpow2.f32 %v3536_v43 }
 0x3c6   :  { %3913 = vtanh.f32 %v1891_v26 }
 0x3cd   :  { %v3908_v44 = vpop.eup %3907 }
 0x3ce   :  { %v3910_v10 = vpop.eup %3909  ;;  %v1983_v45 = vadd.f32 1.0, %v3908_v44 }
 0x3cf   :  { %v1989_v46 = vadd.f32 1.0, %v3910_v10  ;;  %v3912_v48 = vpop.eup %3911 }
 0x3d0   :  { %3915 = vrcp.f32 %v1983_v45  ;;  %v3914_v49 = vpop.eup %3913  ;;  %v1996_v25 = vadd.f32 1.0, %v3912_v48 }
 0x3d1   :  { %3917 = vrcp.f32 %v1989_v46 }
 0x3d2   :  { %3919 = vrcp.f32 %v1996_v25 }
 0x3da   :  { %v3916_v50 = vpop.eup %3915 }
 0x3db   :  { %v3918_v51 = vpop.eup %3917  ;;  %v2000_v31 = vmul.f32 %v3916_v50, %v3914_v49 }
 0x3dc   :  { %v1999_v40 = vmul.f32 %v3918_v51, %v5160_v37  ;;  %v3920_v45 = vpop.eup %3919 }
 0x3de   :  { %v5312_v13 = vadd.f32 %v2000_v31, %v1999_v40  ;;  %v1928_v30 = vpop.f32.mrb[52].mxu0  ;;  %v1969_v16 = vpop.f32.mrb[52].mxu1 }
 0x3df   :  { %v1976_v14 = vadd.f32 %v1928_v30, %v5987_v17  ;;  %v1978_v26 = vadd.f32 %v1969_v16, %v5988_v29  ;;  %v1930_v15 = vpop.f32.mrb[53].mxu0  ;;  %v1971_v18 = vpop.f32.mrb[53].mxu1  ;;  %v5319_v30 = vld [vmem:[#allocation11] ss:$16 sps:$4 sm:$0xff]   ;;  %v5322_v16 = vld [vmem:[#allocation11 + $0x8] ss:$16 sps:$4 sm:$0xff]  }
 0x3e0   :  { %v1977_v24 = vadd.f32 %v1930_v15, %v5989_v6  ;;  %v1979_v12 = vadd.f32 %v1971_v18, %v5990_v11  ;;  %v1932_v41 = vpop.f32.mrb[54].mxu0  ;;  %v1973_v42 = vpop.f32.mrb[54].mxu1  ;;  %3921 = vtanh.f32 %v5312_v13  ;;  %v5325_v17 = vld [vmem:[#allocation11 + $0x24] ss:$16 sps:$4 sm:$0xff]   ;;  %v5333_v29 = vld [vmem:[#allocation11 + $0x20] ss:$16 sps:$4 sm:$0xff]  }
 0x3e1   :  { %v3537_v37 = vmul.f32 -1.442695, %v1976_v14  ;;  %v1933_v43 = vpop.f32.mrb[55].mxu0  ;;  %v1974_v44 = vpop.f32.mrb[55].mxu1  ;;  %v5328_v14 = vld [vmem:[#allocation11 + $0x2c] ss:$16 sps:$4 sm:$0xff]  }
 0x3e2   :  { %v3538_v10 = vmul.f32 -1.442695, %v1977_v24  ;;  %v3539_v48 = vmul.f32 -1.442695, %v1979_v12  ;;  %v5339_v15 = vld [vmem:[#allocation11 + $0x44] ss:$16 sps:$4 sm:$0xff]  }
 0x3e3   :  { %3923 = vpow2.f32 %v3537_v37  ;;  %v5342_v18 = vld [vmem:[#allocation11 + $0x4c] ss:$16 sps:$4 sm:$0xff]   ;;  %v5345_v24 = vld [vmem:[#allocation11 + $0x40] ss:$16 sps:$4 sm:$0xff]   ;;  %v5348_v11 = vld [vmem:[#allocation11 + $0x48] ss:$16 sps:$4 sm:$0xff]  }
 0x3e4   :  { %3925 = vpow2.f32 %v3538_v10  ;;  %v5351_v41 = vld [vmem:[#allocation11 + $0x64] ss:$16 sps:$4 sm:$0xff]   ;;  %v5354_v42 = vld [vmem:[#allocation11 + $0x6c] ss:$16 sps:$4 sm:$0xff]  }
 0x3e5   :  { %3927 = vpow2.f32 %v3539_v48  ;;  %v5361_v48 = vld [vmem:[#allocation11 + $0x68] ss:$16 sps:$4 sm:$0xff]  }
 0x3e6   :  { %3929 = vtanh.f32 %v1978_v26  ;;  %v5336_v26 = vld [vmem:[#allocation11 + $0x28] ss:$16 sps:$4 sm:$0xff]  }
 0x3ea   :  { %v3922_v46 = vpop.eup %3921 }
 0x3eb   :  { %v2003_v49 = vmul.f32 %v3922_v46, %v3920_v45  ;;  %v5358_v46 = vld [vmem:[#allocation11 + $0x60] ss:$16 sps:$4 sm:$0xff]  }
 0x3ed   :  { %v3924_v50 = vpop.eup %3923  ;;  %v2042_v51 = vpack.c.bf16 %v2003_v49, %v2003_v49  ;;  %v5364_v49 = vld [vmem:[#allocation11 + $0x84] ss:$16 sps:$4 sm:$0xff]  }
 0x3ee   :  { %v3926_v31 = vpop.eup %3925  ;;  %v2007_v25 = vadd.f32 1.0, %v3924_v50  ;;  %v5367_v50 = vld [vmem:[#allocation11 + $0x8c] ss:$16 sps:$4 sm:$0xff]  }
 0x3ef   :  { %v2013_v40 = vadd.f32 1.0, %v3926_v31  ;;  %2076 = vmatmul.mubr.bf16.vlgmr.msra.gmra.mrb[56].mxu0 %v2042_v51  ;;  %2117 = vmatmul.mubr.bf16.vlgmr.msra.gmra.mrb[56].mxu1 %v2042_v51  ;;  %v3928_v6 = vpop.eup %3927  ;;  %v5375_v31 = vld [vmem:[#allocation11 + $0x88] ss:$16 sps:$4 sm:$0xff]  }
 0x3f0   :  { %3931 = vrcp.f32 %v2007_v25  ;;  %2131 = vmatpush1.bf16.msra.mxu0 %v5319_v30  ;;  %2172 = vmatpush1.bf16.msra.mxu1 %v5322_v16  ;;  %v3930_v12 = vpop.eup %3929  ;;  %v2020_v10 = vadd.f32 1.0, %v3928_v6  ;;  %v5379_v25 = vld [vmem:[#allocation11 + $0xa4] ss:$16 sps:$4 sm:$0xff]   ;;  %v5385_v6 = vld [vmem:[#allocation11 + $0xa0] ss:$16 sps:$4 sm:$0xff]  }
 0x3f1   :  { %3933 = vrcp.f32 %v2013_v40  ;;  %2132 = vmatprep.subr.bf16.mxu0 %v5325_v17  ;;  %2173 = vmatprep.subr.bf16.mxu1 %v5328_v14  ;;  %v5382_v40 = vld [vmem:[#allocation11 + $0xac] ss:$16 sps:$4 sm:$0xff]   ;;  %5992 = vst [vmem:[#allocation45_spill] sm:$0xff] %v5385_v6 }
 0x3f2   :  { %2162 = vmatprep.mubr.bf16.mxu0 %v5861_v1  ;;  %2203 = vmatprep.mubr.bf16.mxu1 %v5861_v1  ;;  %3935 = vrcp.f32 %v2020_v10  ;;  %5991 = vst [vmem:[#allocation44_spill] sm:$0xff] %v5382_v40  ;;  %v5400_v10 = vld [vmem:[#allocation11 + $0xc8] ss:$16 sps:$4 sm:$0xff]  }
 0x3f3   :  { %5997 = vst [vmem:[#allocation50_spill] sm:$0xff] %v5400_v10 }
 0x3f4   :  { %2133 = vmatpush1.bf16.msra.mxu0 %v5333_v29  ;;  %2174 = vmatpush1.bf16.msra.mxu1 %v5336_v26 }
 0x3f5   :  { %2134 = vmatprep.subr.bf16.mxu0 %v5339_v15  ;;  %2175 = vmatprep.subr.bf16.mxu1 %v5342_v18 }
 0x3f8   :  { %2135 = vmatpush1.bf16.msra.mxu0 %v5345_v24  ;;  %2176 = vmatpush1.bf16.msra.mxu1 %v5348_v11 }
 0x3f9   :  { %2136 = vmatprep.subr.bf16.mxu0 %v5351_v41  ;;  %2177 = vmatprep.subr.bf16.mxu1 %v5354_v42 }
 0x3fa   :  { %v3932_v37 = vpop.eup %3931 }
 0x3fb   :  { %v3934_v43 = vpop.eup %3933  ;;  %v2024_v44 = vmul.f32 %v3932_v37, %v3930_v12  ;;  %v5388_v12 = vld [vmem:[#allocation11 + $0xa8] ss:$16 sps:$4 sm:$0xff]   ;;  %v5391_v37 = vld [vmem:[#allocation11 + $0xc4] ss:$16 sps:$4 sm:$0xff]  }
 0x3fc   :  { %v2023_v45 = vmul.f32 %v3934_v43, %v5186_v47  ;;  %2137 = vmatpush1.bf16.msra.mxu0 %v5358_v46  ;;  %2178 = vmatpush1.bf16.msra.mxu1 %v5361_v48  ;;  %v5372_v47 = vld [vmem:[#allocation11 + $0x80] ss:$16 sps:$4 sm:$0xff]   ;;  %5993 = vst [vmem:[#allocation46_spill] sm:$0xff] %v5388_v12  ;;  %5994 = vst [vmem:[#allocation47_spill] sm:$0xff] %v5391_v37  ;;  %v5394_v43 = vld [vmem:[#allocation11 + $0xcc] ss:$16 sps:$4 sm:$0xff]  }
 0x3fd   :  { %2138 = vmatprep.subr.bf16.mxu0 %v5364_v49  ;;  %2179 = vmatprep.subr.bf16.mxu1 %v5367_v50  ;;  %5995 = vst [vmem:[#allocation48_spill] sm:$0xff] %v5394_v43 }
 0x3fe   :  { %v5370_v51 = vadd.f32 %v2024_v44, %v2023_v45  ;;  %v5397_v44 = vld [vmem:[#allocation11 + $0xc0] ss:$16 sps:$4 sm:$0xff]   ;;  %v3936_v45 = vpop.eup %3935 }
 0x3ff   :  { %5996 = vst [vmem:[#allocation49_spill] sm:$0xff] %v5397_v44 }
 0x400   :  { %2139 = vmatpush1.bf16.msra.mxu0 %v5372_v47  ;;  %2180 = vmatpush1.bf16.msra.mxu1 %v5375_v31  ;;  %3937 = vtanh.f32 %v5370_v51 }
 0x401   :  { %2140 = vmatprep.subr.bf16.mxu0 %v5379_v25  ;;  %2181 = vmatprep.subr.bf16.mxu1 %v5382_v40 }
 0x404   :  { %2141 = vmatpush1.bf16.msra.mxu0 %v5385_v6  ;;  %2182 = vmatpush1.bf16.msra.mxu1 %v5388_v12  ;;  %v5403_v6 = vld [vmem:[#allocation11 + $0xe4] ss:$16 sps:$4 sm:$0xff]   ;;  %v5406_v12 = vld [vmem:[#allocation11 + $0xec] ss:$16 sps:$4 sm:$0xff]  }
 0x405   :  { %2142 = vmatprep.subr.bf16.mxu0 %v5391_v37  ;;  %2183 = vmatprep.subr.bf16.mxu1 %v5394_v43  ;;  %v5409_v43 = vld [vmem:[#allocation11 + $0xe0] ss:$16 sps:$4 sm:$0xff]  }
 0x408   :  { %2143 = vmatpush1.bf16.msra.mxu0 %v5397_v44  ;;  %2184 = vmatpush1.bf16.msra.mxu1 %v5400_v10  ;;  %v5412_v44 = vld [vmem:[#allocation11 + $0xe8] ss:$16 sps:$4 sm:$0xff]  }
 0x409   :  { %2144 = vmatprep.subr.bf16.mxu0 %v5403_v6  ;;  %2185 = vmatprep.subr.bf16.mxu1 %v5406_v12 }
 0x40a   :  { %v3938_v37 = vpop.eup %3937 }
 0x40b   :  { %v2027_v40 = vmul.f32 %v3938_v37, %v3936_v45 }
 0x40c   :  { %2145 = vmatpush1.bf16.msra.mxu0 %v5409_v43  ;;  %2186 = vmatpush1.bf16.msra.mxu1 %v5412_v44 }
 0x40d   :  { %v2129_v10 = vpack.c.bf16 %v2027_v40, %v2027_v40  ;;  %2273 = vmatprep.subr.bf16.mxu0 %v5203_v52  ;;  %2314 = vmatprep.subr.bf16.mxu1 %v5206_v53 }
 0x40f   :  { %2163 = vmatmul.mubr.bf16.vlgmr.msra.gmra.mrb[60].mxu0 %v2129_v10  ;;  %2204 = vmatmul.mubr.bf16.vlgmr.msra.gmra.mrb[60].mxu1 %v2129_v10  ;;  %v5998_v10 = vld [vmem:[#allocation61_spill] sm:$0xff] }
 0x410   :  { %2274 = vmatpush1.bf16.msra.mxu0 %v5209_v54  ;;  %2315 = vmatpush1.bf16.msra.mxu1 %v5212_v55 }
 0x411   :  { %2275 = vmatprep.subr.bf16.mxu0 %v5215_v0  ;;  %2316 = vmatprep.subr.bf16.mxu1 %v5218_v56 }
 0x412   :  { %2305 = vmatprep.mubr.bf16.mxu0 %v5861_v1  ;;  %2346 = vmatprep.mubr.bf16.mxu1 %v5861_v1 }
 0x414   :  { %2276 = vmatpush1.bf16.msra.mxu0 %v5223_v57  ;;  %2317 = vmatpush1.bf16.msra.mxu1 %v5226_v58 }
 0x415   :  { %2277 = vmatprep.subr.bf16.mxu0 %v5229_v59  ;;  %2318 = vmatprep.subr.bf16.mxu1 %v5232_v60 }
 0x418   :  { %2278 = vmatpush1.bf16.msra.mxu0 %v5235_v61  ;;  %2319 = vmatpush1.bf16.msra.mxu1 %v5238_v62 }
 0x419   :  { %2279 = vmatprep.subr.bf16.mxu0 %v5241_v63  ;;  %2320 = vmatprep.subr.bf16.mxu1 %v5244_v2 }
 0x41c   :  { %2280 = vmatpush1.bf16.msra.mxu0 %v5247_v3  ;;  %2321 = vmatpush1.bf16.msra.mxu1 %v5250_v4 }
 0x41d   :  { %2281 = vmatprep.subr.bf16.mxu0 %v5253_v5  ;;  %2322 = vmatprep.subr.bf16.mxu1 %v5256_v7 }
 0x420   :  { %2282 = vmatpush1.bf16.msra.mxu0 %v5259_v21  ;;  %2323 = vmatpush1.bf16.msra.mxu1 %v5262_v22 }
 0x421   :  { %2283 = vmatprep.subr.bf16.mxu0 %v5265_v20  ;;  %2324 = vmatprep.subr.bf16.mxu1 %v5268_v35 }
 0x424   :  { %2284 = vmatpush1.bf16.msra.mxu0 %v5271_v32  ;;  %2325 = vmatpush1.bf16.msra.mxu1 %v5274_v38  ;;  %v6000_v38 = vld [vmem:[#allocation63_spill] sm:$0xff]  ;;  %v6001_v32 = vld [vmem:[#allocation65_spill] sm:$0xff] }
 0x425   :  { %2285 = vmatprep.subr.bf16.mxu0 %v5277_v28  ;;  %2326 = vmatprep.subr.bf16.mxu1 %v5280_v27  ;;  %v5999_v27 = vld [vmem:[#allocation64_spill] sm:$0xff] }
 0x428   :  { %2286 = vmatpush1.bf16.msra.mxu0 %v5283_v36  ;;  %2327 = vmatpush1.bf16.msra.mxu1 %v5286_v34 }
 0x429   :  { %2287 = vmatprep.subr.bf16.mxu0 %v5289_v8  ;;  %2328 = vmatprep.subr.bf16.mxu1 %v5292_v9 }
 0x42c   :  { %2288 = vmatpush1.bf16.msra.mxu0 %v5295_v19  ;;  %2329 = vmatpush1.bf16.msra.mxu1 %v5298_v23 }
 0x42d   :  { %2360 = vmatprep.subr.bf16.mxu0 %v5301_v33  ;;  %2401 = vmatprep.subr.bf16.mxu1 %v5304_v39 }
 0x4c2   :  { %v2077_v40 = vpop.f32.mrb[56].mxu0  ;;  %v2118_v37 = vpop.f32.mrb[56].mxu1 }
 0x4c3   :  { %v2125_v45 = vadd.f32 %v2077_v40, %v5998_v10  ;;  %v2127_v36 = vadd.f32 %v2118_v37, %v5999_v27  ;;  %v2079_v28 = vpop.f32.mrb[57].mxu0  ;;  %v2120_v34 = vpop.f32.mrb[57].mxu1  ;;  %v6004_v37 = vld [vmem:[#allocation99_spill] sm:$0xff] }
 0x4c4   :  { %v2126_v8 = vadd.f32 %v2079_v28, %v6000_v38  ;;  %v2128_v9 = vadd.f32 %v2120_v34, %v6001_v32  ;;  %v2081_v35 = vpop.f32.mrb[58].mxu0  ;;  %v2122_v19 = vpop.f32.mrb[58].mxu1 }
 0x4c5   :  { %v3540_v20 = vmul.f32 -1.442695, %v2125_v45  ;;  %v2082_v23 = vpop.f32.mrb[59].mxu0  ;;  %v2123_v22 = vpop.f32.mrb[59].mxu1  ;;  %v6005_v45 = vld [vmem:[#allocation102_spill] sm:$0xff] }
 0x4c6   :  { %v3541_v33 = vmul.f32 -1.442695, %v2126_v8  ;;  %v3542_v39 = vmul.f32 -1.442695, %v2128_v9  ;;  %v6002_v23 = vld [vmem:[#allocation98_spill] sm:$0xff] }
 0x4c7   :  { %3939 = vpow2.f32 %v3540_v20 }
 0x4c8   :  { %3941 = vpow2.f32 %v3541_v33  ;;  %v6003_v33 = vld [vmem:[#allocation100_spill] sm:$0xff] }
 0x4c9   :  { %3943 = vpow2.f32 %v3542_v39 }
 0x4ca   :  { %3945 = vtanh.f32 %v2127_v36 }
 0x4d1   :  { %v3940_v21 = vpop.eup %3939 }
 0x4d2   :  { %v3942_v7 = vpop.eup %3941  ;;  %v2219_v40 = vadd.f32 1.0, %v3940_v21 }
 0x4d3   :  { %v2225_v27 = vadd.f32 1.0, %v3942_v7  ;;  %v3944_v38 = vpop.eup %3943 }
 0x4d4   :  { %3947 = vrcp.f32 %v2219_v40  ;;  %v3946_v28 = vpop.eup %3945  ;;  %v2232_v19 = vadd.f32 1.0, %v3944_v38 }
 0x4d5   :  { %3949 = vrcp.f32 %v2225_v27 }
 0x4d6   :  { %3951 = vrcp.f32 %v2232_v19 }
 0x4de   :  { %v3948_v32 = vpop.eup %3947 }
 0x4df   :  { %v3950_v35 = vpop.eup %3949  ;;  %v2236_v34 = vmul.f32 %v3948_v32, %v3946_v28 }
 0x4e0   :  { %v2235_v22 = vmul.f32 %v3950_v35, %v5312_v13 }
 0x4e2   :  { %v5456_v8 = vadd.f32 %v2236_v34, %v2235_v22  ;;  %v2164_v20 = vpop.f32.mrb[60].mxu0  ;;  %v2205_v9 = vpop.f32.mrb[60].mxu1 }
 0x4e3   :  { %v2212_v21 = vadd.f32 %v2164_v20, %v6002_v23  ;;  %v2214_v36 = vadd.f32 %v2205_v9, %v6003_v33  ;;  %v2166_v7 = vpop.f32.mrb[61].mxu0  ;;  %v2207_v39 = vpop.f32.mrb[61].mxu1 }
 0x4e4   :  { %v2213_v10 = vadd.f32 %v2166_v7, %v6004_v37  ;;  %v2215_v40 = vadd.f32 %v2207_v39, %v6005_v45  ;;  %v2168_v27 = vpop.f32.mrb[62].mxu0  ;;  %v2209_v28 = vpop.f32.mrb[62].mxu1  ;;  %3953 = vtanh.f32 %v5456_v8 }
 0x4e5   :  { %v3543_v13 = vmul.f32 -1.442695, %v2212_v21  ;;  %v2169_v38 = vpop.f32.mrb[63].mxu0  ;;  %v2210_v32 = vpop.f32.mrb[63].mxu1 }
 0x4e6   :  { %v3544_v35 = vmul.f32 -1.442695, %v2213_v10  ;;  %v3952_v34 = vpop.eup %3951  ;;  %v3545_v22 = vmul.f32 -1.442695, %v2215_v40  ;;  %v6008_v38 = vld [vmem:[#allocation46_spill] sm:$0xff]  ;;  %v6009_v32 = vld [vmem:[#allocation47_spill] sm:$0xff] }
 0x4e7   :  { %3955 = vpow2.f32 %v3543_v13  ;;  %v6007_v13 = vld [vmem:[#allocation45_spill] sm:$0xff] }
 0x4e8   :  { %3957 = vpow2.f32 %v3544_v35  ;;  %v6010_v35 = vld [vmem:[#allocation48_spill] sm:$0xff] }
 0x4e9   :  { %3959 = vpow2.f32 %v3545_v22 }
 0x4ea   :  { %3961 = vtanh.f32 %v2214_v36 }
 0x4ee   :  { %v3954_v19 = vpop.eup %3953 }
 0x4ef   :  { %v2239_v20 = vmul.f32 %v3954_v19, %v3952_v34  ;;  %v6011_v34 = vld [vmem:[#allocation49_spill] sm:$0xff]  ;;  %v6012_v19 = vld [vmem:[#allocation50_spill] sm:$0xff] }
 0x4f1   :  { %v3956_v9 = vpop.eup %3955  ;;  %v2272_v23 = vpack.c.bf16 %v2239_v20, %v2239_v20 }
 0x4f2   :  { %v3958_v33 = vpop.eup %3957  ;;  %v2243_v7 = vadd.f32 1.0, %v3956_v9 }
 0x4f3   :  { %v2249_v39 = vadd.f32 1.0, %v3958_v33  ;;  %2306 = vmatmul.mubr.bf16.vlgmr.msra.gmra.mrb[64].mxu0 %v2272_v23  ;;  %2347 = vmatmul.mubr.bf16.vlgmr.msra.gmra.mrb[64].mxu1 %v2272_v23  ;;  %v3960_v21 = vpop.eup %3959  ;;  %v6013_v33 = vld [vmem:[#allocation27_spill] sm:$0xff] }
 0x4f4   :  { %3963 = vrcp.f32 %v2243_v7  ;;  %2361 = vmatpush1.bf16.msra.mxu0 %v5319_v30  ;;  %2402 = vmatpush1.bf16.msra.mxu1 %v5322_v16  ;;  %v3962_v36 = vpop.eup %3961  ;;  %v2256_v40 = vadd.f32 1.0, %v3960_v21  ;;  %v6014_v7 = vld [vmem:[#allocation28_spill] sm:$0xff]  ;;  %v6016_v21 = vld [vmem:[#allocation30_spill] sm:$0xff] }
 0x4f5   :  { %3965 = vrcp.f32 %v2249_v39  ;;  %2362 = vmatprep.subr.bf16.mxu0 %v5325_v17  ;;  %2403 = vmatprep.subr.bf16.mxu1 %v5328_v14  ;;  %v6015_v39 = vld [vmem:[#allocation29_spill] sm:$0xff] }
 0x4f6   :  { %2392 = vmatprep.mubr.bf16.mxu0 %v5861_v1  ;;  %2433 = vmatprep.mubr.bf16.mxu1 %v5861_v1  ;;  %3967 = vrcp.f32 %v2256_v40  ;;  %v6021_v40 = vld [vmem:[#allocation35_spill] sm:$0xff] }
 0x4f8   :  { %2363 = vmatpush1.bf16.msra.mxu0 %v5333_v29  ;;  %2404 = vmatpush1.bf16.msra.mxu1 %v5336_v26 }
 0x4f9   :  { %2364 = vmatprep.subr.bf16.mxu0 %v5339_v15  ;;  %2405 = vmatprep.subr.bf16.mxu1 %v5342_v18 }
 0x4fc   :  { %2365 = vmatpush1.bf16.msra.mxu0 %v5345_v24  ;;  %2406 = vmatpush1.bf16.msra.mxu1 %v5348_v11 }
 0x4fd   :  { %2366 = vmatprep.subr.bf16.mxu0 %v5351_v41  ;;  %2407 = vmatprep.subr.bf16.mxu1 %v5354_v42 }
 0x4fe   :  { %v3964_v37 = vpop.eup %3963 }
 0x4ff   :  { %v3966_v10 = vpop.eup %3965  ;;  %v2260_v45 = vmul.f32 %v3964_v37, %v3962_v36  ;;  %v6017_v36 = vld [vmem:[#allocation31_spill] sm:$0xff]  ;;  %v6018_v37 = vld [vmem:[#allocation32_spill] sm:$0xff] }
 0x500   :  { %v2259_v27 = vmul.f32 %v3966_v10, %v5370_v51  ;;  %2367 = vmatpush1.bf16.msra.mxu0 %v5358_v46  ;;  %2408 = vmatpush1.bf16.msra.mxu1 %v5361_v48  ;;  %v6006_v51 = vld [vmem:[#allocation44_spill] sm:$0xff]  ;;  %v3968_v22 = vpop.eup %3967  ;;  %v6019_v10 = vld [vmem:[#allocation33_spill] sm:$0xff] }
 0x501   :  { %2368 = vmatprep.subr.bf16.mxu0 %v5364_v49  ;;  %2409 = vmatprep.subr.bf16.mxu1 %v5367_v50 }
 0x502   :  { %v5482_v28 = vadd.f32 %v2260_v45, %v2259_v27  ;;  %v6020_v45 = vld [vmem:[#allocation34_spill] sm:$0xff]  ;;  %v6022_v27 = vld [vmem:[#allocation36_spill] sm:$0xff] }
 0x504   :  { %2369 = vmatpush1.bf16.msra.mxu0 %v5372_v47  ;;  %2410 = vmatpush1.bf16.msra.mxu1 %v5375_v31  ;;  %3969 = vtanh.f32 %v5482_v28 }
 0x505   :  { %2370 = vmatprep.subr.bf16.mxu0 %v5379_v25  ;;  %2411 = vmatprep.subr.bf16.mxu1 %v6006_v51 }
 0x508   :  { %2371 = vmatpush1.bf16.msra.mxu0 %v6007_v13  ;;  %2412 = vmatpush1.bf16.msra.mxu1 %v6008_v38 }
 0x509   :  { %2372 = vmatprep.subr.bf16.mxu0 %v6009_v32  ;;  %2413 = vmatprep.subr.bf16.mxu1 %v6010_v35 }
 0x50c   :  { %2373 = vmatpush1.bf16.msra.mxu0 %v6011_v34  ;;  %2414 = vmatpush1.bf16.msra.mxu1 %v6012_v19 }
 0x50d   :  { %2374 = vmatprep.subr.bf16.mxu0 %v5403_v6  ;;  %2415 = vmatprep.subr.bf16.mxu1 %v5406_v12 }
 0x50e   :  { %v3970_v20 = vpop.eup %3969 }
 0x50f   :  { %v2263_v9 = vmul.f32 %v3970_v20, %v3968_v22  ;;  %v6023_v22 = vld [vmem:[#allocation37_spill] sm:$0xff]  ;;  %v6024_v20 = vld [vmem:[#allocation38_spill] sm:$0xff] }
 0x510   :  { %2375 = vmatpush1.bf16.msra.mxu0 %v5409_v43  ;;  %2416 = vmatpush1.bf16.msra.mxu1 %v5412_v44 }
 0x511   :  { %v2359_v23 = vpack.c.bf16 %v2263_v9, %v2263_v9  ;;  %2503 = vmatprep.subr.bf16.mxu0 %v5203_v52  ;;  %2544 = vmatprep.subr.bf16.mxu1 %v5206_v53  ;;  %v6025_v9 = vld [vmem:[#allocation39_spill] sm:$0xff] }
 0x513   :  { %2393 = vmatmul.mubr.bf16.vlgmr.msra.gmra.mrb[68].mxu0 %v2359_v23  ;;  %2434 = vmatmul.mubr.bf16.vlgmr.msra.gmra.mrb[68].mxu1 %v2359_v23  ;;  %v6026_v23 = vld [vmem:[#allocation40_spill] sm:$0xff] }
 0x514   :  { %2504 = vmatpush1.bf16.msra.mxu0 %v5209_v54  ;;  %2545 = vmatpush1.bf16.msra.mxu1 %v5212_v55 }
 0x515   :  { %2505 = vmatprep.subr.bf16.mxu0 %v5215_v0  ;;  %2546 = vmatprep.subr.bf16.mxu1 %v5218_v56 }
 0x516   :  { %2535 = vmatprep.mubr.bf16.mxu0 %v5861_v1  ;;  %2576 = vmatprep.mubr.bf16.mxu1 %v5861_v1 }
 0x518   :  { %2506 = vmatpush1.bf16.msra.mxu0 %v5223_v57  ;;  %2547 = vmatpush1.bf16.msra.mxu1 %v5226_v58 }
 0x519   :  { %2507 = vmatprep.subr.bf16.mxu0 %v5229_v59  ;;  %2548 = vmatprep.subr.bf16.mxu1 %v5232_v60 }
 0x51c   :  { %2508 = vmatpush1.bf16.msra.mxu0 %v5235_v61  ;;  %2549 = vmatpush1.bf16.msra.mxu1 %v5238_v62 }
 0x51d   :  { %2509 = vmatprep.subr.bf16.mxu0 %v5241_v63  ;;  %2550 = vmatprep.subr.bf16.mxu1 %v5244_v2 }
 0x520   :  { %2510 = vmatpush1.bf16.msra.mxu0 %v5247_v3  ;;  %2551 = vmatpush1.bf16.msra.mxu1 %v5250_v4  ;;  %v6033_v4 = vld [vmem:[#allocation70_spill] sm:$0xff] }
 0x521   :  { %2511 = vmatprep.subr.bf16.mxu0 %v5253_v5  ;;  %2552 = vmatprep.subr.bf16.mxu1 %v6013_v33  ;;  %v6032_v5 = vld [vmem:[#allocation67_spill] sm:$0xff] }
 0x524   :  { %2512 = vmatpush1.bf16.msra.mxu0 %v6014_v7  ;;  %2553 = vmatpush1.bf16.msra.mxu1 %v6015_v39  ;;  %v6030_v39 = vld [vmem:[#allocation66_spill] sm:$0xff]  ;;  %v6031_v7 = vld [vmem:[#allocation68_spill] sm:$0xff] }
 0x525   :  { %2513 = vmatprep.subr.bf16.mxu0 %v6016_v21  ;;  %2554 = vmatprep.subr.bf16.mxu1 %v6017_v36  ;;  %v6027_v21 = vld [vmem:[#allocation41_spill] sm:$0xff]  ;;  %v6028_v36 = vld [vmem:[#allocation42_spill] sm:$0xff] }
 0x528   :  { %2514 = vmatpush1.bf16.msra.mxu0 %v6018_v37  ;;  %2555 = vmatpush1.bf16.msra.mxu1 %v6019_v10  ;;  %v6029_v37 = vld [vmem:[#allocation43_spill] sm:$0xff] }
 0x529   :  { %2515 = vmatprep.subr.bf16.mxu0 %v6020_v45  ;;  %2556 = vmatprep.subr.bf16.mxu1 %v6021_v40 }
 0x52c   :  { %2516 = vmatpush1.bf16.msra.mxu0 %v6022_v27  ;;  %2557 = vmatpush1.bf16.msra.mxu1 %v6023_v22 }
 0x52d   :  { %2517 = vmatprep.subr.bf16.mxu0 %v6024_v20  ;;  %2558 = vmatprep.subr.bf16.mxu1 %v6025_v9 }
 0x530   :  { %2518 = vmatpush1.bf16.msra.mxu0 %v6026_v23  ;;  %2559 = vmatpush1.bf16.msra.mxu1 %v6027_v21 }
 0x531   :  { %2590 = vmatprep.subr.bf16.mxu0 %v6028_v36  ;;  %2631 = vmatprep.subr.bf16.mxu1 %v6029_v37 }
 0x5c6   :  { %v2307_v10 = vpop.f32.mrb[64].mxu0  ;;  %v2348_v45 = vpop.f32.mrb[64].mxu1 }
 0x5c7   :  { %v2355_v40 = vadd.f32 %v2307_v10, %v6030_v39  ;;  %v2357_v27 = vadd.f32 %v2348_v45, %v6031_v7  ;;  %v2309_v33 = vpop.f32.mrb[65].mxu0  ;;  %v2350_v22 = vpop.f32.mrb[65].mxu1 }
 0x5c8   :  { %v2356_v20 = vadd.f32 %v2309_v33, %v6032_v5  ;;  %v2358_v9 = vadd.f32 %v2350_v22, %v6033_v4  ;;  %v2311_v3 = vpop.f32.mrb[66].mxu0  ;;  %v2352_v23 = vpop.f32.mrb[66].mxu1 }
 0x5c9   :  { %v3546_v2 = vmul.f32 -1.442695, %v2355_v40  ;;  %v2312_v21 = vpop.f32.mrb[67].mxu0  ;;  %v2353_v63 = vpop.f32.mrb[67].mxu1  ;;  %v6034_v40 = vld [vmem:[#allocation93_spill] sm:$0xff] }
 0x5ca   :  { %v3547_v36 = vmul.f32 -1.442695, %v2356_v20  ;;  %v3548_v37 = vmul.f32 -1.442695, %v2358_v9  ;;  %v6036_v20 = vld [vmem:[#allocation95_spill] sm:$0xff]  ;;  %v6037_v23 = vld [vmem:[#allocation97_spill] sm:$0xff] }
 0x5cb   :  { %3971 = vpow2.f32 %v3546_v2 }
 0x5cc   :  { %3973 = vpow2.f32 %v3547_v36 }
 0x5cd   :  { %3975 = vpow2.f32 %v3548_v37  ;;  %v6035_v37 = vld [vmem:[#allocation96_spill] sm:$0xff] }
 0x5ce   :  { %3977 = vtanh.f32 %v2357_v27 }
 0x5d5   :  { %v3972_v62 = vpop.eup %3971 }
 0x5d6   :  { %v3974_v61 = vpop.eup %3973  ;;  %v2449_v39 = vadd.f32 1.0, %v3972_v62 }
 0x5d7   :  { %v2455_v7 = vadd.f32 1.0, %v3974_v61  ;;  %v3976_v5 = vpop.eup %3975 }
 0x5d8   :  { %3979 = vrcp.f32 %v2449_v39  ;;  %v3978_v33 = vpop.eup %3977  ;;  %v2462_v45 = vadd.f32 1.0, %v3976_v5 }
 0x5d9   :  { %3981 = vrcp.f32 %v2455_v7 }
 0x5da   :  { %3983 = vrcp.f32 %v2462_v45 }
 0x5e2   :  { %v3980_v4 = vpop.eup %3979 }
 0x5e3   :  { %v3982_v3 = vpop.eup %3981  ;;  %v2466_v10 = vmul.f32 %v3980_v4, %v3978_v33 }
 0x5e4   :  { %v2465_v63 = vmul.f32 %v3982_v3, %v5456_v8 }
 0x5e6   :  { %v5540_v21 = vadd.f32 %v2466_v10, %v2465_v63  ;;  %v2394_v2 = vpop.f32.mrb[68].mxu0  ;;  %v2435_v36 = vpop.f32.mrb[68].mxu1 }
 0x5e7   :  { %v2442_v62 = vadd.f32 %v2394_v2, %v6034_v40  ;;  %v2444_v27 = vadd.f32 %v2435_v36, %v6035_v37  ;;  %v2396_v61 = vpop.f32.mrb[69].mxu0  ;;  %v2437_v22 = vpop.f32.mrb[69].mxu1 }
 0x5e8   :  { %v2443_v9 = vadd.f32 %v2396_v61, %v6036_v20  ;;  %v2445_v39 = vadd.f32 %v2437_v22, %v6037_v23  ;;  %v2398_v7 = vpop.f32.mrb[70].mxu0  ;;  %v2439_v33 = vpop.f32.mrb[70].mxu1  ;;  %3985 = vtanh.f32 %v5540_v21 }
 0x5e9   :  { %v3549_v8 = vmul.f32 -1.442695, %v2442_v62  ;;  %v2399_v5 = vpop.f32.mrb[71].mxu0  ;;  %v2440_v4 = vpop.f32.mrb[71].mxu1 }
 0x5ea   :  { %v3550_v3 = vmul.f32 -1.442695, %v2443_v9  ;;  %v3984_v10 = vpop.eup %3983  ;;  %v3551_v63 = vmul.f32 -1.442695, %v2445_v39 }
 0x5eb   :  { %3987 = vpow2.f32 %v3549_v8 }
 0x5ec   :  { %3989 = vpow2.f32 %v3550_v3  ;;  %v6044_v3 = vld [vmem:[#allocation26_spill] sm:$0xff] }
 0x5ed   :  { %3991 = vpow2.f32 %v3551_v63  ;;  %v6051_v63 = vld [vmem:[#allocation33_spill] sm:$0xff] }
 0x5ee   :  { %3993 = vtanh.f32 %v2444_v27 }
 0x5f2   :  { %v3986_v45 = vpop.eup %3985 }
 0x5f3   :  { %v2469_v2 = vmul.f32 %v3986_v45, %v3984_v10  ;;  %v6049_v10 = vld [vmem:[#allocation31_spill] sm:$0xff]  ;;  %v6050_v45 = vld [vmem:[#allocation32_spill] sm:$0xff] }
 0x5f5   :  { %v3988_v36 = vpop.eup %3987  ;;  %v2502_v40 = vpack.c.bf16 %v2469_v2, %v2469_v2  ;;  %v6052_v2 = vld [vmem:[#allocation34_spill] sm:$0xff] }
 0x5f6   :  { %v3990_v37 = vpop.eup %3989  ;;  %v2473_v61 = vadd.f32 1.0, %v3988_v36  ;;  %v6053_v36 = vld [vmem:[#allocation35_spill] sm:$0xff] }
 0x5f7   :  { %v2479_v22 = vadd.f32 1.0, %v3990_v37  ;;  %2536 = vmatmul.mubr.bf16.vlgmr.msra.gmra.mrb[72].mxu0 %v2502_v40  ;;  %2577 = vmatmul.mubr.bf16.vlgmr.msra.gmra.mrb[72].mxu1 %v2502_v40  ;;  %v3992_v62 = vpop.eup %3991  ;;  %v6054_v40 = vld [vmem:[#allocation36_spill] sm:$0xff]  ;;  %v6055_v37 = vld [vmem:[#allocation37_spill] sm:$0xff] }
 0x5f8   :  { %3995 = vrcp.f32 %v2473_v61  ;;  %2591 = vmatpush1.bf16.msra.mxu0 %v5319_v30  ;;  %2632 = vmatpush1.bf16.msra.mxu1 %v5322_v16  ;;  %v3994_v27 = vpop.eup %3993  ;;  %v2486_v39 = vadd.f32 1.0, %v3992_v62  ;;  %v6056_v61 = vld [vmem:[#allocation38_spill] sm:$0xff]  ;;  %v6058_v62 = vld [vmem:[#allocation40_spill] sm:$0xff] }
 0x5f9   :  { %3997 = vrcp.f32 %v2479_v22  ;;  %2592 = vmatprep.subr.bf16.mxu0 %v5325_v17  ;;  %2633 = vmatprep.subr.bf16.mxu1 %v5328_v14  ;;  %v6057_v22 = vld [vmem:[#allocation39_spill] sm:$0xff] }
 0x5fa   :  { %2622 = vmatprep.mubr.bf16.mxu0 %v5861_v1  ;;  %2663 = vmatprep.mubr.bf16.mxu1 %v5861_v1  ;;  %3999 = vrcp.f32 %v2486_v39 }
 0x5fc   :  { %2593 = vmatpush1.bf16.msra.mxu0 %v5333_v29  ;;  %2634 = vmatpush1.bf16.msra.mxu1 %v5336_v26 }
 0x5fd   :  { %2594 = vmatprep.subr.bf16.mxu0 %v5339_v15  ;;  %2635 = vmatprep.subr.bf16.mxu1 %v5342_v18 }
 0x600   :  { %2595 = vmatpush1.bf16.msra.mxu0 %v5345_v24  ;;  %2636 = vmatpush1.bf16.msra.mxu1 %v5348_v11 }
 0x601   :  { %2596 = vmatprep.subr.bf16.mxu0 %v5351_v41  ;;  %2637 = vmatprep.subr.bf16.mxu1 %v5354_v42 }
 0x602   :  { %v3996_v20 = vpop.eup %3995 }
 0x603   :  { %v3998_v9 = vpop.eup %3997  ;;  %v2490_v23 = vmul.f32 %v3996_v20, %v3994_v27  ;;  %v6059_v27 = vld [vmem:[#allocation41_spill] sm:$0xff]  ;;  %v6060_v20 = vld [vmem:[#allocation42_spill] sm:$0xff] }
 0x604   :  { %v2489_v7 = vmul.f32 %v3998_v9, %v5482_v28  ;;  %2597 = vmatpush1.bf16.msra.mxu0 %v5358_v46  ;;  %2638 = vmatpush1.bf16.msra.mxu1 %v5361_v48  ;;  %v4000_v28 = vpop.eup %3999  ;;  %v6061_v9 = vld [vmem:[#allocation43_spill] sm:$0xff] }
 0x605   :  { %2598 = vmatprep.subr.bf16.mxu0 %v5364_v49  ;;  %2639 = vmatprep.subr.bf16.mxu1 %v5367_v50 }
 0x606   :  { %v5566_v33 = vadd.f32 %v2490_v23, %v2489_v7  ;;  %v6062_v7 = vld [vmem:[#allocation69_spill] sm:$0xff] }
 0x608   :  { %2599 = vmatpush1.bf16.msra.mxu0 %v5372_v47  ;;  %2640 = vmatpush1.bf16.msra.mxu1 %v5375_v31  ;;  %4001 = vtanh.f32 %v5566_v33 }
 0x609   :  { %2600 = vmatprep.subr.bf16.mxu0 %v5379_v25  ;;  %2641 = vmatprep.subr.bf16.mxu1 %v6006_v51 }
 0x60c   :  { %2601 = vmatpush1.bf16.msra.mxu0 %v6007_v13  ;;  %2642 = vmatpush1.bf16.msra.mxu1 %v6008_v38 }
 0x60d   :  { %2602 = vmatprep.subr.bf16.mxu0 %v6009_v32  ;;  %2643 = vmatprep.subr.bf16.mxu1 %v6010_v35 }
 0x610   :  { %2603 = vmatpush1.bf16.msra.mxu0 %v6011_v34  ;;  %2644 = vmatpush1.bf16.msra.mxu1 %v6012_v19 }
 0x611   :  { %2604 = vmatprep.subr.bf16.mxu0 %v5403_v6  ;;  %2645 = vmatprep.subr.bf16.mxu1 %v5406_v12 }
 0x612   :  { %v4002_v8 = vpop.eup %4001 }
 0x613   :  { %v2493_v5 = vmul.f32 %v4002_v8, %v4000_v28  ;;  %v6063_v8 = vld [vmem:[#allocation72_spill] sm:$0xff] }
 0x614   :  { %2605 = vmatpush1.bf16.msra.mxu0 %v5409_v43  ;;  %2646 = vmatpush1.bf16.msra.mxu1 %v5412_v44 }
 0x615   :  { %v2589_v4 = vpack.c.bf16 %v2493_v5, %v2493_v5  ;;  %2733 = vmatprep.subr.bf16.mxu0 %v5203_v52  ;;  %2774 = vmatprep.subr.bf16.mxu1 %v5206_v53  ;;  %v6038_v52 = vld [vmem:[#allocation53_spill] sm:$0xff] }
 0x616   :  { %v6039_v53 = vld [vmem:[#allocation21_spill] sm:$0xff] }
 0x617   :  { %2623 = vmatmul.mubr.bf16.vlgmr.msra.gmra.mrb[76].mxu0 %v2589_v4  ;;  %2664 = vmatmul.mubr.bf16.vlgmr.msra.gmra.mrb[76].mxu1 %v2589_v4 }
 0x618   :  { %2734 = vmatpush1.bf16.msra.mxu0 %v5209_v54  ;;  %2775 = vmatpush1.bf16.msra.mxu1 %v5212_v55  ;;  %v6040_v54 = vld [vmem:[#allocation22_spill] sm:$0xff]  ;;  %v6041_v55 = vld [vmem:[#allocation23_spill] sm:$0xff] }
 0x619   :  { %2735 = vmatprep.subr.bf16.mxu0 %v5215_v0  ;;  %2776 = vmatprep.subr.bf16.mxu1 %v5218_v56  ;;  %v6042_v0 = vld [vmem:[#allocation24_spill] sm:$0xff]  ;;  %v6043_v56 = vld [vmem:[#allocation25_spill] sm:$0xff] }
 0x61a   :  { %2765 = vmatprep.mubr.bf16.mxu0 %v5861_v1  ;;  %2806 = vmatprep.mubr.bf16.mxu1 %v5861_v1 }
 0x61c   :  { %2736 = vmatpush1.bf16.msra.mxu0 %v5223_v57  ;;  %2777 = vmatpush1.bf16.msra.mxu1 %v5226_v58  ;;  %v6045_v57 = vld [vmem:[#allocation27_spill] sm:$0xff]  ;;  %v6046_v58 = vld [vmem:[#allocation28_spill] sm:$0xff] }
 0x61d   :  { %2737 = vmatprep.subr.bf16.mxu0 %v5229_v59  ;;  %2778 = vmatprep.subr.bf16.mxu1 %v5232_v60  ;;  %v6047_v59 = vld [vmem:[#allocation29_spill] sm:$0xff]  ;;  %v6048_v60 = vld [vmem:[#allocation30_spill] sm:$0xff] }
 0x620   :  { %2738 = vmatpush1.bf16.msra.mxu0 %v6038_v52  ;;  %2779 = vmatpush1.bf16.msra.mxu1 %v6039_v53  ;;  %v6064_v53 = vld [vmem:[#allocation71_spill] sm:$0xff] }
 0x621   :  { %2739 = vmatprep.subr.bf16.mxu0 %v6040_v54  ;;  %2780 = vmatprep.subr.bf16.mxu1 %v6041_v55  ;;  %v6065_v55 = vld [vmem:[#allocation73_spill] sm:$0xff] }
 0x624   :  { %2740 = vmatpush1.bf16.msra.mxu0 %v6042_v0  ;;  %2781 = vmatpush1.bf16.msra.mxu1 %v6043_v56 }
 0x625   :  { %2741 = vmatprep.subr.bf16.mxu0 %v6044_v3  ;;  %2782 = vmatprep.subr.bf16.mxu1 %v6045_v57 }
 0x628   :  { %2742 = vmatpush1.bf16.msra.mxu0 %v6046_v58  ;;  %2783 = vmatpush1.bf16.msra.mxu1 %v6047_v59 }
 0x629   :  { %2743 = vmatprep.subr.bf16.mxu0 %v6048_v60  ;;  %2784 = vmatprep.subr.bf16.mxu1 %v6049_v10 }
 0x62c   :  { %2744 = vmatpush1.bf16.msra.mxu0 %v6050_v45  ;;  %2785 = vmatpush1.bf16.msra.mxu1 %v6051_v63 }
 0x62d   :  { %2745 = vmatprep.subr.bf16.mxu0 %v6052_v2  ;;  %2786 = vmatprep.subr.bf16.mxu1 %v6053_v36 }
 0x630   :  { %2746 = vmatpush1.bf16.msra.mxu0 %v6054_v40  ;;  %2787 = vmatpush1.bf16.msra.mxu1 %v6055_v37 }
 0x631   :  { %2747 = vmatprep.subr.bf16.mxu0 %v6056_v61  ;;  %2788 = vmatprep.subr.bf16.mxu1 %v6057_v22 }
 0x634   :  { %2748 = vmatpush1.bf16.msra.mxu0 %v6058_v62  ;;  %2789 = vmatpush1.bf16.msra.mxu1 %v6059_v27 }
 0x635   :  { %2820 = vmatprep.subr.bf16.mxu0 %v6060_v20  ;;  %2861 = vmatprep.subr.bf16.mxu1 %v6061_v9 }
 0x6ca   :  { %v2537_v23 = vpop.f32.mrb[72].mxu0  ;;  %v2578_v39 = vpop.f32.mrb[72].mxu1 }
 0x6cb   :  { %v2585_v28 = vadd.f32 %v2537_v23, %v6062_v7  ;;  %v2587_v5 = vadd.f32 %v2578_v39, %v6063_v8  ;;  %v2539_v4 = vpop.f32.mrb[73].mxu0  ;;  %v2580_v52 = vpop.f32.mrb[73].mxu1  ;;  %v6066_v7 = vld [vmem:[#allocation90_spill] sm:$0xff]  ;;  %v6067_v8 = vld [vmem:[#allocation92_spill] sm:$0xff] }
 0x6cc   :  { %v2586_v54 = vadd.f32 %v2539_v4, %v6064_v53  ;;  %v2588_v0 = vadd.f32 %v2580_v52, %v6065_v55  ;;  %v2541_v56 = vpop.f32.mrb[74].mxu0  ;;  %v2582_v3 = vpop.f32.mrb[74].mxu1  ;;  %v6068_v53 = vld [vmem:[#allocation91_spill] sm:$0xff]  ;;  %v6069_v55 = vld [vmem:[#allocation94_spill] sm:$0xff] }
 0x6cd   :  { %v3552_v57 = vmul.f32 -1.442695, %v2585_v28  ;;  %v2542_v58 = vpop.f32.mrb[75].mxu0  ;;  %v2583_v59 = vpop.f32.mrb[75].mxu1 }
 0x6ce   :  { %v3553_v60 = vmul.f32 -1.442695, %v2586_v54  ;;  %v3554_v10 = vmul.f32 -1.442695, %v2588_v0 }
 0x6cf   :  { %4003 = vpow2.f32 %v3552_v57 }
 0x6d0   :  { %4005 = vpow2.f32 %v3553_v60 }
 0x6d1   :  { %4007 = vpow2.f32 %v3554_v10 }
 0x6d2   :  { %4009 = vtanh.f32 %v2587_v5 }
 0x6d9   :  { %v4004_v45 = vpop.eup %4003 }
 0x6da   :  { %v4006_v63 = vpop.eup %4005  ;;  %v2679_v2 = vadd.f32 1.0, %v4004_v45 }
 0x6db   :  { %v2685_v36 = vadd.f32 1.0, %v4006_v63  ;;  %v4008_v40 = vpop.eup %4007 }
 0x6dc   :  { %4011 = vrcp.f32 %v2679_v2  ;;  %v4010_v37 = vpop.eup %4009  ;;  %v2692_v27 = vadd.f32 1.0, %v4008_v40 }
 0x6dd   :  { %4013 = vrcp.f32 %v2685_v36 }
 0x6de   :  { %4015 = vrcp.f32 %v2692_v27  ;;  %v4184_v27 = vld [vmem:[#allocation9 + $0xac] ss:$16 sps:$4 sm:$0xff]  }
 0x6e6   :  { %v4012_v61 = vpop.eup %4011 }
 0x6e7   :  { %v4014_v22 = vpop.eup %4013  ;;  %v2696_v62 = vmul.f32 %v4012_v61, %v4010_v37 }
 0x6e8   :  { %v2695_v20 = vmul.f32 %v4014_v22, %v5540_v21  ;;  %v4016_v60 = vpop.eup %4015 }
 0x6ea   :  { %v5624_v9 = vadd.f32 %v2696_v62, %v2695_v20  ;;  %v2624_v23 = vpop.f32.mrb[76].mxu0  ;;  %v2665_v39 = vpop.f32.mrb[76].mxu1  ;;  %v4183_v62 = vld [vmem:[#allocation9 + $0xa4] ss:$16 sps:$4 sm:$0xff]   ;;  %v4185_v20 = vld [vmem:[#allocation9 + $0xa0] ss:$16 sps:$4 sm:$0xff]  }
 0x6eb   :  { %v2672_v28 = vadd.f32 %v2624_v23, %v6066_v7  ;;  %v2674_v5 = vadd.f32 %v2665_v39, %v6067_v8  ;;  %v2626_v4 = vpop.f32.mrb[77].mxu0  ;;  %v2667_v52 = vpop.f32.mrb[77].mxu1  ;;  %v4186_v23 = vld [vmem:[#allocation9 + $0xa8] ss:$16 sps:$4 sm:$0xff]   ;;  %v4187_v39 = vld [vmem:[#allocation9 + $0xc4] ss:$16 sps:$4 sm:$0xff]  }
 0x6ec   :  { %v2673_v54 = vadd.f32 %v2626_v4, %v6068_v53  ;;  %v2675_v0 = vadd.f32 %v2667_v52, %v6069_v55  ;;  %v2628_v56 = vpop.f32.mrb[78].mxu0  ;;  %v2669_v3 = vpop.f32.mrb[78].mxu1  ;;  %4017 = vtanh.f32 %v5624_v9  ;;  %v4188_v7 = vld [vmem:[#allocation9 + $0xcc] ss:$16 sps:$4 sm:$0xff]   ;;  %v4190_v8 = vld [vmem:[#allocation9 + $0xc8] ss:$16 sps:$4 sm:$0xff]  }
 0x6ed   :  { %v3555_v21 = vmul.f32 -1.442695, %v2672_v28  ;;  %v2629_v57 = vpop.f32.mrb[79].mxu0  ;;  %v2670_v58 = vpop.f32.mrb[79].mxu1  ;;  %v4189_v28 = vld [vmem:[#allocation9 + $0xc0] ss:$16 sps:$4 sm:$0xff]  }
 0x6ee   :  { %v3556_v59 = vmul.f32 -1.442695, %v2673_v54  ;;  %v3557_v45 = vmul.f32 -1.442695, %v2675_v0  ;;  %v4192_v4 = vld [vmem:[#allocation9 + $0xec] ss:$16 sps:$4 sm:$0xff]  }
 0x6ef   :  { %4019 = vpow2.f32 %v3555_v21  ;;  %v4193_v52 = vld [vmem:[#allocation9 + $0xe0] ss:$16 sps:$4 sm:$0xff]   ;;  %v4194_v53 = vld [vmem:[#allocation9 + $0xe8] ss:$16 sps:$4 sm:$0xff]   ;;  %v4195_v54 = vld [vmem:[#allocation11 + $0x4] ss:$16 sps:$4 sm:$0xff]  }
 0x6f0   :  { %4021 = vpow2.f32 %v3556_v59  ;;  %v4196_v55 = vld [vmem:[#allocation11 + $0xc] ss:$16 sps:$4 sm:$0xff]   ;;  %v6070_v3 = vld [vmem:[#allocation74_spill] sm:$0xff]  ;;  %v6071_v57 = vld [vmem:[#allocation76_spill] sm:$0xff] }
 0x6f1   :  { %4023 = vpow2.f32 %v3557_v45 }
 0x6f2   :  { %4025 = vtanh.f32 %v2674_v5  ;;  %v4191_v5 = vld [vmem:[#allocation9 + $0xe4] ss:$16 sps:$4 sm:$0xff]  }
 0x6f6   :  { %v4018_v10 = vpop.eup %4017 }
 0x6f7   :  { %v2699_v63 = vmul.f32 %v4018_v10, %v4016_v60  ;;  %v6072_v10 = vld [vmem:[#allocation75_spill] sm:$0xff] }
 0x6f9   :  { %v4020_v2 = vpop.eup %4019  ;;  %v2732_v36 = vpack.c.bf16 %v2699_v63, %v2699_v63  ;;  %v6073_v63 = vld [vmem:[#allocation78_spill] sm:$0xff] }
 0x6fa   :  { %v4022_v40 = vpop.eup %4021  ;;  %v2703_v37 = vadd.f32 1.0, %v4020_v2 }
 0x6fb   :  { %v2709_v61 = vadd.f32 1.0, %v4022_v40  ;;  %2766 = vmatmul.mubr.bf16.vlgmr.msra.gmra.mrb[80].mxu0 %v2732_v36  ;;  %2807 = vmatmul.mubr.bf16.vlgmr.msra.gmra.mrb[80].mxu1 %v2732_v36 }
 0x6fc   :  { %4027 = vrcp.f32 %v2703_v37  ;;  %2821 = vmatpush1.bf16.msra.mxu0 %v5319_v30  ;;  %2862 = vmatpush1.bf16.msra.mxu1 %v5322_v16  ;;  %v4024_v30 = vpop.eup %4023 }
 0x6fd   :  { %4029 = vrcp.f32 %v2709_v61  ;;  %2822 = vmatprep.subr.bf16.mxu0 %v5325_v17  ;;  %2863 = vmatprep.subr.bf16.mxu1 %v5328_v14  ;;  %v4026_v16 = vpop.eup %4025 }
 0x6fe   :  { %2852 = vmatprep.mubr.bf16.mxu0 %v5861_v1  ;;  %2893 = vmatprep.mubr.bf16.mxu1 %v5861_v1 }
 0x700   :  { %2823 = vmatpush1.bf16.msra.mxu0 %v5333_v29  ;;  %2864 = vmatpush1.bf16.msra.mxu1 %v5336_v26  ;;  %v2716_v29 = vadd.f32 1.0, %v4024_v30 }
 0x701   :  { %2824 = vmatprep.subr.bf16.mxu0 %v5339_v15  ;;  %2865 = vmatprep.subr.bf16.mxu1 %v5342_v18 }
 0x702   :  { %4031 = vrcp.f32 %v2716_v29 }
 0x704   :  { %2825 = vmatpush1.bf16.msra.mxu0 %v5345_v24  ;;  %2866 = vmatpush1.bf16.msra.mxu1 %v5348_v11 }
 0x705   :  { %2826 = vmatprep.subr.bf16.mxu0 %v5351_v41  ;;  %2867 = vmatprep.subr.bf16.mxu1 %v5354_v42  ;;  %v4163_v42 = vld [vmem:[#allocation9 + $0x4] ss:$16 sps:$4 sm:$0xff]  }
 0x706   :  { %v4028_v17 = vpop.eup %4027 }
 0x707   :  { %v4030_v14 = vpop.eup %4029  ;;  %v2720_v22 = vmul.f32 %v4028_v17, %v4026_v16 }
 0x708   :  { %v2719_v26 = vmul.f32 %v4030_v14, %v5566_v33  ;;  %2827 = vmatpush1.bf16.msra.mxu0 %v5358_v46  ;;  %2868 = vmatpush1.bf16.msra.mxu1 %v5361_v48  ;;  %v4164_v46 = vld [vmem:[#allocation9 + $0xc] ss:$16 sps:$4 sm:$0xff]   ;;  %v4165_v48 = vld [vmem:[#allocation9] ss:$16 sps:$4 sm:$0xff]   ;;  %v4182_v33 = vld [vmem:[#allocation9 + $0x88] ss:$16 sps:$4 sm:$0xff]  }
 0x709   :  { %2828 = vmatprep.subr.bf16.mxu0 %v5364_v49  ;;  %2869 = vmatprep.subr.bf16.mxu1 %v5367_v50  ;;  %v4166_v49 = vld [vmem:[#allocation9 + $0x8] ss:$16 sps:$4 sm:$0xff]   ;;  %v4167_v50 = vld [vmem:[#allocation9 + $0x24] ss:$16 sps:$4 sm:$0xff]  }
 0x70a   :  { %v5650_v15 = vadd.f32 %v2720_v22, %v2719_v26 }
 0x70c   :  { %2829 = vmatpush1.bf16.msra.mxu0 %v5372_v47  ;;  %2870 = vmatpush1.bf16.msra.mxu1 %v5375_v31  ;;  %4033 = vtanh.f32 %v5650_v15  ;;  %v4032_v18 = vpop.eup %4031  ;;  %v4168_v47 = vld [vmem:[#allocation9 + $0x2c] ss:$16 sps:$4 sm:$0xff]   ;;  %v4169_v31 = vld [vmem:[#allocation9 + $0x20] ss:$16 sps:$4 sm:$0xff]  }
 0x70d   :  { %2830 = vmatprep.subr.bf16.mxu0 %v5379_v25  ;;  %2871 = vmatprep.subr.bf16.mxu1 %v6006_v51  ;;  %v4170_v25 = vld [vmem:[#allocation9 + $0x28] ss:$16 sps:$4 sm:$0xff]   ;;  %v4175_v51 = vld [vmem:[#allocation9 + $0x64] ss:$16 sps:$4 sm:$0xff]  }
 0x710   :  { %2831 = vmatpush1.bf16.msra.mxu0 %v6007_v13  ;;  %2872 = vmatpush1.bf16.msra.mxu1 %v6008_v38  ;;  %v4176_v13 = vld [vmem:[#allocation9 + $0x6c] ss:$16 sps:$4 sm:$0xff]   ;;  %v4177_v38 = vld [vmem:[#allocation9 + $0x60] ss:$16 sps:$4 sm:$0xff]  }
 0x711   :  { %2832 = vmatprep.subr.bf16.mxu0 %v6009_v32  ;;  %2873 = vmatprep.subr.bf16.mxu1 %v6010_v35  ;;  %v4178_v32 = vld [vmem:[#allocation9 + $0x68] ss:$16 sps:$4 sm:$0xff]   ;;  %v4179_v35 = vld [vmem:[#allocation9 + $0x84] ss:$16 sps:$4 sm:$0xff]  }
 0x714   :  { %2833 = vmatpush1.bf16.msra.mxu0 %v6011_v34  ;;  %2874 = vmatpush1.bf16.msra.mxu1 %v6012_v19  ;;  %v4180_v34 = vld [vmem:[#allocation9 + $0x8c] ss:$16 sps:$4 sm:$0xff]   ;;  %v4181_v19 = vld [vmem:[#allocation9 + $0x80] ss:$16 sps:$4 sm:$0xff]  }
 0x715   :  { %2834 = vmatprep.subr.bf16.mxu0 %v5403_v6  ;;  %2875 = vmatprep.subr.bf16.mxu1 %v5406_v12  ;;  %v4171_v6 = vld [vmem:[#allocation9 + $0x44] ss:$16 sps:$4 sm:$0xff]   ;;  %v4172_v12 = vld [vmem:[#allocation9 + $0x4c] ss:$16 sps:$4 sm:$0xff]  }
 0x716   :  { %v4034_v24 = vpop.eup %4033 }
 0x717   :  { %v2723_v11 = vmul.f32 %v4034_v24, %v4032_v18 }
 0x718   :  { %2835 = vmatpush1.bf16.msra.mxu0 %v5409_v43  ;;  %2876 = vmatpush1.bf16.msra.mxu1 %v5412_v44  ;;  %v4173_v43 = vld [vmem:[#allocation9 + $0x40] ss:$16 sps:$4 sm:$0xff]   ;;  %v4174_v44 = vld [vmem:[#allocation9 + $0x48] ss:$16 sps:$4 sm:$0xff]  }
 0x719   :  { %v2819_v41 = vpack.c.bf16 %v2723_v11, %v2723_v11  ;;  %2963 = vmatprep.subr.bf16.mxu0 %v4163_v42  ;;  %3004 = vmatprep.subr.bf16.mxu1 %v4164_v46 }
 0x71b   :  { %2853 = vmatmul.mubr.bf16.vlgmr.msra.gmra.mrb[84].mxu0 %v2819_v41  ;;  %2894 = vmatmul.mubr.bf16.vlgmr.msra.gmra.mrb[84].mxu1 %v2819_v41 }
 0x71c   :  { %2964 = vmatpush1.bf16.msra.mxu0 %v4165_v48  ;;  %3005 = vmatpush1.bf16.msra.mxu1 %v4166_v49 }
 0x71d   :  { %2965 = vmatprep.subr.bf16.mxu0 %v4167_v50  ;;  %3006 = vmatprep.subr.bf16.mxu1 %v4168_v47 }
 0x71e   :  { %2995 = vmatprep.mubr.bf16.mxu0 %v5861_v1  ;;  %3036 = vmatprep.mubr.bf16.mxu1 %v5861_v1 }
 0x720   :  { %2966 = vmatpush1.bf16.msra.mxu0 %v4169_v31  ;;  %3007 = vmatpush1.bf16.msra.mxu1 %v4170_v25  ;;  %v6074_v31 = vld [vmem:[#allocation85_spill] sm:$0xff] }
 0x721   :  { %2967 = vmatprep.subr.bf16.mxu0 %v4171_v6  ;;  %3008 = vmatprep.subr.bf16.mxu1 %v4172_v12  ;;  %v6075_v6 = vld [vmem:[#allocation88_spill] sm:$0xff] }
 0x724   :  { %2968 = vmatpush1.bf16.msra.mxu0 %v4173_v43  ;;  %3009 = vmatpush1.bf16.msra.mxu1 %v4174_v44 }
 0x725   :  { %2969 = vmatprep.subr.bf16.mxu0 %v4175_v51  ;;  %3010 = vmatprep.subr.bf16.mxu1 %v4176_v13  ;;  %v6076_v51 = vld [vmem:[#allocation87_spill] sm:$0xff] }
 0x728   :  { %2970 = vmatpush1.bf16.msra.mxu0 %v4177_v38  ;;  %3011 = vmatpush1.bf16.msra.mxu1 %v4178_v32  ;;  %v6077_v38 = vld [vmem:[#allocation89_spill] sm:$0xff] }
 0x729   :  { %2971 = vmatprep.subr.bf16.mxu0 %v4179_v35  ;;  %3012 = vmatprep.subr.bf16.mxu1 %v4180_v34 }
 0x72c   :  { %2972 = vmatpush1.bf16.msra.mxu0 %v4181_v19  ;;  %3013 = vmatpush1.bf16.msra.mxu1 %v4182_v33 }
 0x72d   :  { %2973 = vmatprep.subr.bf16.mxu0 %v4183_v62  ;;  %3014 = vmatprep.subr.bf16.mxu1 %v4184_v27 }
 0x730   :  { %2974 = vmatpush1.bf16.msra.mxu0 %v4185_v20  ;;  %3015 = vmatpush1.bf16.msra.mxu1 %v4186_v23 }
 0x731   :  { %2975 = vmatprep.subr.bf16.mxu0 %v4187_v39  ;;  %3016 = vmatprep.subr.bf16.mxu1 %v4188_v7 }
 0x734   :  { %2976 = vmatpush1.bf16.msra.mxu0 %v4189_v28  ;;  %3017 = vmatpush1.bf16.msra.mxu1 %v4190_v8 }
 0x735   :  { %2977 = vmatprep.subr.bf16.mxu0 %v4191_v5  ;;  %3018 = vmatprep.subr.bf16.mxu1 %v4192_v4 }
 0x738   :  { %2978 = vmatpush1.bf16.msra.mxu0 %v4193_v52  ;;  %3019 = vmatpush1.bf16.msra.mxu1 %v4194_v53  ;;  %v4197_v52 = vld [vmem:[#allocation11] ss:$16 sps:$4 sm:$0xff]   ;;  %v4198_v53 = vld [vmem:[#allocation11 + $0x8] ss:$16 sps:$4 sm:$0xff]  }
 0x739   :  { %3050 = vmatprep.subr.bf16.mxu0 %v4195_v54  ;;  %3091 = vmatprep.subr.bf16.mxu1 %v4196_v55  ;;  %v4199_v54 = vld [vmem:[#allocation11 + $0x24] ss:$16 sps:$4 sm:$0xff]   ;;  %v4200_v55 = vld [vmem:[#allocation11 + $0x2c] ss:$16 sps:$4 sm:$0xff]  }
 0x7ce   :  { %v2767_v0 = vpop.f32.mrb[80].mxu0  ;;  %v2808_v56 = vpop.f32.mrb[80].mxu1 }
 0x7cf   :  { %v2815_v21 = vadd.f32 %v2767_v0, %v6070_v3  ;;  %v2817_v58 = vadd.f32 %v2808_v56, %v6071_v57  ;;  %v2769_v59 = vpop.f32.mrb[81].mxu0  ;;  %v2810_v60 = vpop.f32.mrb[81].mxu1  ;;  %v4201_v0 = vld [vmem:[#allocation11 + $0x20] ss:$16 sps:$4 sm:$0xff]   ;;  %v4202_v56 = vld [vmem:[#allocation11 + $0x28] ss:$16 sps:$4 sm:$0xff]  }
 0x7d0   :  { %v2816_v45 = vadd.f32 %v2769_v59, %v6072_v10  ;;  %v2818_v2 = vadd.f32 %v2810_v60, %v6073_v63  ;;  %v2771_v36 = vpop.f32.mrb[82].mxu0  ;;  %v2812_v40 = vpop.f32.mrb[82].mxu1  ;;  %v4203_v3 = vld [vmem:[#allocation11 + $0x44] ss:$16 sps:$4 sm:$0xff]   ;;  %v4206_v59 = vld [vmem:[#allocation11 + $0x48] ss:$16 sps:$4 sm:$0xff]  }
 0x7d1   :  { %v3558_v37 = vmul.f32 -1.442695, %v2815_v21  ;;  %v2772_v61 = vpop.f32.mrb[83].mxu0  ;;  %v2813_v30 = vpop.f32.mrb[83].mxu1  ;;  %v4204_v21 = vld [vmem:[#allocation11 + $0x4c] ss:$16 sps:$4 sm:$0xff]  }
 0x7d2   :  { %v3559_v16 = vmul.f32 -1.442695, %v2816_v45  ;;  %v3560_v17 = vmul.f32 -1.442695, %v2818_v2  ;;  %v4207_v10 = vld [vmem:[#allocation11 + $0x64] ss:$16 sps:$4 sm:$0xff]  }
 0x7d3   :  { %4035 = vpow2.f32 %v3558_v37  ;;  %v4208_v45 = vld [vmem:[#allocation11 + $0x6c] ss:$16 sps:$4 sm:$0xff]   ;;  %v4209_v37 = vld [vmem:[#allocation11 + $0x60] ss:$16 sps:$4 sm:$0xff]   ;;  %v4210_v61 = vld [vmem:[#allocation11 + $0x68] ss:$16 sps:$4 sm:$0xff]  }
 0x7d4   :  { %4037 = vpow2.f32 %v3559_v16  ;;  %v4211_v30 = vld [vmem:[#allocation11 + $0x84] ss:$16 sps:$4 sm:$0xff]   ;;  %v4212_v16 = vld [vmem:[#allocation11 + $0x8c] ss:$16 sps:$4 sm:$0xff]  }
 0x7d5   :  { %4039 = vpow2.f32 %v3560_v17 }
 0x7d6   :  { %4041 = vtanh.f32 %v2817_v58  ;;  %v4205_v58 = vld [vmem:[#allocation11 + $0x40] ss:$16 sps:$4 sm:$0xff]  }
 0x7dd   :  { %v4036_v14 = vpop.eup %4035 }
 0x7de   :  { %v4038_v22 = vpop.eup %4037  ;;  %v2909_v29 = vadd.f32 1.0, %v4036_v14  ;;  %v4213_v14 = vld [vmem:[#allocation11 + $0x80] ss:$16 sps:$4 sm:$0xff]  }
 0x7df   :  { %v2915_v26 = vadd.f32 1.0, %v4038_v22  ;;  %v4040_v18 = vpop.eup %4039  ;;  %v4214_v22 = vld [vmem:[#allocation11 + $0x88] ss:$16 sps:$4 sm:$0xff]  }
 0x7e0   :  { %4043 = vrcp.f32 %v2909_v29  ;;  %v4042_v24 = vpop.eup %4041  ;;  %v2922_v46 = vadd.f32 1.0, %v4040_v18  ;;  %v4215_v29 = vld [vmem:[#allocation11 + $0xa4] ss:$16 sps:$4 sm:$0xff]   ;;  %v4218_v18 = vld [vmem:[#allocation11 + $0xa8] ss:$16 sps:$4 sm:$0xff]  }
 0x7e1   :  { %4045 = vrcp.f32 %v2915_v26  ;;  %v4217_v26 = vld [vmem:[#allocation11 + $0xa0] ss:$16 sps:$4 sm:$0xff]  }
 0x7e2   :  { %4047 = vrcp.f32 %v2922_v46 }
 0x7ea   :  { %v4044_v11 = vpop.eup %4043 }
 0x7eb   :  { %v4046_v41 = vpop.eup %4045  ;;  %v2926_v42 = vmul.f32 %v4044_v11, %v4042_v24  ;;  %v4219_v24 = vld [vmem:[#allocation11 + $0xc4] ss:$16 sps:$4 sm:$0xff]   ;;  %v4220_v11 = vld [vmem:[#allocation11 + $0xcc] ss:$16 sps:$4 sm:$0xff]  }
 0x7ec   :  { %v2925_v48 = vmul.f32 %v4046_v41, %v5624_v9  ;;  %v4048_v27 = vpop.eup %4047  ;;  %v4221_v41 = vld [vmem:[#allocation11 + $0xc0] ss:$16 sps:$4 sm:$0xff]  }
 0x7ee   :  { %v5674_v49 = vadd.f32 %v2926_v42, %v2925_v48  ;;  %v2854_v50 = vpop.f32.mrb[84].mxu0  ;;  %v2895_v47 = vpop.f32.mrb[84].mxu1  ;;  %v4222_v42 = vld [vmem:[#allocation11 + $0xc8] ss:$16 sps:$4 sm:$0xff]   ;;  %v4223_v48 = vld [vmem:[#allocation11 + $0xe4] ss:$16 sps:$4 sm:$0xff]  }
 0x7ef   :  { %v2902_v25 = vadd.f32 %v2854_v50, %v6074_v31  ;;  %v2904_v12 = vadd.f32 %v2895_v47, %v6075_v6  ;;  %v2856_v43 = vpop.f32.mrb[85].mxu0  ;;  %v2897_v44 = vpop.f32.mrb[85].mxu1  ;;  %v4224_v50 = vld [vmem:[#allocation11 + $0xec] ss:$16 sps:$4 sm:$0xff]   ;;  %v4226_v6 = vld [vmem:[#allocation11 + $0xe8] ss:$16 sps:$4 sm:$0xff]  }
 0x7f0   :  { %v2903_v13 = vadd.f32 %v2856_v43, %v6076_v51  ;;  %v2905_v32 = vadd.f32 %v2897_v44, %v6077_v38  ;;  %v2858_v35 = vpop.f32.mrb[86].mxu0  ;;  %v2899_v34 = vpop.f32.mrb[86].mxu1  ;;  %4049 = vtanh.f32 %v5674_v49  ;;  %v3184_v43 = vld [vmem:[#allocation12] sm:$0xff]  ;;  %v3185_v44 = vld [vmem:[#allocation12 + $0x8] sm:$0xff]  ;;  %v3186_v38 = vld [vmem:[#allocation12 + $0x10] sm:$0xff] }
 0x7f1   :  { %v3561_v9 = vmul.f32 -1.442695, %v2902_v25  ;;  %v2859_v19 = vpop.f32.mrb[87].mxu0  ;;  %v2900_v33 = vpop.f32.mrb[87].mxu1  ;;  %v4225_v25 = vld [vmem:[#allocation11 + $0xe0] ss:$16 sps:$4 sm:$0xff]   ;;  %v3700_v51 = vpack.c.bf16 %v3185_v44, %v3184_v43 }
 0x7f2   :  { %v3562_v62 = vmul.f32 -1.442695, %v2903_v13  ;;  %v3563_v23 = vmul.f32 -1.442695, %v2905_v32  ;;  %v4429_v13 = vmov 0.0|0.0   ;;  %v3187_v32 = vld [vmem:[#allocation12 + $0x18] sm:$0xff] }
 0x7f3   :  { %4051 = vpow2.f32 %v3561_v9  ;;  %v3703_v35 = vpack.c.bf16 %v3187_v32, %v3186_v38  ;;  %v3188_v34 = vld [vmem:[#allocation12 + $0x20] sm:$0xff]  ;;  %v3189_v9 = vld [vmem:[#allocation12 + $0x28] sm:$0xff]  ;;  %v3190_v33 = vld [vmem:[#allocation12 + $0x30] sm:$0xff] }
 0x7f4   :  { %4053 = vpow2.f32 %v3562_v62  ;;  %v3706_v19 = vpack.c.bf16 %v3189_v9, %v3188_v34  ;;  %v3191_v62 = vld [vmem:[#allocation12 + $0x38] sm:$0xff] }
 0x7f5   :  { %4055 = vpow2.f32 %v3563_v23  ;;  %v3193_v23 = vld [vmem:[#allocation12 + $0x48] sm:$0xff] }
 0x7f6   :  { %4057 = vtanh.f32 %v2904_v12 }
 0x7fa   :  { %v4050_v20 = vpop.eup %4049 }
 0x7fb   :  { %v2929_v39 = vmul.f32 %v4050_v20, %v4048_v27  ;;  %v3709_v27 = vpack.c.bf16 %v3191_v62, %v3190_v33  ;;  %v3192_v20 = vld [vmem:[#allocation12 + $0x40] sm:$0xff] }
 0x7fd   :  { %v4052_v7 = vpop.eup %4051  ;;  %v2962_v28 = vpack.c.bf16 %v2929_v39, %v2929_v39  ;;  %v3712_v39 = vpack.c.bf16 %v3193_v23, %v3192_v20 }
 0x7fe   :  { %v4054_v8 = vpop.eup %4053  ;;  %v2933_v5 = vadd.f32 1.0, %v4052_v7  ;;  %v3194_v7 = vld [vmem:[#allocation12 + $0x50] sm:$0xff] }
 0x7ff   :  { %v2939_v4 = vadd.f32 1.0, %v4054_v8  ;;  %2996 = vmatmul.mubr.bf16.vlgmr.msra.gmra.mrb[88].mxu0 %v2962_v28  ;;  %3037 = vmatmul.mubr.bf16.vlgmr.msra.gmra.mrb[88].mxu1 %v2962_v28  ;;  %v4056_v57 = vpop.eup %4055  ;;  %v3195_v28 = vld [vmem:[#allocation12 + $0x58] sm:$0xff] }
 0x800   :  { %4059 = vrcp.f32 %v2933_v5  ;;  %3051 = vmatpush1.bf16.msra.mxu0 %v4197_v52  ;;  %3092 = vmatpush1.bf16.msra.mxu1 %v4198_v53  ;;  %v4058_v60 = vpop.eup %4057  ;;  %v2946_v36 = vadd.f32 1.0, %v4056_v57  ;;  %v3715_v8 = vpack.c.bf16 %v3195_v28, %v3194_v7  ;;  %v3196_v5 = vld [vmem:[#allocation12 + $0x60] sm:$0xff]  ;;  %v3198_v53 = vld [vmem:[#allocation12 + $0x70] sm:$0xff] }
 0x801   :  { %4061 = vrcp.f32 %v2939_v4  ;;  %3052 = vmatprep.subr.bf16.mxu0 %v4199_v54  ;;  %3093 = vmatprep.subr.bf16.mxu1 %v4200_v55  ;;  %v3197_v4 = vld [vmem:[#allocation12 + $0x68] sm:$0xff]  ;;  %v3199_v54 = vld [vmem:[#allocation12 + $0x78] sm:$0xff]  ;;  %v3202_v57 = vld [vmem:[#allocation14 + $0x10] sm:$0xff] }
 0x802   :  { %3082 = vmatprep.mubr.bf16.mxu0 %v5861_v1  ;;  %3123 = vmatprep.mubr.bf16.mxu1 %v5861_v1  ;;  %4063 = vrcp.f32 %v2946_v36  ;;  %v3718_v52 = vpack.c.bf16 %v3197_v4, %v3196_v5  ;;  %v3721_v55 = vpack.c.bf16 %v3199_v54, %v3198_v53  ;;  %v3208_v36 = vld [vmem:[#allocation14 + $0x40] sm:$0xff] }
 0x803   :  { %v6083_v54 = vld [vmem:[#allocation84_spill] sm:$0xff] }
 0x804   :  { %3053 = vmatpush1.bf16.msra.mxu0 %v4201_v0  ;;  %3094 = vmatpush1.bf16.msra.mxu1 %v4202_v56  ;;  %v3200_v0 = vld [vmem:[#allocation14] sm:$0xff]  ;;  %v3201_v56 = vld [vmem:[#allocation14 + $0x8] sm:$0xff] }
 0x805   :  { %3054 = vmatprep.subr.bf16.mxu0 %v4203_v3  ;;  %3095 = vmatprep.subr.bf16.mxu1 %v4204_v21  ;;  %v4431_v3 = vmov 0.0   ;;  %v3676_v21 = vpack.c.bf16 %v3201_v56, %v3200_v0 }
 0x808   :  { %3055 = vmatpush1.bf16.msra.mxu0 %v4205_v58  ;;  %3096 = vmatpush1.bf16.msra.mxu1 %v4206_v59  ;;  %v3203_v58 = vld [vmem:[#allocation14 + $0x18] sm:$0xff] }
 0x809   :  { %3056 = vmatprep.subr.bf16.mxu0 %v4207_v10  ;;  %3097 = vmatprep.subr.bf16.mxu1 %v4208_v45  ;;  %v3679_v59 = vpack.c.bf16 %v3203_v58, %v3202_v57  ;;  %v3205_v10 = vld [vmem:[#allocation14 + $0x28] sm:$0xff]  ;;  %v6085_v57 = vld [vmem:[#allocation86_spill] sm:$0xff] }
 0x80a   :  { %v4060_v63 = vpop.eup %4059 }
 0x80b   :  { %v4062_v1 = vpop.eup %4061  ;;  %v2950_v2 = vmul.f32 %v4060_v63, %v4058_v60  ;;  %v3204_v60 = vld [vmem:[#allocation14 + $0x20] sm:$0xff]  ;;  %v3206_v63 = vld [vmem:[#allocation14 + $0x30] sm:$0xff] }
 0x80c   :  { %v2949_v40 = vmul.f32 %v4062_v1, %v5650_v15  ;;  %3057 = vmatpush1.bf16.msra.mxu0 %v4209_v37  ;;  %3098 = vmatpush1.bf16.msra.mxu1 %v4210_v61  ;;  %v4216_v15 = vld [vmem:[#allocation11 + $0xac] ss:$16 sps:$4 sm:$0xff]   ;;  %v4064_v46 = vpop.eup %4063  ;;  %v3682_v45 = vpack.c.bf16 %v3205_v10, %v3204_v60  ;;  %v3210_v61 = vld [vmem:[#allocation14 + $0x50] sm:$0xff] }
 0x80d   :  { %3058 = vmatprep.subr.bf16.mxu0 %v4211_v30  ;;  %3099 = vmatprep.subr.bf16.mxu1 %v4212_v16  ;;  %v3207_v1 = vld [vmem:[#allocation14 + $0x38] sm:$0xff]  ;;  %v3212_v16 = vld [vmem:[#allocation14 + $0x60] sm:$0xff] }
 0x80e   :  { %v5684_v17 = vadd.f32 %v2950_v2, %v2949_v40  ;;  %v3685_v2 = vpack.c.bf16 %v3207_v1, %v3206_v63  ;;  %v3209_v40 = vld [vmem:[#allocation14 + $0x48] sm:$0xff]  ;;  %v3211_v30 = vld [vmem:[#allocation14 + $0x58] sm:$0xff] }
 0x80f   :  { %v3688_v37 = vpack.c.bf16 %v3209_v40, %v3208_v36 }
 0x810   :  { %3059 = vmatpush1.bf16.msra.mxu0 %v4213_v14  ;;  %3100 = vmatpush1.bf16.msra.mxu1 %v4214_v22  ;;  %4065 = vtanh.f32 %v5684_v17  ;;  %v3691_v14 = vpack.c.bf16 %v3211_v30, %v3210_v61  ;;  %v3213_v22 = vld [vmem:[#allocation14 + $0x68] sm:$0xff] }
 0x811   :  { %3060 = vmatprep.subr.bf16.mxu0 %v4215_v29  ;;  %3101 = vmatprep.subr.bf16.mxu1 %v4216_v15  ;;  %v3694_v29 = vpack.c.bf16 %v3213_v22, %v3212_v16  ;;  %v3214_v15 = vld [vmem:[#allocation14 + $0x70] sm:$0xff] }
 0x814   :  { %3061 = vmatpush1.bf16.msra.mxu0 %v4217_v26  ;;  %3102 = vmatpush1.bf16.msra.mxu1 %v4218_v18  ;;  %v3215_v26 = vld [vmem:[#allocation14 + $0x78] sm:$0xff] }
 0x815   :  { %3062 = vmatprep.subr.bf16.mxu0 %v4219_v24  ;;  %3103 = vmatprep.subr.bf16.mxu1 %v4220_v11  ;;  %v3697_v18 = vpack.c.bf16 %v3215_v26, %v3214_v15 }
 0x818   :  { %3063 = vmatpush1.bf16.msra.mxu0 %v4221_v41  ;;  %3104 = vmatpush1.bf16.msra.mxu1 %v4222_v42  ;;  %v6078_v41 = vld [vmem:[#allocation77_spill] sm:$0xff] }
 0x819   :  { %3064 = vmatprep.subr.bf16.mxu0 %v4223_v48  ;;  %3105 = vmatprep.subr.bf16.mxu1 %v4224_v50 }
 0x81a   :  { %v4066_v47 = vpop.eup %4065 }
 0x81b   :  { %v2953_v31 = vmul.f32 %v4066_v47, %v4064_v46  ;;  %v6079_v46 = vld [vmem:[#allocation80_spill] sm:$0xff] }
 0x81c   :  { %3065 = vmatpush1.bf16.msra.mxu0 %v4225_v25  ;;  %3106 = vmatpush1.bf16.msra.mxu1 %v4226_v6  ;;  %v6081_v6 = vld [vmem:[#allocation81_spill] sm:$0xff] }
 0x81d   :  { %v3049_v12 = vpack.c.bf16 %v2953_v31, %v2953_v31  ;;  %3699 = vmatprep.subr.bf16.mxu1 %v4429_v13  ;;  %3675 = vmatprep.subr.bf16.mxu0 %v4429_v13  ;;  %v6080_v31 = vld [vmem:[#allocation79_spill] sm:$0xff] }
 0x81f   :  { %3083 = vmatmul.mubr.bf16.vlgmr.msra.gmra.mrb[92].mxu0 %v3049_v12  ;;  %3124 = vmatmul.mubr.bf16.vlgmr.msra.gmra.mrb[92].mxu1 %v3049_v12 }
 0x820   :  { %3701 = vmatpush3.bf16.msra.mxu1 %v3700_v51  ;;  %3672 = vmatprep.mubr.msk.f32.mxu1 %vm4430_vm0, %v4431_v3 }
 0x821   :  { %3702 = vmatprep.subr.bf16.mxu1 %v4429_v13  ;;  %3637 = vmatprep.mubr.msk.f32.mxu0 %vm4430_vm0, %v4431_v3  ;;  %v6084_v3 = vld [vmem:[#allocation83_spill] sm:$0xff] }
 0x822   :  { %3677 = vmatpush3.bf16.msra.mxu0 %v3676_v21 }
 0x823   :  { %3678 = vmatprep.subr.bf16.mxu0 %v4429_v13 }
 0x824   :  { %3704 = vmatpush3.bf16.msra.mxu1 %v3703_v35 }
 0x825   :  { %3705 = vmatprep.subr.bf16.mxu1 %v4429_v13 }
 0x826   :  { %3680 = vmatpush3.bf16.msra.mxu0 %v3679_v59 }
 0x827   :  { %3681 = vmatprep.subr.bf16.mxu0 %v4429_v13 }
 0x828   :  { %3707 = vmatpush3.bf16.msra.mxu1 %v3706_v19 }
 0x829   :  { %3708 = vmatprep.subr.bf16.mxu1 %v4429_v13 }
 0x82a   :  { %3683 = vmatpush3.bf16.msra.mxu0 %v3682_v45 }
 0x82b   :  { %3684 = vmatprep.subr.bf16.mxu0 %v4429_v13 }
 0x82c   :  { %3710 = vmatpush3.bf16.msra.mxu1 %v3709_v27 }
 0x82d   :  { %3711 = vmatprep.subr.bf16.mxu1 %v4429_v13 }
 0x82e   :  { %3686 = vmatpush3.bf16.msra.mxu0 %v3685_v2 }
 0x82f   :  { %3687 = vmatprep.subr.bf16.mxu0 %v4429_v13 }
 0x830   :  { %3713 = vmatpush3.bf16.msra.mxu1 %v3712_v39 }
 0x831   :  { %3714 = vmatprep.subr.bf16.mxu1 %v4429_v13 }
 0x832   :  { %3689 = vmatpush3.bf16.msra.mxu0 %v3688_v37 }
 0x833   :  { %3690 = vmatprep.subr.bf16.mxu0 %v4429_v13 }
 0x834   :  { %3716 = vmatpush3.bf16.msra.mxu1 %v3715_v8 }
 0x835   :  { %3717 = vmatprep.subr.bf16.mxu1 %v4429_v13 }
 0x836   :  { %3692 = vmatpush3.bf16.msra.mxu0 %v3691_v14 }
 0x837   :  { %3693 = vmatprep.subr.bf16.mxu0 %v4429_v13 }
 0x838   :  { %3719 = vmatpush3.bf16.msra.mxu1 %v3718_v52  ;;  %v6082_v52 = vld [vmem:[#allocation82_spill] sm:$0xff] }
 0x839   :  { %3720 = vmatprep.subr.bf16.mxu1 %v4429_v13 }
 0x83a   :  { %3695 = vmatpush3.bf16.msra.mxu0 %v3694_v29 }
 0x83b   :  { %3696 = vmatprep.subr.bf16.mxu0 %v4429_v13 }
 0x83c   :  { %3722 = vmatpush3.bf16.msra.mxu1 %v3721_v55 }
 0x83e   :  { %3698 = vmatpush3.bf16.msra.mxu0 %v3697_v18 }
 0x8d2   :  { %v2997_v24 = vpop.f32.mrb[88].mxu0  ;;  %v3038_v11 = vpop.f32.mrb[88].mxu1 }
 0x8d3   :  { %v3045_v42 = vadd.f32 %v2997_v24, %v6078_v41  ;;  %v3047_v48 = vadd.f32 %v3038_v11, %v6079_v46  ;;  %v2999_v50 = vpop.f32.mrb[89].mxu0  ;;  %v3040_v47 = vpop.f32.mrb[89].mxu1 }
 0x8d4   :  { %v3046_v25 = vadd.f32 %v2999_v50, %v6080_v31  ;;  %v3048_v12 = vadd.f32 %v3040_v47, %v6081_v6  ;;  %v3001_v43 = vpop.f32.mrb[90].mxu0  ;;  %v3042_v44 = vpop.f32.mrb[90].mxu1  ;;  %v3570_v31 = vld [vmem:[%s5735_s7] ss:$0 sm:$0xff] }
 0x8d5   :  { %v3564_v51 = vmul.f32 -1.442695, %v3045_v42  ;;  %v3002_v38 = vpop.f32.mrb[91].mxu0  ;;  %v3043_v32 = vpop.f32.mrb[91].mxu1 }
 0x8d6   :  { %v3565_v35 = vmul.f32 -1.442695, %v3046_v25  ;;  %v3566_v13 = vmul.f32 -1.442695, %v3048_v12 }
 0x8d7   :  { %4067 = vpow2.f32 %v3564_v51 }
 0x8d8   :  { %4069 = vpow2.f32 %v3565_v35 }
 0x8d9   :  { %4071 = vpow2.f32 %v3566_v13 }
 0x8da   :  { %4073 = vtanh.f32 %v3047_v48 }
 0x8e1   :  { %v4068_v34 = vpop.eup %4067 }
 0x8e2   :  { %v4070_v9 = vpop.eup %4069  ;;  %v3139_v19 = vadd.f32 1.0, %v4068_v34 }
 0x8e3   :  { %v3145_v33 = vadd.f32 1.0, %v4070_v9  ;;  %v4072_v62 = vpop.eup %4071 }
 0x8e4   :  { %4075 = vrcp.f32 %v3139_v19  ;;  %v4074_v27 = vpop.eup %4073  ;;  %v3152_v7 = vadd.f32 1.0, %v4072_v62 }
 0x8e5   :  { %4077 = vrcp.f32 %v3145_v33 }
 0x8e6   :  { %4079 = vrcp.f32 %v3152_v7 }
 0x8ee   :  { %v4076_v20 = vpop.eup %4075 }
 0x8ef   :  { %v4078_v23 = vpop.eup %4077  ;;  %v3156_v39 = vmul.f32 %v4076_v20, %v4074_v27 }
 0x8f0   :  { %v3155_v28 = vmul.f32 %v4078_v23, %v5674_v49  ;;  %v4080_v1 = vpop.eup %4079 }
 0x8f2   :  { %v3157_v8 = vadd.f32 %v3156_v39, %v3155_v28  ;;  %v3084_v5 = vpop.f32.mrb[92].mxu0  ;;  %v3125_v4 = vpop.f32.mrb[92].mxu1 }
 0x8f3   :  { %v3132_v53 = vadd.f32 %v3084_v5, %v6082_v52  ;;  %v3134_v55 = vadd.f32 %v3125_v4, %v6083_v54  ;;  %v3086_v0 = vpop.f32.mrb[93].mxu0  ;;  %v3127_v56 = vpop.f32.mrb[93].mxu1 }
 0x8f4   :  { %4081 = vtanh.f32 %v3157_v8  ;;  %v3133_v21 = vadd.f32 %v3086_v0, %v6084_v3  ;;  %v3135_v58 = vadd.f32 %v3127_v56, %v6085_v57  ;;  %v3088_v59 = vpop.f32.mrb[94].mxu0  ;;  %v3129_v60 = vpop.f32.mrb[94].mxu1 }
 0x8f5   :  { %v3567_v10 = vmul.f32 -1.442695, %v3132_v53  ;;  %v3089_v45 = vpop.f32.mrb[95].mxu0  ;;  %v3130_v49 = vpop.f32.mrb[95].mxu1 }
 0x8f6   :  { %v3568_v63 = vmul.f32 -1.442695, %v3133_v21  ;;  %v3569_v36 = vmul.f32 -1.442695, %v3135_v58 }
 0x8f7   :  { %4083 = vpow2.f32 %v3567_v10 }
 0x8f8   :  { %4085 = vpow2.f32 %v3568_v63 }
 0x8f9   :  { %4087 = vpow2.f32 %v3569_v36 }
 0x8fa   :  { %4089 = vtanh.f32 %v3134_v55 }
 0x8fe   :  { %v4082_v2 = vpop.eup %4081 }
 0x8ff   :  { %v3159_v40 = vmul.f32 %v4082_v2, %v4080_v1 }
 0x901   :  { %v4084_v37 = vpop.eup %4083  ;;  %3673 = vmatmul.mubr.f32.vlgmr.msra.gmra.mrb[96].mxu1 %v3159_v40 }
 0x902   :  { %v4086_v61 = vpop.eup %4085  ;;  %v3163_v30 = vadd.f32 1.0, %v4084_v37 }
 0x903   :  { %v3169_v16 = vadd.f32 1.0, %v4086_v61  ;;  %v4088_v14 = vpop.eup %4087 }
 0x904   :  { %4091 = vrcp.f32 %v3163_v30  ;;  %v4090_v22 = vpop.eup %4089  ;;  %v3176_v18 = vadd.f32 1.0, %v4088_v14 }
 0x905   :  { %4093 = vrcp.f32 %v3169_v16 }
 0x906   :  { %4095 = vrcp.f32 %v3176_v18 }
 0x90e   :  { %v4092_v29 = vpop.eup %4091 }
 0x90f   :  { %v4094_v15 = vpop.eup %4093  ;;  %v3180_v26 = vmul.f32 %v4092_v29, %v4090_v22 }
 0x910   :  { %v3179_v24 = vmul.f32 %v4094_v15, %v5684_v17  ;;  %v4096_v41 = vpop.eup %4095 }
 0x912   :  { %v3181_v11 = vadd.f32 %v3180_v26, %v3179_v24 }
 0x914   :  { %4097 = vtanh.f32 %v3181_v11 }
 0x91e   :  { %v4098_v42 = vpop.eup %4097 }
 0x91f   :  { %v3183_v46 = vmul.f32 %v4098_v42, %v4096_v41 }
 0x921   :  { %3638 = vmatmul.mubr.f32.vlgmr.msra.gmra.mrb[96].mxu0 %v3183_v46 }
 0x9d4   :  { %v3352_v48 = vpop.f32.mrb[96].mxu1 }
 0x9d5   :  { %v3674_v50 = vpop.f32.mrb[97].mxu1 }
 0x9f4   :  { %v3282_v47 = vpop.f32.mrb[96].mxu0 }
 0x9f5   :  { %v3353_v25 = vadd.f32 %v3352_v48, %v3282_v47  ;;  %v3639_v6 = vpop.f32.mrb[97].mxu0 }
 0x9f7   :  { %v3363_v12 = vadd.f32 %v3570_v31, %v3353_v25 }
 0x9f9   :  { %3364 = vst [vmem:[#allocation15] sm:$0xff] %v3363_v12 }
 0x9fa   :  { %4392 = shalt.err (!%p4389_p4)
}
 0x9fb   :  { %s4393_s30 = scalar_lea.hbm %s5736_s8, 128 }
 0x9fc   :  { %p4394_p5 = scmp.ne.s32.totalorder %s5736_s8, %s4393_s30  ;;  %p4397_p6 = scmp.lt.u32.totalorder %s4393_s30, %s5736_s8 }
 0x9fe   :  { %p4399_p7 = pnand %p4397_p6, %p4394_p5 }
 0xa00   :  { %4402 = shalt.err (!%p4399_p7)
}
 0xa01   :  { %3374 = dma.vmem_to_hbm [thread:$0]  %s3372_s20, 128, %s5736_s8, [#allocation5]  }
 0xa02   :  { %4411 = dma.done.wait [#allocation5], 128  }
 0xa03   :  { %4412 = vsyncadd [#allocation5], 4294967168 }
 0xa04   :  { %3378 = vsyncpa [#allocation4], 1 }
 0xa05   :  { %3379 = vsyncpa [#allocation7], 1 }
 0xa06   :  { %3380 = vsyncpa [#allocation10], 1 }
 0xa07   :  { %3381 = vsyncpa [#allocation13], 1 }
 0xa08   :  { %3382 = vsyncpa [#allocation5], 1 }

</bundles_post_ra>
